<compile_context>
chip_gen: v5e
topology: v5e:2x2
jax: 0.10.0
libtpu: 0.0.40
codegen_flags: <defaults>
</compile_context>

<pallas_src>
import jax
import jax.numpy as jnp
from jax.experimental import pallas as pl
from jax.experimental.pallas import tpu as pltpu

SEQ = 8          # sequence length (small example shape)
DIM = 32         # d_model
HEADS = 4
HEAD_DIM = DIM // HEADS
FF = 64          # FFN hidden size
LAYERS = 3
EPS = 1e-5       # torch.nn.LayerNorm default eps
MASK_VALUE = -1e30   # finite "-inf": avoids inf-inf -> NaN on fully-masked rows

# Row layout of the packed per-layer parameter slab (lane width = 3*DIM = 96):
ROW_WQKV = 0                 # rows [  0,  32) : fused Wqkv               (32, 96)
ROW_W1 = DIM                 # rows [ 32,  64) : W1   in cols [0, 64)     (32, 64)
ROW_WO = 2 * DIM             # rows [ 64,  96) : Wo   in cols [0, 32)     (32, 32)
ROW_W2 = 3 * DIM             # rows [ 96, 160) : W2   in cols [0, 32)     (64, 32)
ROW_SMALL = 3 * DIM + FF     # rows [160, 168) : biases / LayerNorm params
SLAB_ROWS = ROW_SMALL + 8    # 168 (multiple of 8)
SLAB_COLS = 3 * DIM          # 96

# Cast matmul operands at the MXU edge.  float32 keeps tight parity with the
# f32 reference below; set to jnp.bfloat16 on v6e/v7x for ~2x MXU throughput
# once the batch-folded matmuls are non-trivial (accumulation stays f32).
MATMUL_DTYPE = jnp.float32


def _mm(a, b):
    return jnp.dot(a.astype(MATMUL_DTYPE), b.astype(MATMUL_DTYPE),
                   preferred_element_type=jnp.float32)


def _bmm(a, b, *, transpose_rhs=False):
    rhs_dim = 2 if transpose_rhs else 1
    return jax.lax.dot_general(
        a.astype(MATMUL_DTYPE), b.astype(MATMUL_DTYPE),
        (((2,), (rhs_dim,)), ((0,), (0,))),
        preferred_element_type=jnp.float32)


def _layer_norm(x, g, b):
    mu = jnp.mean(x, axis=-1, keepdims=True)
    var = jnp.mean((x - mu) ** 2, axis=-1, keepdims=True)
    return (x - mu) * jax.lax.rsqrt(var + EPS) * g + b


def encoder_kernel(x_ref, vlen_ref, slab_ref, o_ref):
    BB = x_ref.shape[0]
    M = BB * SEQ
    scale = 1.0 / (HEAD_DIM ** 0.5)

    # (BB, S, D) -> (BB*S, D): leading-axis merge, layout-free.
    x = x_ref[...].reshape(M, DIM).astype(jnp.float32)

    # Key-padding mask built in-kernel from the per-row valid lengths
    # (replaces the S-times redundant (B, S, S) float mask input).
    vlen = vlen_ref[...]                                          # (BB, 1) int32
    key_ids = jax.lax.broadcasted_iota(jnp.int32, (BB, SEQ), 1)   # (BB, S)
    key_masked = jnp.broadcast_to((key_ids >= vlen)[:, None, :],
                                  (BB, SEQ, SEQ))                 # hoisted broadcast

    for l in range(LAYERS):                    # static unroll over the 3 layers
        # ---- slices of the packed parameter slab (all lane offsets are 0) ----
        wqkv = slab_ref[l, ROW_WQKV:ROW_WQKV + DIM, :]            # (32, 96)
        w1 = slab_ref[l, ROW_W1:ROW_W1 + DIM, 0:FF]               # (32, 64)
        wo = slab_ref[l, ROW_WO:ROW_WO + DIM, 0:DIM]              # (32, 32)
        w2 = slab_ref[l, ROW_W2:ROW_W2 + FF, 0:DIM]               # (64, 32)
        smalls = slab_ref[l, ROW_SMALL:ROW_SMALL + 8, :]          # (8, 96)
        bqkv = smalls[0, :]
        ln1g, ln1b = smalls[1, 0:DIM], smalls[2, 0:DIM]
        ln2g, ln2b = smalls[3, 0:DIM], smalls[4, 0:DIM]
        bo = smalls[5, 0:DIM]
        b1 = smalls[6, 0:FF]
        b2 = smalls[7, 0:DIM]

        # ------------- MultiHead (pre-norm self attention) -------------
        xn = _layer_norm(x, ln1g, ln1b)                           # (M, D)
        qkv = _mm(xn, wqkv) + bqkv                                # (M, 3D) fused QKV
        qkv3 = qkv.reshape(BB, SEQ, 3 * DIM)                      # (BB, S, 3D)

        xa = x + bo                             # residual + out-proj bias
        for h in range(HEADS):                  # static unroll over heads
            q0 = h * HEAD_DIM
            qh = qkv3[:, :, q0:q0 + HEAD_DIM]                     # (BB, S, dh)
            kh = qkv3[:, :, DIM + q0:DIM + q0 + HEAD_DIM]         # (BB, S, dh)
            vh = qkv3[:, :, 2 * DIM + q0:2 * DIM + q0 + HEAD_DIM]

            s = _bmm(qh, kh, transpose_rhs=True) * scale          # (BB, S, S)
            s = jnp.where(key_masked, MASK_VALUE, s)              # masked_fill
            m = jnp.max(s, axis=-1, keepdims=True)
            e = jnp.exp(s - m)
            # approx=True would use the EUP approximation path; exact keeps
            # tight parity with the f32 reference check below.
            p = e * pl.reciprocal(jnp.sum(e, axis=-1, keepdims=True),
                                  approx=False)
            oh = _bmm(p, vh)                                      # (BB, S, dh)
            # Per-head output projection, accumulated (no lane concatenate).
            xa = xa + _mm(oh.reshape(M, HEAD_DIM), wo[q0:q0 + HEAD_DIM, :])
        x = xa                                                    # dropout = identity

        # ------------- FullyConnectedOutput (pre-norm FFN) -------------
        xn = _layer_norm(x, ln2g, ln2b)
        h1 = jnp.maximum(_mm(xn, w1) + b1, 0.0)
        x = x + _mm(h1, w2) + b2                                  # dropout = identity

    # TODO(synk): lane-dense (BB, S*D) output store skipped — the required
    # (BB*S, D)->(BB, S*D) in-kernel relayout is riskier than the masked vst
    # at these tiny sizes; revisit if S*D grows.
    o_ref[...] = x.reshape(BB, SEQ, DIM).astype(o_ref.dtype)


def _pick_batch_block(batch, target=16):
    """Largest BB <= target with batch % BB == 0 and a Mosaic-legal (BB, 1)
    block for the valid-length input (BB % 8 == 0 or BB == batch)."""
    if batch <= target:
        return batch
    for bb in range(target, 0, -1):
        if batch % bb == 0 and bb % 8 == 0:
            return bb
    return batch


def encoder_forward(x, valid_lens, slab, *, batch_block=16):
    B, S, D = x.shape
    assert (S, D) == (SEQ, DIM)
    BB = _pick_batch_block(B, batch_block)
    vlen = valid_lens.reshape(B, 1).astype(jnp.int32)
    return pl.pallas_call(
        encoder_kernel,
        out_shape=jax.ShapeDtypeStruct((B, S, D), x.dtype),
        grid=(B // BB,),
        in_specs=[
            pl.BlockSpec((BB, S, D), lambda b: (b, 0, 0)),
            pl.BlockSpec((BB, 1), lambda b: (b, 0)),
            # Whole parameter slab: same block index every step => resident.
            pl.BlockSpec((LAYERS, SLAB_ROWS, SLAB_COLS), lambda b: (0, 0, 0)),
        ],
        out_specs=pl.BlockSpec((BB, S, D), lambda b: (b, 0, 0)),
        compiler_params=pltpu.CompilerParams(
            dimension_semantics=("parallel",)),
    )(x, vlen, slab)


# -------------------------- parameter construction --------------------------

def _uniform(key, shape, fan_in):
    bound = 1.0 / (fan_in ** 0.5)
    return jax.random.uniform(key, shape, jnp.float32, -bound, bound)


def init_params(key):
    ks = jax.random.split(key, 12)
    wq = _uniform(ks[0], (LAYERS, DIM, DIM), DIM)
    bq = _uniform(ks[1], (LAYERS, DIM), DIM)
    wk = _uniform(ks[2], (LAYERS, DIM, DIM), DIM)
    bk = _uniform(ks[3], (LAYERS, DIM), DIM)
    wv = _uniform(ks[4], (LAYERS, DIM, DIM), DIM)
    bv = _uniform(ks[5], (LAYERS, DIM), DIM)
    wo = _uniform(ks[6], (LAYERS, DIM, DIM), DIM)
    bo = _uniform(ks[7], (LAYERS, DIM), DIM)
    w1 = _uniform(ks[8], (LAYERS, DIM, FF), DIM)
    b1 = _uniform(ks[9], (LAYERS, FF), DIM)
    w2 = _uniform(ks[10], (LAYERS, FF, DIM), FF)
    b2 = _uniform(ks[11], (LAYERS, DIM), FF)
    ln1g = jnp.ones((LAYERS, DIM), jnp.float32)
    ln1b = jnp.zeros((LAYERS, DIM), jnp.float32)
    ln2g = jnp.ones((LAYERS, DIM), jnp.float32)
    ln2b = jnp.zeros((LAYERS, DIM), jnp.float32)
    return (ln1g, ln1b, wq, bq, wk, bk, wv, bv, wo, bo,
            ln2g, ln2b, w1, b1, w2, b2)


def pack_params(params):
    """Pack all per-layer params into one (LAYERS, 168, 96) slab."""
    (ln1g, ln1b, wq, bq, wk, bk, wv, bv, wo, bo,
     ln2g, ln2b, w1, b1, w2, b2) = params
    wqkv = jnp.concatenate([wq, wk, wv], axis=-1)      # (L, 32, 96)
    bqkv = jnp.concatenate([bq, bk, bv], axis=-1)      # (L, 96)
    slab = jnp.zeros((LAYERS, SLAB_ROWS, SLAB_COLS), jnp.float32)
    slab = slab.at[:, ROW_WQKV:ROW_WQKV + DIM, :].set(wqkv)
    slab = slab.at[:, ROW_W1:ROW_W1 + DIM, 0:FF].set(w1)
    slab = slab.at[:, ROW_WO:ROW_WO + DIM, 0:DIM].set(wo)
    slab = slab.at[:, ROW_W2:ROW_W2 + FF, 0:DIM].set(w2)
    slab = slab.at[:, ROW_SMALL + 0, :].set(bqkv)
    slab = slab.at[:, ROW_SMALL + 1, 0:DIM].set(ln1g)
    slab = slab.at[:, ROW_SMALL + 2, 0:DIM].set(ln1b)
    slab = slab.at[:, ROW_SMALL + 3, 0:DIM].set(ln2g)
    slab = slab.at[:, ROW_SMALL + 4, 0:DIM].set(ln2b)
    slab = slab.at[:, ROW_SMALL + 5, 0:DIM].set(bo)
    slab = slab.at[:, ROW_SMALL + 6, 0:FF].set(b1)
    slab = slab.at[:, ROW_SMALL + 7, 0:DIM].set(b2)
    return slab


# ------------------------------ pure-JAX reference ---------------------------

def ref_forward(x, valid_lens, params):
    (ln1g, ln1b, wq, bq, wk, bk, wv, bv, wo, bo,
     ln2g, ln2b, w1, b1, w2, b2) = params

    def ln(z, g, b):
        mu = z.mean(-1, keepdims=True)
        var = ((z - mu) ** 2).mean(-1, keepdims=True)
        return (z - mu) / jnp.sqrt(var + EPS) * g + b

    B, S, D = x.shape
    key_mask = jnp.arange(S)[None, :] >= valid_lens[:, None]   # (B, S), True=masked
    for l in range(LAYERS):
        xn = ln(x, ln1g[l], ln1b[l])
        q = xn @ wq[l] + bq[l]
        k = xn @ wk[l] + bk[l]
        v = xn @ wv[l] + bv[l]
        qh = q.reshape(B, S, HEADS, HEAD_DIM)
        kh = k.reshape(B, S, HEADS, HEAD_DIM)
        vh = v.reshape(B, S, HEADS, HEAD_DIM)
        s = jnp.einsum('bqhd,bkhd->bhqk', qh, kh) / (HEAD_DIM ** 0.5)
        s = jnp.where(key_mask[:, None, None, :], -jnp.inf, s)  # masked_fill(-inf)
        p = jax.nn.softmax(s, axis=-1)
        o = jnp.einsum('bhqk,bkhd->bqhd', p, vh).reshape(B, S, D)
        x = x + (o @ wo[l] + bo[l])
        xn = ln(x, ln2g[l], ln2b[l])
        h = jax.nn.relu(xn @ w1[l] + b1[l])
        x = x + (h @ w2[l] + b2[l])
    return x


if __name__ == "__main__":
    key = jax.random.PRNGKey(0)
    kx, kp = jax.random.split(key)

    B = 4
    x = jax.random.normal(kx, (B, SEQ, DIM), jnp.float32)
    # Key-padding lengths (replace the (B, S, S) float mask of the original
    # tutorial test: key position j of row b is masked iff j >= valid_lens[b]).
    valid_lens = jnp.array([SEQ, SEQ - 2, SEQ, 3], dtype=jnp.int32)

    params = init_params(kp)
    slab = pack_params(params)

    out = jax.block_until_ready(encoder_forward(x, valid_lens, slab))
    ref = ref_forward(x, valid_lens, params)

    assert out.shape == (B, SEQ, DIM)
    max_err = float(jnp.max(jnp.abs(out - ref)))
    assert jnp.allclose(out, ref, atol=5e-4, rtol=5e-4), max_err

    print("KERNEL_OK")
</pallas_src>

<mosaic_0001>
module attributes {stable_mosaic.version = 11 : i64} {
  func.func @encoder_kernel(%arg0: i32, %arg1: memref<4x8x32xf32, #tpu.memory_space<vmem>>, %arg2: memref<4x1xi32, #tpu.memory_space<vmem>>, %arg3: memref<3x168x96xf32, #tpu.memory_space<vmem>>, %arg4: memref<4x8x32xf32, #tpu.memory_space<vmem>>) attributes {dimension_semantics = [#tpu.dimension_semantics<parallel>], iteration_bounds = array<i64: 1>, scalar_prefetch = 0 : i64, scratch_operands = 0 : i64, tpu.core_type = #tpu.core_type<tc>, window_params = [{transform_indices = @transform_0, window_bounds = array<i64: 4, 8, 32>}, {transform_indices = @transform_1, window_bounds = array<i64: 4, 1>}, {pipeline_mode = #tpu.pipeline_mode<synchronous>, transform_indices = @transform_2, window_bounds = array<i64: 3, 168, 96>}, {transform_indices = @transform_3, window_bounds = array<i64: 4, 8, 32>}]} {
    %c0 = arith.constant 0 : index
    %c0_0 = arith.constant 0 : index
    %c0_1 = arith.constant 0 : index
    %0 = vector.load %arg1[%c0, %c0_0, %c0_1] : memref<4x8x32xf32, #tpu.memory_space<vmem>>, vector<4x8x32xf32>
    %1 = vector.shape_cast %0 : vector<4x8x32xf32> to vector<32x32xf32>
    %c0_2 = arith.constant 0 : index
    %c0_3 = arith.constant 0 : index
    %2 = vector.load %arg2[%c0_2, %c0_3] : memref<4x1xi32, #tpu.memory_space<vmem>>, vector<4x1xi32>
    %3 = tpu.iota {dimensions = array<i32: 1>} : vector<4x8xi32>
    %4 = vector.broadcast %2 : vector<4x1xi32> to vector<4x8xi32>
    %5 = arith.cmpi sge, %3, %4 : vector<4x8xi32>
    %6 = vector.shape_cast %5 : vector<4x8xi1> to vector<4x1x8xi1>
    %7 = vector.shape_cast %6 : vector<4x1x8xi1> to vector<4x1x8xi1>
    %8 = vector.broadcast %7 : vector<4x1x8xi1> to vector<4x8x8xi1>
    %c0_4 = arith.constant 0 : index
    %c0_5 = arith.constant 0 : index
    %c0_6 = arith.constant 0 : index
    %9 = vector.load %arg3[%c0_4, %c0_5, %c0_6] : memref<3x168x96xf32, #tpu.memory_space<vmem>>, vector<1x32x96xf32>
    %10 = vector.shape_cast %9 : vector<1x32x96xf32> to vector<32x96xf32>
    %c0_7 = arith.constant 0 : index
    %c32 = arith.constant 32 : index
    %c0_8 = arith.constant 0 : index
    %11 = vector.load %arg3[%c0_7, %c32, %c0_8] : memref<3x168x96xf32, #tpu.memory_space<vmem>>, vector<1x32x64xf32>
    %12 = vector.shape_cast %11 : vector<1x32x64xf32> to vector<32x64xf32>
    %c0_9 = arith.constant 0 : index
    %c64 = arith.constant 64 : index
    %c0_10 = arith.constant 0 : index
    %13 = vector.load %arg3[%c0_9, %c64, %c0_10] : memref<3x168x96xf32, #tpu.memory_space<vmem>>, vector<1x32x32xf32>
    %14 = vector.shape_cast %13 : vector<1x32x32xf32> to vector<32x32xf32>
    %c0_11 = arith.constant 0 : index
    %c96 = arith.constant 96 : index
    %c0_12 = arith.constant 0 : index
    %15 = vector.load %arg3[%c0_11, %c96, %c0_12] : memref<3x168x96xf32, #tpu.memory_space<vmem>>, vector<1x64x32xf32>
    %16 = vector.shape_cast %15 : vector<1x64x32xf32> to vector<64x32xf32>
    %c0_13 = arith.constant 0 : index
    %c160 = arith.constant 160 : index
    %c0_14 = arith.constant 0 : index
    %17 = vector.load %arg3[%c0_13, %c160, %c0_14] : memref<3x168x96xf32, #tpu.memory_space<vmem>>, vector<1x8x96xf32>
    %18 = vector.shape_cast %17 : vector<1x8x96xf32> to vector<8x96xf32>
    %19 = vector.extract_strided_slice %18 {offsets = [0, 0], sizes = [1, 96], strides = [1, 1]} : vector<8x96xf32> to vector<1x96xf32>
    %20 = vector.shape_cast %19 : vector<1x96xf32> to vector<96xf32>
    %21 = vector.extract_strided_slice %18 {offsets = [1, 0], sizes = [1, 32], strides = [1, 1]} : vector<8x96xf32> to vector<1x32xf32>
    %22 = vector.shape_cast %21 : vector<1x32xf32> to vector<32xf32>
    %23 = vector.extract_strided_slice %18 {offsets = [2, 0], sizes = [1, 32], strides = [1, 1]} : vector<8x96xf32> to vector<1x32xf32>
    %24 = vector.shape_cast %23 : vector<1x32xf32> to vector<32xf32>
    %25 = vector.extract_strided_slice %18 {offsets = [3, 0], sizes = [1, 32], strides = [1, 1]} : vector<8x96xf32> to vector<1x32xf32>
    %26 = vector.shape_cast %25 : vector<1x32xf32> to vector<32xf32>
    %27 = vector.extract_strided_slice %18 {offsets = [4, 0], sizes = [1, 32], strides = [1, 1]} : vector<8x96xf32> to vector<1x32xf32>
    %28 = vector.shape_cast %27 : vector<1x32xf32> to vector<32xf32>
    %29 = vector.extract_strided_slice %18 {offsets = [5, 0], sizes = [1, 32], strides = [1, 1]} : vector<8x96xf32> to vector<1x32xf32>
    %30 = vector.shape_cast %29 : vector<1x32xf32> to vector<32xf32>
    %31 = vector.extract_strided_slice %18 {offsets = [6, 0], sizes = [1, 64], strides = [1, 1]} : vector<8x96xf32> to vector<1x64xf32>
    %32 = vector.shape_cast %31 : vector<1x64xf32> to vector<64xf32>
    %33 = vector.extract_strided_slice %18 {offsets = [7, 0], sizes = [1, 32], strides = [1, 1]} : vector<8x96xf32> to vector<1x32xf32>
    %34 = vector.shape_cast %33 : vector<1x32xf32> to vector<32xf32>
    %cst = arith.constant dense<0.000000e+00> : vector<32xf32>
    %35 = vector.multi_reduction <add>, %1, %cst [1] : vector<32x32xf32> to vector<32xf32>
    %36 = vector.shape_cast %35 : vector<32xf32> to vector<32x1xf32>
    %cst_15 = arith.constant 3.200000e+01 : f32
    %37 = vector.broadcast %cst_15 : f32 to vector<32x1xf32>
    %38 = arith.divf %36, %37 : vector<32x1xf32>
    %39 = vector.broadcast %38 : vector<32x1xf32> to vector<32x32xf32>
    %40 = arith.subf %1, %39 : vector<32x32xf32>
    %41 = arith.mulf %40, %40 : vector<32x32xf32>
    %cst_16 = arith.constant dense<0.000000e+00> : vector<32xf32>
    %42 = vector.multi_reduction <add>, %41, %cst_16 [1] : vector<32x32xf32> to vector<32xf32>
    %43 = vector.shape_cast %42 : vector<32xf32> to vector<32x1xf32>
    %cst_17 = arith.constant 3.200000e+01 : f32
    %44 = vector.broadcast %cst_17 : f32 to vector<32x1xf32>
    %45 = arith.divf %43, %44 : vector<32x1xf32>
    %46 = vector.broadcast %38 : vector<32x1xf32> to vector<32x32xf32>
    %47 = arith.subf %1, %46 : vector<32x32xf32>
    %cst_18 = arith.constant 9.99999974E-6 : f32
    %48 = vector.broadcast %cst_18 : f32 to vector<32x1xf32>
    %49 = arith.addf %45, %48 : vector<32x1xf32>
    %50 = math.rsqrt %49 : vector<32x1xf32>
    %51 = vector.broadcast %50 : vector<32x1xf32> to vector<32x32xf32>
    %52 = arith.mulf %47, %51 : vector<32x32xf32>
    %53 = vector.shape_cast %22 : vector<32xf32> to vector<1x32xf32>
    %54 = vector.broadcast %53 : vector<1x32xf32> to vector<32x32xf32>
    %55 = arith.mulf %52, %54 : vector<32x32xf32>
    %56 = vector.shape_cast %24 : vector<32xf32> to vector<1x32xf32>
    %57 = vector.broadcast %56 : vector<1x32xf32> to vector<32x32xf32>
    %58 = arith.addf %55, %57 : vector<32x32xf32>
    %cst_19 = arith.constant dense<0.000000e+00> : vector<32x96xf32>
    %59 = tpu.matmul %58, %10, %cst_19 {dimension_numbers = #tpu.dot_dimension_numbers<[1], [0], [0], [1], [0, 0, 1, 1], [], []>} : vector<32x32xf32>, vector<32x96xf32>, vector<32x96xf32> -> vector<32x96xf32>
    %60 = vector.shape_cast %20 : vector<96xf32> to vector<1x96xf32>
    %61 = vector.broadcast %60 : vector<1x96xf32> to vector<32x96xf32>
    %62 = arith.addf %59, %61 : vector<32x96xf32>
    %63 = vector.shape_cast %62 : vector<32x96xf32> to vector<4x8x96xf32>
    %64 = vector.shape_cast %30 : vector<32xf32> to vector<1x32xf32>
    %65 = vector.broadcast %64 : vector<1x32xf32> to vector<32x32xf32>
    %66 = arith.addf %1, %65 : vector<32x32xf32>
    %67 = vector.extract_strided_slice %63 {offsets = [0, 0, 0], sizes = [4, 8, 8], strides = [1, 1, 1]} : vector<4x8x96xf32> to vector<4x8x8xf32>
    %68 = vector.extract_strided_slice %63 {offsets = [0, 0, 32], sizes = [4, 8, 8], strides = [1, 1, 1]} : vector<4x8x96xf32> to vector<4x8x8xf32>
    %69 = vector.extract_strided_slice %63 {offsets = [0, 0, 64], sizes = [4, 8, 8], strides = [1, 1, 1]} : vector<4x8x96xf32> to vector<4x8x8xf32>
    %cst_20 = arith.constant dense<0.000000e+00> : vector<4x8x8xf32>
    %70 = tpu.matmul %67, %68, %cst_20 {dimension_numbers = #tpu.dot_dimension_numbers<[2], [2], [1], [1], [0, 0, 0, 1, 1, 1], [0], [0]>} : vector<4x8x8xf32>, vector<4x8x8xf32>, vector<4x8x8xf32> -> vector<4x8x8xf32>
    %cst_21 = arith.constant 0.353553385 : f32
    %71 = vector.broadcast %cst_21 : f32 to vector<4x8x8xf32>
    %72 = arith.mulf %70, %71 : vector<4x8x8xf32>
    %cst_22 = arith.constant -1.000000e+30 : f32
    %73 = vector.broadcast %cst_22 : f32 to vector<4x8x8xf32>
    %74 = arith.select %8, %73, %72 : vector<4x8x8xi1>, vector<4x8x8xf32>
    %cst_23 = arith.constant dense<0xFF800000> : vector<4x8xf32>
    %75 = vector.multi_reduction <maximumf>, %74, %cst_23 [2] : vector<4x8x8xf32> to vector<4x8xf32>
    %76 = vector.shape_cast %75 : vector<4x8xf32> to vector<4x8x1xf32>
    %77 = vector.broadcast %76 : vector<4x8x1xf32> to vector<4x8x8xf32>
    %78 = arith.subf %74, %77 : vector<4x8x8xf32>
    %79 = math.exp %78 : vector<4x8x8xf32>
    %cst_24 = arith.constant dense<0.000000e+00> : vector<4x8xf32>
    %80 = vector.multi_reduction <add>, %79, %cst_24 [2] : vector<4x8x8xf32> to vector<4x8xf32>
    %81 = vector.shape_cast %80 : vector<4x8xf32> to vector<4x8x1xf32>
    %82 = tpu.reciprocal %81 : vector<4x8x1xf32> -> vector<4x8x1xf32>
    %83 = vector.broadcast %82 : vector<4x8x1xf32> to vector<4x8x8xf32>
    %84 = arith.mulf %79, %83 : vector<4x8x8xf32>
    %cst_25 = arith.constant dense<0.000000e+00> : vector<4x8x8xf32>
    %85 = tpu.matmul %84, %69, %cst_25 {dimension_numbers = #tpu.dot_dimension_numbers<[2], [1], [1], [2], [0, 0, 0, 1, 1, 2], [0], [0]>} : vector<4x8x8xf32>, vector<4x8x8xf32>, vector<4x8x8xf32> -> vector<4x8x8xf32>
    %86 = vector.shape_cast %85 : vector<4x8x8xf32> to vector<32x8xf32>
    %87 = vector.extract_strided_slice %14 {offsets = [0, 0], sizes = [8, 32], strides = [1, 1]} : vector<32x32xf32> to vector<8x32xf32>
    %cst_26 = arith.constant dense<0.000000e+00> : vector<32x32xf32>
    %88 = tpu.matmul %86, %87, %cst_26 {dimension_numbers = #tpu.dot_dimension_numbers<[1], [0], [0], [1], [0, 0, 1, 1], [], []>} : vector<32x8xf32>, vector<8x32xf32>, vector<32x32xf32> -> vector<32x32xf32>
    %89 = arith.addf %66, %88 : vector<32x32xf32>
    %90 = vector.extract_strided_slice %63 {offsets = [0, 0, 8], sizes = [4, 8, 8], strides = [1, 1, 1]} : vector<4x8x96xf32> to vector<4x8x8xf32>
    %91 = vector.extract_strided_slice %63 {offsets = [0, 0, 40], sizes = [4, 8, 8], strides = [1, 1, 1]} : vector<4x8x96xf32> to vector<4x8x8xf32>
    %92 = vector.extract_strided_slice %63 {offsets = [0, 0, 72], sizes = [4, 8, 8], strides = [1, 1, 1]} : vector<4x8x96xf32> to vector<4x8x8xf32>
    %cst_27 = arith.constant dense<0.000000e+00> : vector<4x8x8xf32>
    %93 = tpu.matmul %90, %91, %cst_27 {dimension_numbers = #tpu.dot_dimension_numbers<[2], [2], [1], [1], [0, 0, 0, 1, 1, 1], [0], [0]>} : vector<4x8x8xf32>, vector<4x8x8xf32>, vector<4x8x8xf32> -> vector<4x8x8xf32>
    %cst_28 = arith.constant 0.353553385 : f32
    %94 = vector.broadcast %cst_28 : f32 to vector<4x8x8xf32>
    %95 = arith.mulf %93, %94 : vector<4x8x8xf32>
    %cst_29 = arith.constant -1.000000e+30 : f32
    %96 = vector.broadcast %cst_29 : f32 to vector<4x8x8xf32>
    %97 = arith.select %8, %96, %95 : vector<4x8x8xi1>, vector<4x8x8xf32>
    %cst_30 = arith.constant dense<0xFF800000> : vector<4x8xf32>
    %98 = vector.multi_reduction <maximumf>, %97, %cst_30 [2] : vector<4x8x8xf32> to vector<4x8xf32>
    %99 = vector.shape_cast %98 : vector<4x8xf32> to vector<4x8x1xf32>
    %100 = vector.broadcast %99 : vector<4x8x1xf32> to vector<4x8x8xf32>
    %101 = arith.subf %97, %100 : vector<4x8x8xf32>
    %102 = math.exp %101 : vector<4x8x8xf32>
    %cst_31 = arith.constant dense<0.000000e+00> : vector<4x8xf32>
    %103 = vector.multi_reduction <add>, %102, %cst_31 [2] : vector<4x8x8xf32> to vector<4x8xf32>
    %104 = vector.shape_cast %103 : vector<4x8xf32> to vector<4x8x1xf32>
    %105 = tpu.reciprocal %104 : vector<4x8x1xf32> -> vector<4x8x1xf32>
    %106 = vector.broadcast %105 : vector<4x8x1xf32> to vector<4x8x8xf32>
    %107 = arith.mulf %102, %106 : vector<4x8x8xf32>
    %cst_32 = arith.constant dense<0.000000e+00> : vector<4x8x8xf32>
    %108 = tpu.matmul %107, %92, %cst_32 {dimension_numbers = #tpu.dot_dimension_numbers<[2], [1], [1], [2], [0, 0, 0, 1, 1, 2], [0], [0]>} : vector<4x8x8xf32>, vector<4x8x8xf32>, vector<4x8x8xf32> -> vector<4x8x8xf32>
    %109 = vector.shape_cast %108 : vector<4x8x8xf32> to vector<32x8xf32>
    %110 = vector.extract_strided_slice %14 {offsets = [8, 0], sizes = [8, 32], strides = [1, 1]} : vector<32x32xf32> to vector<8x32xf32>
    %cst_33 = arith.constant dense<0.000000e+00> : vector<32x32xf32>
    %111 = tpu.matmul %109, %110, %cst_33 {dimension_numbers = #tpu.dot_dimension_numbers<[1], [0], [0], [1], [0, 0, 1, 1], [], []>} : vector<32x8xf32>, vector<8x32xf32>, vector<32x32xf32> -> vector<32x32xf32>
    %112 = arith.addf %89, %111 : vector<32x32xf32>
    %113 = vector.extract_strided_slice %63 {offsets = [0, 0, 16], sizes = [4, 8, 8], strides = [1, 1, 1]} : vector<4x8x96xf32> to vector<4x8x8xf32>
    %114 = vector.extract_strided_slice %63 {offsets = [0, 0, 48], sizes = [4, 8, 8], strides = [1, 1, 1]} : vector<4x8x96xf32> to vector<4x8x8xf32>
    %115 = vector.extract_strided_slice %63 {offsets = [0, 0, 80], sizes = [4, 8, 8], strides = [1, 1, 1]} : vector<4x8x96xf32> to vector<4x8x8xf32>
    %cst_34 = arith.constant dense<0.000000e+00> : vector<4x8x8xf32>
    %116 = tpu.matmul %113, %114, %cst_34 {dimension_numbers = #tpu.dot_dimension_numbers<[2], [2], [1], [1], [0, 0, 0, 1, 1, 1], [0], [0]>} : vector<4x8x8xf32>, vector<4x8x8xf32>, vector<4x8x8xf32> -> vector<4x8x8xf32>
    %cst_35 = arith.constant 0.353553385 : f32
    %117 = vector.broadcast %cst_35 : f32 to vector<4x8x8xf32>
    %118 = arith.mulf %116, %117 : vector<4x8x8xf32>
    %cst_36 = arith.constant -1.000000e+30 : f32
    %119 = vector.broadcast %cst_36 : f32 to vector<4x8x8xf32>
    %120 = arith.select %8, %119, %118 : vector<4x8x8xi1>, vector<4x8x8xf32>
    %cst_37 = arith.constant dense<0xFF800000> : vector<4x8xf32>
    %121 = vector.multi_reduction <maximumf>, %120, %cst_37 [2] : vector<4x8x8xf32> to vector<4x8xf32>
    %122 = vector.shape_cast %121 : vector<4x8xf32> to vector<4x8x1xf32>
    %123 = vector.broadcast %122 : vector<4x8x1xf32> to vector<4x8x8xf32>
    %124 = arith.subf %120, %123 : vector<4x8x8xf32>
    %125 = math.exp %124 : vector<4x8x8xf32>
    %cst_38 = arith.constant dense<0.000000e+00> : vector<4x8xf32>
    %126 = vector.multi_reduction <add>, %125, %cst_38 [2] : vector<4x8x8xf32> to vector<4x8xf32>
    %127 = vector.shape_cast %126 : vector<4x8xf32> to vector<4x8x1xf32>
    %128 = tpu.reciprocal %127 : vector<4x8x1xf32> -> vector<4x8x1xf32>
    %129 = vector.broadcast %128 : vector<4x8x1xf32> to vector<4x8x8xf32>
    %130 = arith.mulf %125, %129 : vector<4x8x8xf32>
    %cst_39 = arith.constant dense<0.000000e+00> : vector<4x8x8xf32>
    %131 = tpu.matmul %130, %115, %cst_39 {dimension_numbers = #tpu.dot_dimension_numbers<[2], [1], [1], [2], [0, 0, 0, 1, 1, 2], [0], [0]>} : vector<4x8x8xf32>, vector<4x8x8xf32>, vector<4x8x8xf32> -> vector<4x8x8xf32>
    %132 = vector.shape_cast %131 : vector<4x8x8xf32> to vector<32x8xf32>
    %133 = vector.extract_strided_slice %14 {offsets = [16, 0], sizes = [8, 32], strides = [1, 1]} : vector<32x32xf32> to vector<8x32xf32>
    %cst_40 = arith.constant dense<0.000000e+00> : vector<32x32xf32>
    %134 = tpu.matmul %132, %133, %cst_40 {dimension_numbers = #tpu.dot_dimension_numbers<[1], [0], [0], [1], [0, 0, 1, 1], [], []>} : vector<32x8xf32>, vector<8x32xf32>, vector<32x32xf32> -> vector<32x32xf32>
    %135 = arith.addf %112, %134 : vector<32x32xf32>
    %136 = vector.extract_strided_slice %63 {offsets = [0, 0, 24], sizes = [4, 8, 8], strides = [1, 1, 1]} : vector<4x8x96xf32> to vector<4x8x8xf32>
    %137 = vector.extract_strided_slice %63 {offsets = [0, 0, 56], sizes = [4, 8, 8], strides = [1, 1, 1]} : vector<4x8x96xf32> to vector<4x8x8xf32>
    %138 = vector.extract_strided_slice %63 {offsets = [0, 0, 88], sizes = [4, 8, 8], strides = [1, 1, 1]} : vector<4x8x96xf32> to vector<4x8x8xf32>
    %cst_41 = arith.constant dense<0.000000e+00> : vector<4x8x8xf32>
    %139 = tpu.matmul %136, %137, %cst_41 {dimension_numbers = #tpu.dot_dimension_numbers<[2], [2], [1], [1], [0, 0, 0, 1, 1, 1], [0], [0]>} : vector<4x8x8xf32>, vector<4x8x8xf32>, vector<4x8x8xf32> -> vector<4x8x8xf32>
    %cst_42 = arith.constant 0.353553385 : f32
    %140 = vector.broadcast %cst_42 : f32 to vector<4x8x8xf32>
    %141 = arith.mulf %139, %140 : vector<4x8x8xf32>
    %cst_43 = arith.constant -1.000000e+30 : f32
    %142 = vector.broadcast %cst_43 : f32 to vector<4x8x8xf32>
    %143 = arith.select %8, %142, %141 : vector<4x8x8xi1>, vector<4x8x8xf32>
    %cst_44 = arith.constant dense<0xFF800000> : vector<4x8xf32>
    %144 = vector.multi_reduction <maximumf>, %143, %cst_44 [2] : vector<4x8x8xf32> to vector<4x8xf32>
    %145 = vector.shape_cast %144 : vector<4x8xf32> to vector<4x8x1xf32>
    %146 = vector.broadcast %145 : vector<4x8x1xf32> to vector<4x8x8xf32>
    %147 = arith.subf %143, %146 : vector<4x8x8xf32>
    %148 = math.exp %147 : vector<4x8x8xf32>
    %cst_45 = arith.constant dense<0.000000e+00> : vector<4x8xf32>
    %149 = vector.multi_reduction <add>, %148, %cst_45 [2] : vector<4x8x8xf32> to vector<4x8xf32>
    %150 = vector.shape_cast %149 : vector<4x8xf32> to vector<4x8x1xf32>
    %151 = tpu.reciprocal %150 : vector<4x8x1xf32> -> vector<4x8x1xf32>
    %152 = vector.broadcast %151 : vector<4x8x1xf32> to vector<4x8x8xf32>
    %153 = arith.mulf %148, %152 : vector<4x8x8xf32>
    %cst_46 = arith.constant dense<0.000000e+00> : vector<4x8x8xf32>
    %154 = tpu.matmul %153, %138, %cst_46 {dimension_numbers = #tpu.dot_dimension_numbers<[2], [1], [1], [2], [0, 0, 0, 1, 1, 2], [0], [0]>} : vector<4x8x8xf32>, vector<4x8x8xf32>, vector<4x8x8xf32> -> vector<4x8x8xf32>
    %155 = vector.shape_cast %154 : vector<4x8x8xf32> to vector<32x8xf32>
    %156 = vector.extract_strided_slice %14 {offsets = [24, 0], sizes = [8, 32], strides = [1, 1]} : vector<32x32xf32> to vector<8x32xf32>
    %cst_47 = arith.constant dense<0.000000e+00> : vector<32x32xf32>
    %157 = tpu.matmul %155, %156, %cst_47 {dimension_numbers = #tpu.dot_dimension_numbers<[1], [0], [0], [1], [0, 0, 1, 1], [], []>} : vector<32x8xf32>, vector<8x32xf32>, vector<32x32xf32> -> vector<32x32xf32>
    %158 = arith.addf %135, %157 : vector<32x32xf32>
    %cst_48 = arith.constant dense<0.000000e+00> : vector<32xf32>
    %159 = vector.multi_reduction <add>, %158, %cst_48 [1] : vector<32x32xf32> to vector<32xf32>
    %160 = vector.shape_cast %159 : vector<32xf32> to vector<32x1xf32>
    %cst_49 = arith.constant 3.200000e+01 : f32
    %161 = vector.broadcast %cst_49 : f32 to vector<32x1xf32>
    %162 = arith.divf %160, %161 : vector<32x1xf32>
    %163 = vector.broadcast %162 : vector<32x1xf32> to vector<32x32xf32>
    %164 = arith.subf %158, %163 : vector<32x32xf32>
    %165 = arith.mulf %164, %164 : vector<32x32xf32>
    %cst_50 = arith.constant dense<0.000000e+00> : vector<32xf32>
    %166 = vector.multi_reduction <add>, %165, %cst_50 [1] : vector<32x32xf32> to vector<32xf32>
    %167 = vector.shape_cast %166 : vector<32xf32> to vector<32x1xf32>
    %cst_51 = arith.constant 3.200000e+01 : f32
    %168 = vector.broadcast %cst_51 : f32 to vector<32x1xf32>
    %169 = arith.divf %167, %168 : vector<32x1xf32>
    %170 = vector.broadcast %162 : vector<32x1xf32> to vector<32x32xf32>
    %171 = arith.subf %158, %170 : vector<32x32xf32>
    %cst_52 = arith.constant 9.99999974E-6 : f32
    %172 = vector.broadcast %cst_52 : f32 to vector<32x1xf32>
    %173 = arith.addf %169, %172 : vector<32x1xf32>
    %174 = math.rsqrt %173 : vector<32x1xf32>
    %175 = vector.broadcast %174 : vector<32x1xf32> to vector<32x32xf32>
    %176 = arith.mulf %171, %175 : vector<32x32xf32>
    %177 = vector.shape_cast %26 : vector<32xf32> to vector<1x32xf32>
    %178 = vector.broadcast %177 : vector<1x32xf32> to vector<32x32xf32>
    %179 = arith.mulf %176, %178 : vector<32x32xf32>
    %180 = vector.shape_cast %28 : vector<32xf32> to vector<1x32xf32>
    %181 = vector.broadcast %180 : vector<1x32xf32> to vector<32x32xf32>
    %182 = arith.addf %179, %181 : vector<32x32xf32>
    %cst_53 = arith.constant dense<0.000000e+00> : vector<32x64xf32>
    %183 = tpu.matmul %182, %12, %cst_53 {dimension_numbers = #tpu.dot_dimension_numbers<[1], [0], [0], [1], [0, 0, 1, 1], [], []>} : vector<32x32xf32>, vector<32x64xf32>, vector<32x64xf32> -> vector<32x64xf32>
    %184 = vector.shape_cast %32 : vector<64xf32> to vector<1x64xf32>
    %185 = vector.broadcast %184 : vector<1x64xf32> to vector<32x64xf32>
    %186 = arith.addf %183, %185 : vector<32x64xf32>
    %cst_54 = arith.constant 0.000000e+00 : f32
    %187 = vector.broadcast %cst_54 : f32 to vector<32x64xf32>
    %188 = arith.maximumf %186, %187 : vector<32x64xf32>
    %cst_55 = arith.constant dense<0.000000e+00> : vector<32x32xf32>
    %189 = tpu.matmul %188, %16, %cst_55 {dimension_numbers = #tpu.dot_dimension_numbers<[1], [0], [0], [1], [0, 0, 1, 1], [], []>} : vector<32x64xf32>, vector<64x32xf32>, vector<32x32xf32> -> vector<32x32xf32>
    %190 = arith.addf %158, %189 : vector<32x32xf32>
    %191 = vector.shape_cast %34 : vector<32xf32> to vector<1x32xf32>
    %192 = vector.broadcast %191 : vector<1x32xf32> to vector<32x32xf32>
    %193 = arith.addf %190, %192 : vector<32x32xf32>
    %c1 = arith.constant 1 : index
    %c0_56 = arith.constant 0 : index
    %c0_57 = arith.constant 0 : index
    %194 = vector.load %arg3[%c1, %c0_56, %c0_57] : memref<3x168x96xf32, #tpu.memory_space<vmem>>, vector<1x32x96xf32>
    %195 = vector.shape_cast %194 : vector<1x32x96xf32> to vector<32x96xf32>
    %c1_58 = arith.constant 1 : index
    %c32_59 = arith.constant 32 : index
    %c0_60 = arith.constant 0 : index
    %196 = vector.load %arg3[%c1_58, %c32_59, %c0_60] : memref<3x168x96xf32, #tpu.memory_space<vmem>>, vector<1x32x64xf32>
    %197 = vector.shape_cast %196 : vector<1x32x64xf32> to vector<32x64xf32>
    %c1_61 = arith.constant 1 : index
    %c64_62 = arith.constant 64 : index
    %c0_63 = arith.constant 0 : index
    %198 = vector.load %arg3[%c1_61, %c64_62, %c0_63] : memref<3x168x96xf32, #tpu.memory_space<vmem>>, vector<1x32x32xf32>
    %199 = vector.shape_cast %198 : vector<1x32x32xf32> to vector<32x32xf32>
    %c1_64 = arith.constant 1 : index
    %c96_65 = arith.constant 96 : index
    %c0_66 = arith.constant 0 : index
    %200 = vector.load %arg3[%c1_64, %c96_65, %c0_66] : memref<3x168x96xf32, #tpu.memory_space<vmem>>, vector<1x64x32xf32>
    %201 = vector.shape_cast %200 : vector<1x64x32xf32> to vector<64x32xf32>
    %c1_67 = arith.constant 1 : index
    %c160_68 = arith.constant 160 : index
    %c0_69 = arith.constant 0 : index
    %202 = vector.load %arg3[%c1_67, %c160_68, %c0_69] : memref<3x168x96xf32, #tpu.memory_space<vmem>>, vector<1x8x96xf32>
    %203 = vector.shape_cast %202 : vector<1x8x96xf32> to vector<8x96xf32>
    %204 = vector.extract_strided_slice %203 {offsets = [0, 0], sizes = [1, 96], strides = [1, 1]} : vector<8x96xf32> to vector<1x96xf32>
    %205 = vector.shape_cast %204 : vector<1x96xf32> to vector<96xf32>
    %206 = vector.extract_strided_slice %203 {offsets = [1, 0], sizes = [1, 32], strides = [1, 1]} : vector<8x96xf32> to vector<1x32xf32>
    %207 = vector.shape_cast %206 : vector<1x32xf32> to vector<32xf32>
    %208 = vector.extract_strided_slice %203 {offsets = [2, 0], sizes = [1, 32], strides = [1, 1]} : vector<8x96xf32> to vector<1x32xf32>
    %209 = vector.shape_cast %208 : vector<1x32xf32> to vector<32xf32>
    %210 = vector.extract_strided_slice %203 {offsets = [3, 0], sizes = [1, 32], strides = [1, 1]} : vector<8x96xf32> to vector<1x32xf32>
    %211 = vector.shape_cast %210 : vector<1x32xf32> to vector<32xf32>
    %212 = vector.extract_strided_slice %203 {offsets = [4, 0], sizes = [1, 32], strides = [1, 1]} : vector<8x96xf32> to vector<1x32xf32>
    %213 = vector.shape_cast %212 : vector<1x32xf32> to vector<32xf32>
    %214 = vector.extract_strided_slice %203 {offsets = [5, 0], sizes = [1, 32], strides = [1, 1]} : vector<8x96xf32> to vector<1x32xf32>
    %215 = vector.shape_cast %214 : vector<1x32xf32> to vector<32xf32>
    %216 = vector.extract_strided_slice %203 {offsets = [6, 0], sizes = [1, 64], strides = [1, 1]} : vector<8x96xf32> to vector<1x64xf32>
    %217 = vector.shape_cast %216 : vector<1x64xf32> to vector<64xf32>
    %218 = vector.extract_strided_slice %203 {offsets = [7, 0], sizes = [1, 32], strides = [1, 1]} : vector<8x96xf32> to vector<1x32xf32>
    %219 = vector.shape_cast %218 : vector<1x32xf32> to vector<32xf32>
    %cst_70 = arith.constant dense<0.000000e+00> : vector<32xf32>
    %220 = vector.multi_reduction <add>, %193, %cst_70 [1] : vector<32x32xf32> to vector<32xf32>
    %221 = vector.shape_cast %220 : vector<32xf32> to vector<32x1xf32>
    %cst_71 = arith.constant 3.200000e+01 : f32
    %222 = vector.broadcast %cst_71 : f32 to vector<32x1xf32>
    %223 = arith.divf %221, %222 : vector<32x1xf32>
    %224 = vector.broadcast %223 : vector<32x1xf32> to vector<32x32xf32>
    %225 = arith.subf %193, %224 : vector<32x32xf32>
    %226 = arith.mulf %225, %225 : vector<32x32xf32>
    %cst_72 = arith.constant dense<0.000000e+00> : vector<32xf32>
    %227 = vector.multi_reduction <add>, %226, %cst_72 [1] : vector<32x32xf32> to vector<32xf32>
    %228 = vector.shape_cast %227 : vector<32xf32> to vector<32x1xf32>
    %cst_73 = arith.constant 3.200000e+01 : f32
    %229 = vector.broadcast %cst_73 : f32 to vector<32x1xf32>
    %230 = arith.divf %228, %229 : vector<32x1xf32>
    %231 = vector.broadcast %223 : vector<32x1xf32> to vector<32x32xf32>
    %232 = arith.subf %193, %231 : vector<32x32xf32>
    %cst_74 = arith.constant 9.99999974E-6 : f32
    %233 = vector.broadcast %cst_74 : f32 to vector<32x1xf32>
    %234 = arith.addf %230, %233 : vector<32x1xf32>
    %235 = math.rsqrt %234 : vector<32x1xf32>
    %236 = vector.broadcast %235 : vector<32x1xf32> to vector<32x32xf32>
    %237 = arith.mulf %232, %236 : vector<32x32xf32>
    %238 = vector.shape_cast %207 : vector<32xf32> to vector<1x32xf32>
    %239 = vector.broadcast %238 : vector<1x32xf32> to vector<32x32xf32>
    %240 = arith.mulf %237, %239 : vector<32x32xf32>
    %241 = vector.shape_cast %209 : vector<32xf32> to vector<1x32xf32>
    %242 = vector.broadcast %241 : vector<1x32xf32> to vector<32x32xf32>
    %243 = arith.addf %240, %242 : vector<32x32xf32>
    %cst_75 = arith.constant dense<0.000000e+00> : vector<32x96xf32>
    %244 = tpu.matmul %243, %195, %cst_75 {dimension_numbers = #tpu.dot_dimension_numbers<[1], [0], [0], [1], [0, 0, 1, 1], [], []>} : vector<32x32xf32>, vector<32x96xf32>, vector<32x96xf32> -> vector<32x96xf32>
    %245 = vector.shape_cast %205 : vector<96xf32> to vector<1x96xf32>
    %246 = vector.broadcast %245 : vector<1x96xf32> to vector<32x96xf32>
    %247 = arith.addf %244, %246 : vector<32x96xf32>
    %248 = vector.shape_cast %247 : vector<32x96xf32> to vector<4x8x96xf32>
    %249 = vector.shape_cast %215 : vector<32xf32> to vector<1x32xf32>
    %250 = vector.broadcast %249 : vector<1x32xf32> to vector<32x32xf32>
    %251 = arith.addf %193, %250 : vector<32x32xf32>
    %252 = vector.extract_strided_slice %248 {offsets = [0, 0, 0], sizes = [4, 8, 8], strides = [1, 1, 1]} : vector<4x8x96xf32> to vector<4x8x8xf32>
    %253 = vector.extract_strided_slice %248 {offsets = [0, 0, 32], sizes = [4, 8, 8], strides = [1, 1, 1]} : vector<4x8x96xf32> to vector<4x8x8xf32>
    %254 = vector.extract_strided_slice %248 {offsets = [0, 0, 64], sizes = [4, 8, 8], strides = [1, 1, 1]} : vector<4x8x96xf32> to vector<4x8x8xf32>
    %cst_76 = arith.constant dense<0.000000e+00> : vector<4x8x8xf32>
    %255 = tpu.matmul %252, %253, %cst_76 {dimension_numbers = #tpu.dot_dimension_numbers<[2], [2], [1], [1], [0, 0, 0, 1, 1, 1], [0], [0]>} : vector<4x8x8xf32>, vector<4x8x8xf32>, vector<4x8x8xf32> -> vector<4x8x8xf32>
    %cst_77 = arith.constant 0.353553385 : f32
    %256 = vector.broadcast %cst_77 : f32 to vector<4x8x8xf32>
    %257 = arith.mulf %255, %256 : vector<4x8x8xf32>
    %cst_78 = arith.constant -1.000000e+30 : f32
    %258 = vector.broadcast %cst_78 : f32 to vector<4x8x8xf32>
    %259 = arith.select %8, %258, %257 : vector<4x8x8xi1>, vector<4x8x8xf32>
    %cst_79 = arith.constant dense<0xFF800000> : vector<4x8xf32>
    %260 = vector.multi_reduction <maximumf>, %259, %cst_79 [2] : vector<4x8x8xf32> to vector<4x8xf32>
    %261 = vector.shape_cast %260 : vector<4x8xf32> to vector<4x8x1xf32>
    %262 = vector.broadcast %261 : vector<4x8x1xf32> to vector<4x8x8xf32>
    %263 = arith.subf %259, %262 : vector<4x8x8xf32>
    %264 = math.exp %263 : vector<4x8x8xf32>
    %cst_80 = arith.constant dense<0.000000e+00> : vector<4x8xf32>
    %265 = vector.multi_reduction <add>, %264, %cst_80 [2] : vector<4x8x8xf32> to vector<4x8xf32>
    %266 = vector.shape_cast %265 : vector<4x8xf32> to vector<4x8x1xf32>
    %267 = tpu.reciprocal %266 : vector<4x8x1xf32> -> vector<4x8x1xf32>
    %268 = vector.broadcast %267 : vector<4x8x1xf32> to vector<4x8x8xf32>
    %269 = arith.mulf %264, %268 : vector<4x8x8xf32>
    %cst_81 = arith.constant dense<0.000000e+00> : vector<4x8x8xf32>
    %270 = tpu.matmul %269, %254, %cst_81 {dimension_numbers = #tpu.dot_dimension_numbers<[2], [1], [1], [2], [0, 0, 0, 1, 1, 2], [0], [0]>} : vector<4x8x8xf32>, vector<4x8x8xf32>, vector<4x8x8xf32> -> vector<4x8x8xf32>
    %271 = vector.shape_cast %270 : vector<4x8x8xf32> to vector<32x8xf32>
    %272 = vector.extract_strided_slice %199 {offsets = [0, 0], sizes = [8, 32], strides = [1, 1]} : vector<32x32xf32> to vector<8x32xf32>
    %cst_82 = arith.constant dense<0.000000e+00> : vector<32x32xf32>
    %273 = tpu.matmul %271, %272, %cst_82 {dimension_numbers = #tpu.dot_dimension_numbers<[1], [0], [0], [1], [0, 0, 1, 1], [], []>} : vector<32x8xf32>, vector<8x32xf32>, vector<32x32xf32> -> vector<32x32xf32>
    %274 = arith.addf %251, %273 : vector<32x32xf32>
    %275 = vector.extract_strided_slice %248 {offsets = [0, 0, 8], sizes = [4, 8, 8], strides = [1, 1, 1]} : vector<4x8x96xf32> to vector<4x8x8xf32>
    %276 = vector.extract_strided_slice %248 {offsets = [0, 0, 40], sizes = [4, 8, 8], strides = [1, 1, 1]} : vector<4x8x96xf32> to vector<4x8x8xf32>
    %277 = vector.extract_strided_slice %248 {offsets = [0, 0, 72], sizes = [4, 8, 8], strides = [1, 1, 1]} : vector<4x8x96xf32> to vector<4x8x8xf32>
    %cst_83 = arith.constant dense<0.000000e+00> : vector<4x8x8xf32>
    %278 = tpu.matmul %275, %276, %cst_83 {dimension_numbers = #tpu.dot_dimension_numbers<[2], [2], [1], [1], [0, 0, 0, 1, 1, 1], [0], [0]>} : vector<4x8x8xf32>, vector<4x8x8xf32>, vector<4x8x8xf32> -> vector<4x8x8xf32>
    %cst_84 = arith.constant 0.353553385 : f32
    %279 = vector.broadcast %cst_84 : f32 to vector<4x8x8xf32>
    %280 = arith.mulf %278, %279 : vector<4x8x8xf32>
    %cst_85 = arith.constant -1.000000e+30 : f32
    %281 = vector.broadcast %cst_85 : f32 to vector<4x8x8xf32>
    %282 = arith.select %8, %281, %280 : vector<4x8x8xi1>, vector<4x8x8xf32>
    %cst_86 = arith.constant dense<0xFF800000> : vector<4x8xf32>
    %283 = vector.multi_reduction <maximumf>, %282, %cst_86 [2] : vector<4x8x8xf32> to vector<4x8xf32>
    %284 = vector.shape_cast %283 : vector<4x8xf32> to vector<4x8x1xf32>
    %285 = vector.broadcast %284 : vector<4x8x1xf32> to vector<4x8x8xf32>
    %286 = arith.subf %282, %285 : vector<4x8x8xf32>
    %287 = math.exp %286 : vector<4x8x8xf32>
    %cst_87 = arith.constant dense<0.000000e+00> : vector<4x8xf32>
    %288 = vector.multi_reduction <add>, %287, %cst_87 [2] : vector<4x8x8xf32> to vector<4x8xf32>
    %289 = vector.shape_cast %288 : vector<4x8xf32> to vector<4x8x1xf32>
    %290 = tpu.reciprocal %289 : vector<4x8x1xf32> -> vector<4x8x1xf32>
    %291 = vector.broadcast %290 : vector<4x8x1xf32> to vector<4x8x8xf32>
    %292 = arith.mulf %287, %291 : vector<4x8x8xf32>
    %cst_88 = arith.constant dense<0.000000e+00> : vector<4x8x8xf32>
    %293 = tpu.matmul %292, %277, %cst_88 {dimension_numbers = #tpu.dot_dimension_numbers<[2], [1], [1], [2], [0, 0, 0, 1, 1, 2], [0], [0]>} : vector<4x8x8xf32>, vector<4x8x8xf32>, vector<4x8x8xf32> -> vector<4x8x8xf32>
    %294 = vector.shape_cast %293 : vector<4x8x8xf32> to vector<32x8xf32>
    %295 = vector.extract_strided_slice %199 {offsets = [8, 0], sizes = [8, 32], strides = [1, 1]} : vector<32x32xf32> to vector<8x32xf32>
    %cst_89 = arith.constant dense<0.000000e+00> : vector<32x32xf32>
    %296 = tpu.matmul %294, %295, %cst_89 {dimension_numbers = #tpu.dot_dimension_numbers<[1], [0], [0], [1], [0, 0, 1, 1], [], []>} : vector<32x8xf32>, vector<8x32xf32>, vector<32x32xf32> -> vector<32x32xf32>
    %297 = arith.addf %274, %296 : vector<32x32xf32>
    %298 = vector.extract_strided_slice %248 {offsets = [0, 0, 16], sizes = [4, 8, 8], strides = [1, 1, 1]} : vector<4x8x96xf32> to vector<4x8x8xf32>
    %299 = vector.extract_strided_slice %248 {offsets = [0, 0, 48], sizes = [4, 8, 8], strides = [1, 1, 1]} : vector<4x8x96xf32> to vector<4x8x8xf32>
    %300 = vector.extract_strided_slice %248 {offsets = [0, 0, 80], sizes = [4, 8, 8], strides = [1, 1, 1]} : vector<4x8x96xf32> to vector<4x8x8xf32>
    %cst_90 = arith.constant dense<0.000000e+00> : vector<4x8x8xf32>
    %301 = tpu.matmul %298, %299, %cst_90 {dimension_numbers = #tpu.dot_dimension_numbers<[2], [2], [1], [1], [0, 0, 0, 1, 1, 1], [0], [0]>} : vector<4x8x8xf32>, vector<4x8x8xf32>, vector<4x8x8xf32> -> vector<4x8x8xf32>
    %cst_91 = arith.constant 0.353553385 : f32
    %302 = vector.broadcast %cst_91 : f32 to vector<4x8x8xf32>
    %303 = arith.mulf %301, %302 : vector<4x8x8xf32>
    %cst_92 = arith.constant -1.000000e+30 : f32
    %304 = vector.broadcast %cst_92 : f32 to vector<4x8x8xf32>
    %305 = arith.select %8, %304, %303 : vector<4x8x8xi1>, vector<4x8x8xf32>
    %cst_93 = arith.constant dense<0xFF800000> : vector<4x8xf32>
    %306 = vector.multi_reduction <maximumf>, %305, %cst_93 [2] : vector<4x8x8xf32> to vector<4x8xf32>
    %307 = vector.shape_cast %306 : vector<4x8xf32> to vector<4x8x1xf32>
    %308 = vector.broadcast %307 : vector<4x8x1xf32> to vector<4x8x8xf32>
    %309 = arith.subf %305, %308 : vector<4x8x8xf32>
    %310 = math.exp %309 : vector<4x8x8xf32>
    %cst_94 = arith.constant dense<0.000000e+00> : vector<4x8xf32>
    %311 = vector.multi_reduction <add>, %310, %cst_94 [2] : vector<4x8x8xf32> to vector<4x8xf32>
    %312 = vector.shape_cast %311 : vector<4x8xf32> to vector<4x8x1xf32>
    %313 = tpu.reciprocal %312 : vector<4x8x1xf32> -> vector<4x8x1xf32>
    %314 = vector.broadcast %313 : vector<4x8x1xf32> to vector<4x8x8xf32>
    %315 = arith.mulf %310, %314 : vector<4x8x8xf32>
    %cst_95 = arith.constant dense<0.000000e+00> : vector<4x8x8xf32>
    %316 = tpu.matmul %315, %300, %cst_95 {dimension_numbers = #tpu.dot_dimension_numbers<[2], [1], [1], [2], [0, 0, 0, 1, 1, 2], [0], [0]>} : vector<4x8x8xf32>, vector<4x8x8xf32>, vector<4x8x8xf32> -> vector<4x8x8xf32>
    %317 = vector.shape_cast %316 : vector<4x8x8xf32> to vector<32x8xf32>
    %318 = vector.extract_strided_slice %199 {offsets = [16, 0], sizes = [8, 32], strides = [1, 1]} : vector<32x32xf32> to vector<8x32xf32>
    %cst_96 = arith.constant dense<0.000000e+00> : vector<32x32xf32>
    %319 = tpu.matmul %317, %318, %cst_96 {dimension_numbers = #tpu.dot_dimension_numbers<[1], [0], [0], [1], [0, 0, 1, 1], [], []>} : vector<32x8xf32>, vector<8x32xf32>, vector<32x32xf32> -> vector<32x32xf32>
    %320 = arith.addf %297, %319 : vector<32x32xf32>
    %321 = vector.extract_strided_slice %248 {offsets = [0, 0, 24], sizes = [4, 8, 8], strides = [1, 1, 1]} : vector<4x8x96xf32> to vector<4x8x8xf32>
    %322 = vector.extract_strided_slice %248 {offsets = [0, 0, 56], sizes = [4, 8, 8], strides = [1, 1, 1]} : vector<4x8x96xf32> to vector<4x8x8xf32>
    %323 = vector.extract_strided_slice %248 {offsets = [0, 0, 88], sizes = [4, 8, 8], strides = [1, 1, 1]} : vector<4x8x96xf32> to vector<4x8x8xf32>
    %cst_97 = arith.constant dense<0.000000e+00> : vector<4x8x8xf32>
    %324 = tpu.matmul %321, %322, %cst_97 {dimension_numbers = #tpu.dot_dimension_numbers<[2], [2], [1], [1], [0, 0, 0, 1, 1, 1], [0], [0]>} : vector<4x8x8xf32>, vector<4x8x8xf32>, vector<4x8x8xf32> -> vector<4x8x8xf32>
    %cst_98 = arith.constant 0.353553385 : f32
    %325 = vector.broadcast %cst_98 : f32 to vector<4x8x8xf32>
    %326 = arith.mulf %324, %325 : vector<4x8x8xf32>
    %cst_99 = arith.constant -1.000000e+30 : f32
    %327 = vector.broadcast %cst_99 : f32 to vector<4x8x8xf32>
    %328 = arith.select %8, %327, %326 : vector<4x8x8xi1>, vector<4x8x8xf32>
    %cst_100 = arith.constant dense<0xFF800000> : vector<4x8xf32>
    %329 = vector.multi_reduction <maximumf>, %328, %cst_100 [2] : vector<4x8x8xf32> to vector<4x8xf32>
    %330 = vector.shape_cast %329 : vector<4x8xf32> to vector<4x8x1xf32>
    %331 = vector.broadcast %330 : vector<4x8x1xf32> to vector<4x8x8xf32>
    %332 = arith.subf %328, %331 : vector<4x8x8xf32>
    %333 = math.exp %332 : vector<4x8x8xf32>
    %cst_101 = arith.constant dense<0.000000e+00> : vector<4x8xf32>
    %334 = vector.multi_reduction <add>, %333, %cst_101 [2] : vector<4x8x8xf32> to vector<4x8xf32>
    %335 = vector.shape_cast %334 : vector<4x8xf32> to vector<4x8x1xf32>
    %336 = tpu.reciprocal %335 : vector<4x8x1xf32> -> vector<4x8x1xf32>
    %337 = vector.broadcast %336 : vector<4x8x1xf32> to vector<4x8x8xf32>
    %338 = arith.mulf %333, %337 : vector<4x8x8xf32>
    %cst_102 = arith.constant dense<0.000000e+00> : vector<4x8x8xf32>
    %339 = tpu.matmul %338, %323, %cst_102 {dimension_numbers = #tpu.dot_dimension_numbers<[2], [1], [1], [2], [0, 0, 0, 1, 1, 2], [0], [0]>} : vector<4x8x8xf32>, vector<4x8x8xf32>, vector<4x8x8xf32> -> vector<4x8x8xf32>
    %340 = vector.shape_cast %339 : vector<4x8x8xf32> to vector<32x8xf32>
    %341 = vector.extract_strided_slice %199 {offsets = [24, 0], sizes = [8, 32], strides = [1, 1]} : vector<32x32xf32> to vector<8x32xf32>
    %cst_103 = arith.constant dense<0.000000e+00> : vector<32x32xf32>
    %342 = tpu.matmul %340, %341, %cst_103 {dimension_numbers = #tpu.dot_dimension_numbers<[1], [0], [0], [1], [0, 0, 1, 1], [], []>} : vector<32x8xf32>, vector<8x32xf32>, vector<32x32xf32> -> vector<32x32xf32>
    %343 = arith.addf %320, %342 : vector<32x32xf32>
    %cst_104 = arith.constant dense<0.000000e+00> : vector<32xf32>
    %344 = vector.multi_reduction <add>, %343, %cst_104 [1] : vector<32x32xf32> to vector<32xf32>
    %345 = vector.shape_cast %344 : vector<32xf32> to vector<32x1xf32>
    %cst_105 = arith.constant 3.200000e+01 : f32
    %346 = vector.broadcast %cst_105 : f32 to vector<32x1xf32>
    %347 = arith.divf %345, %346 : vector<32x1xf32>
    %348 = vector.broadcast %347 : vector<32x1xf32> to vector<32x32xf32>
    %349 = arith.subf %343, %348 : vector<32x32xf32>
    %350 = arith.mulf %349, %349 : vector<32x32xf32>
    %cst_106 = arith.constant dense<0.000000e+00> : vector<32xf32>
    %351 = vector.multi_reduction <add>, %350, %cst_106 [1] : vector<32x32xf32> to vector<32xf32>
    %352 = vector.shape_cast %351 : vector<32xf32> to vector<32x1xf32>
    %cst_107 = arith.constant 3.200000e+01 : f32
    %353 = vector.broadcast %cst_107 : f32 to vector<32x1xf32>
    %354 = arith.divf %352, %353 : vector<32x1xf32>
    %355 = vector.broadcast %347 : vector<32x1xf32> to vector<32x32xf32>
    %356 = arith.subf %343, %355 : vector<32x32xf32>
    %cst_108 = arith.constant 9.99999974E-6 : f32
    %357 = vector.broadcast %cst_108 : f32 to vector<32x1xf32>
    %358 = arith.addf %354, %357 : vector<32x1xf32>
    %359 = math.rsqrt %358 : vector<32x1xf32>
    %360 = vector.broadcast %359 : vector<32x1xf32> to vector<32x32xf32>
    %361 = arith.mulf %356, %360 : vector<32x32xf32>
    %362 = vector.shape_cast %211 : vector<32xf32> to vector<1x32xf32>
    %363 = vector.broadcast %362 : vector<1x32xf32> to vector<32x32xf32>
    %364 = arith.mulf %361, %363 : vector<32x32xf32>
    %365 = vector.shape_cast %213 : vector<32xf32> to vector<1x32xf32>
    %366 = vector.broadcast %365 : vector<1x32xf32> to vector<32x32xf32>
    %367 = arith.addf %364, %366 : vector<32x32xf32>
    %cst_109 = arith.constant dense<0.000000e+00> : vector<32x64xf32>
    %368 = tpu.matmul %367, %197, %cst_109 {dimension_numbers = #tpu.dot_dimension_numbers<[1], [0], [0], [1], [0, 0, 1, 1], [], []>} : vector<32x32xf32>, vector<32x64xf32>, vector<32x64xf32> -> vector<32x64xf32>
    %369 = vector.shape_cast %217 : vector<64xf32> to vector<1x64xf32>
    %370 = vector.broadcast %369 : vector<1x64xf32> to vector<32x64xf32>
    %371 = arith.addf %368, %370 : vector<32x64xf32>
    %cst_110 = arith.constant 0.000000e+00 : f32
    %372 = vector.broadcast %cst_110 : f32 to vector<32x64xf32>
    %373 = arith.maximumf %371, %372 : vector<32x64xf32>
    %cst_111 = arith.constant dense<0.000000e+00> : vector<32x32xf32>
    %374 = tpu.matmul %373, %201, %cst_111 {dimension_numbers = #tpu.dot_dimension_numbers<[1], [0], [0], [1], [0, 0, 1, 1], [], []>} : vector<32x64xf32>, vector<64x32xf32>, vector<32x32xf32> -> vector<32x32xf32>
    %375 = arith.addf %343, %374 : vector<32x32xf32>
    %376 = vector.shape_cast %219 : vector<32xf32> to vector<1x32xf32>
    %377 = vector.broadcast %376 : vector<1x32xf32> to vector<32x32xf32>
    %378 = arith.addf %375, %377 : vector<32x32xf32>
    %c2 = arith.constant 2 : index
    %c0_112 = arith.constant 0 : index
    %c0_113 = arith.constant 0 : index
    %379 = vector.load %arg3[%c2, %c0_112, %c0_113] : memref<3x168x96xf32, #tpu.memory_space<vmem>>, vector<1x32x96xf32>
    %380 = vector.shape_cast %379 : vector<1x32x96xf32> to vector<32x96xf32>
    %c2_114 = arith.constant 2 : index
    %c32_115 = arith.constant 32 : index
    %c0_116 = arith.constant 0 : index
    %381 = vector.load %arg3[%c2_114, %c32_115, %c0_116] : memref<3x168x96xf32, #tpu.memory_space<vmem>>, vector<1x32x64xf32>
    %382 = vector.shape_cast %381 : vector<1x32x64xf32> to vector<32x64xf32>
    %c2_117 = arith.constant 2 : index
    %c64_118 = arith.constant 64 : index
    %c0_119 = arith.constant 0 : index
    %383 = vector.load %arg3[%c2_117, %c64_118, %c0_119] : memref<3x168x96xf32, #tpu.memory_space<vmem>>, vector<1x32x32xf32>
    %384 = vector.shape_cast %383 : vector<1x32x32xf32> to vector<32x32xf32>
    %c2_120 = arith.constant 2 : index
    %c96_121 = arith.constant 96 : index
    %c0_122 = arith.constant 0 : index
    %385 = vector.load %arg3[%c2_120, %c96_121, %c0_122] : memref<3x168x96xf32, #tpu.memory_space<vmem>>, vector<1x64x32xf32>
    %386 = vector.shape_cast %385 : vector<1x64x32xf32> to vector<64x32xf32>
    %c2_123 = arith.constant 2 : index
    %c160_124 = arith.constant 160 : index
    %c0_125 = arith.constant 0 : index
    %387 = vector.load %arg3[%c2_123, %c160_124, %c0_125] : memref<3x168x96xf32, #tpu.memory_space<vmem>>, vector<1x8x96xf32>
    %388 = vector.shape_cast %387 : vector<1x8x96xf32> to vector<8x96xf32>
    %389 = vector.extract_strided_slice %388 {offsets = [0, 0], sizes = [1, 96], strides = [1, 1]} : vector<8x96xf32> to vector<1x96xf32>
    %390 = vector.shape_cast %389 : vector<1x96xf32> to vector<96xf32>
    %391 = vector.extract_strided_slice %388 {offsets = [1, 0], sizes = [1, 32], strides = [1, 1]} : vector<8x96xf32> to vector<1x32xf32>
    %392 = vector.shape_cast %391 : vector<1x32xf32> to vector<32xf32>
    %393 = vector.extract_strided_slice %388 {offsets = [2, 0], sizes = [1, 32], strides = [1, 1]} : vector<8x96xf32> to vector<1x32xf32>
    %394 = vector.shape_cast %393 : vector<1x32xf32> to vector<32xf32>
    %395 = vector.extract_strided_slice %388 {offsets = [3, 0], sizes = [1, 32], strides = [1, 1]} : vector<8x96xf32> to vector<1x32xf32>
    %396 = vector.shape_cast %395 : vector<1x32xf32> to vector<32xf32>
    %397 = vector.extract_strided_slice %388 {offsets = [4, 0], sizes = [1, 32], strides = [1, 1]} : vector<8x96xf32> to vector<1x32xf32>
    %398 = vector.shape_cast %397 : vector<1x32xf32> to vector<32xf32>
    %399 = vector.extract_strided_slice %388 {offsets = [5, 0], sizes = [1, 32], strides = [1, 1]} : vector<8x96xf32> to vector<1x32xf32>
    %400 = vector.shape_cast %399 : vector<1x32xf32> to vector<32xf32>
    %401 = vector.extract_strided_slice %388 {offsets = [6, 0], sizes = [1, 64], strides = [1, 1]} : vector<8x96xf32> to vector<1x64xf32>
    %402 = vector.shape_cast %401 : vector<1x64xf32> to vector<64xf32>
    %403 = vector.extract_strided_slice %388 {offsets = [7, 0], sizes = [1, 32], strides = [1, 1]} : vector<8x96xf32> to vector<1x32xf32>
    %404 = vector.shape_cast %403 : vector<1x32xf32> to vector<32xf32>
    %cst_126 = arith.constant dense<0.000000e+00> : vector<32xf32>
    %405 = vector.multi_reduction <add>, %378, %cst_126 [1] : vector<32x32xf32> to vector<32xf32>
    %406 = vector.shape_cast %405 : vector<32xf32> to vector<32x1xf32>
    %cst_127 = arith.constant 3.200000e+01 : f32
    %407 = vector.broadcast %cst_127 : f32 to vector<32x1xf32>
    %408 = arith.divf %406, %407 : vector<32x1xf32>
    %409 = vector.broadcast %408 : vector<32x1xf32> to vector<32x32xf32>
    %410 = arith.subf %378, %409 : vector<32x32xf32>
    %411 = arith.mulf %410, %410 : vector<32x32xf32>
    %cst_128 = arith.constant dense<0.000000e+00> : vector<32xf32>
    %412 = vector.multi_reduction <add>, %411, %cst_128 [1] : vector<32x32xf32> to vector<32xf32>
    %413 = vector.shape_cast %412 : vector<32xf32> to vector<32x1xf32>
    %cst_129 = arith.constant 3.200000e+01 : f32
    %414 = vector.broadcast %cst_129 : f32 to vector<32x1xf32>
    %415 = arith.divf %413, %414 : vector<32x1xf32>
    %416 = vector.broadcast %408 : vector<32x1xf32> to vector<32x32xf32>
    %417 = arith.subf %378, %416 : vector<32x32xf32>
    %cst_130 = arith.constant 9.99999974E-6 : f32
    %418 = vector.broadcast %cst_130 : f32 to vector<32x1xf32>
    %419 = arith.addf %415, %418 : vector<32x1xf32>
    %420 = math.rsqrt %419 : vector<32x1xf32>
    %421 = vector.broadcast %420 : vector<32x1xf32> to vector<32x32xf32>
    %422 = arith.mulf %417, %421 : vector<32x32xf32>
    %423 = vector.shape_cast %392 : vector<32xf32> to vector<1x32xf32>
    %424 = vector.broadcast %423 : vector<1x32xf32> to vector<32x32xf32>
    %425 = arith.mulf %422, %424 : vector<32x32xf32>
    %426 = vector.shape_cast %394 : vector<32xf32> to vector<1x32xf32>
    %427 = vector.broadcast %426 : vector<1x32xf32> to vector<32x32xf32>
    %428 = arith.addf %425, %427 : vector<32x32xf32>
    %cst_131 = arith.constant dense<0.000000e+00> : vector<32x96xf32>
    %429 = tpu.matmul %428, %380, %cst_131 {dimension_numbers = #tpu.dot_dimension_numbers<[1], [0], [0], [1], [0, 0, 1, 1], [], []>} : vector<32x32xf32>, vector<32x96xf32>, vector<32x96xf32> -> vector<32x96xf32>
    %430 = vector.shape_cast %390 : vector<96xf32> to vector<1x96xf32>
    %431 = vector.broadcast %430 : vector<1x96xf32> to vector<32x96xf32>
    %432 = arith.addf %429, %431 : vector<32x96xf32>
    %433 = vector.shape_cast %432 : vector<32x96xf32> to vector<4x8x96xf32>
    %434 = vector.shape_cast %400 : vector<32xf32> to vector<1x32xf32>
    %435 = vector.broadcast %434 : vector<1x32xf32> to vector<32x32xf32>
    %436 = arith.addf %378, %435 : vector<32x32xf32>
    %437 = vector.extract_strided_slice %433 {offsets = [0, 0, 0], sizes = [4, 8, 8], strides = [1, 1, 1]} : vector<4x8x96xf32> to vector<4x8x8xf32>
    %438 = vector.extract_strided_slice %433 {offsets = [0, 0, 32], sizes = [4, 8, 8], strides = [1, 1, 1]} : vector<4x8x96xf32> to vector<4x8x8xf32>
    %439 = vector.extract_strided_slice %433 {offsets = [0, 0, 64], sizes = [4, 8, 8], strides = [1, 1, 1]} : vector<4x8x96xf32> to vector<4x8x8xf32>
    %cst_132 = arith.constant dense<0.000000e+00> : vector<4x8x8xf32>
    %440 = tpu.matmul %437, %438, %cst_132 {dimension_numbers = #tpu.dot_dimension_numbers<[2], [2], [1], [1], [0, 0, 0, 1, 1, 1], [0], [0]>} : vector<4x8x8xf32>, vector<4x8x8xf32>, vector<4x8x8xf32> -> vector<4x8x8xf32>
    %cst_133 = arith.constant 0.353553385 : f32
    %441 = vector.broadcast %cst_133 : f32 to vector<4x8x8xf32>
    %442 = arith.mulf %440, %441 : vector<4x8x8xf32>
    %cst_134 = arith.constant -1.000000e+30 : f32
    %443 = vector.broadcast %cst_134 : f32 to vector<4x8x8xf32>
    %444 = arith.select %8, %443, %442 : vector<4x8x8xi1>, vector<4x8x8xf32>
    %cst_135 = arith.constant dense<0xFF800000> : vector<4x8xf32>
    %445 = vector.multi_reduction <maximumf>, %444, %cst_135 [2] : vector<4x8x8xf32> to vector<4x8xf32>
    %446 = vector.shape_cast %445 : vector<4x8xf32> to vector<4x8x1xf32>
    %447 = vector.broadcast %446 : vector<4x8x1xf32> to vector<4x8x8xf32>
    %448 = arith.subf %444, %447 : vector<4x8x8xf32>
    %449 = math.exp %448 : vector<4x8x8xf32>
    %cst_136 = arith.constant dense<0.000000e+00> : vector<4x8xf32>
    %450 = vector.multi_reduction <add>, %449, %cst_136 [2] : vector<4x8x8xf32> to vector<4x8xf32>
    %451 = vector.shape_cast %450 : vector<4x8xf32> to vector<4x8x1xf32>
    %452 = tpu.reciprocal %451 : vector<4x8x1xf32> -> vector<4x8x1xf32>
    %453 = vector.broadcast %452 : vector<4x8x1xf32> to vector<4x8x8xf32>
    %454 = arith.mulf %449, %453 : vector<4x8x8xf32>
    %cst_137 = arith.constant dense<0.000000e+00> : vector<4x8x8xf32>
    %455 = tpu.matmul %454, %439, %cst_137 {dimension_numbers = #tpu.dot_dimension_numbers<[2], [1], [1], [2], [0, 0, 0, 1, 1, 2], [0], [0]>} : vector<4x8x8xf32>, vector<4x8x8xf32>, vector<4x8x8xf32> -> vector<4x8x8xf32>
    %456 = vector.shape_cast %455 : vector<4x8x8xf32> to vector<32x8xf32>
    %457 = vector.extract_strided_slice %384 {offsets = [0, 0], sizes = [8, 32], strides = [1, 1]} : vector<32x32xf32> to vector<8x32xf32>
    %cst_138 = arith.constant dense<0.000000e+00> : vector<32x32xf32>
    %458 = tpu.matmul %456, %457, %cst_138 {dimension_numbers = #tpu.dot_dimension_numbers<[1], [0], [0], [1], [0, 0, 1, 1], [], []>} : vector<32x8xf32>, vector<8x32xf32>, vector<32x32xf32> -> vector<32x32xf32>
    %459 = arith.addf %436, %458 : vector<32x32xf32>
    %460 = vector.extract_strided_slice %433 {offsets = [0, 0, 8], sizes = [4, 8, 8], strides = [1, 1, 1]} : vector<4x8x96xf32> to vector<4x8x8xf32>
    %461 = vector.extract_strided_slice %433 {offsets = [0, 0, 40], sizes = [4, 8, 8], strides = [1, 1, 1]} : vector<4x8x96xf32> to vector<4x8x8xf32>
    %462 = vector.extract_strided_slice %433 {offsets = [0, 0, 72], sizes = [4, 8, 8], strides = [1, 1, 1]} : vector<4x8x96xf32> to vector<4x8x8xf32>
    %cst_139 = arith.constant dense<0.000000e+00> : vector<4x8x8xf32>
    %463 = tpu.matmul %460, %461, %cst_139 {dimension_numbers = #tpu.dot_dimension_numbers<[2], [2], [1], [1], [0, 0, 0, 1, 1, 1], [0], [0]>} : vector<4x8x8xf32>, vector<4x8x8xf32>, vector<4x8x8xf32> -> vector<4x8x8xf32>
    %cst_140 = arith.constant 0.353553385 : f32
    %464 = vector.broadcast %cst_140 : f32 to vector<4x8x8xf32>
    %465 = arith.mulf %463, %464 : vector<4x8x8xf32>
    %cst_141 = arith.constant -1.000000e+30 : f32
    %466 = vector.broadcast %cst_141 : f32 to vector<4x8x8xf32>
    %467 = arith.select %8, %466, %465 : vector<4x8x8xi1>, vector<4x8x8xf32>
    %cst_142 = arith.constant dense<0xFF800000> : vector<4x8xf32>
    %468 = vector.multi_reduction <maximumf>, %467, %cst_142 [2] : vector<4x8x8xf32> to vector<4x8xf32>
    %469 = vector.shape_cast %468 : vector<4x8xf32> to vector<4x8x1xf32>
    %470 = vector.broadcast %469 : vector<4x8x1xf32> to vector<4x8x8xf32>
    %471 = arith.subf %467, %470 : vector<4x8x8xf32>
    %472 = math.exp %471 : vector<4x8x8xf32>
    %cst_143 = arith.constant dense<0.000000e+00> : vector<4x8xf32>
    %473 = vector.multi_reduction <add>, %472, %cst_143 [2] : vector<4x8x8xf32> to vector<4x8xf32>
    %474 = vector.shape_cast %473 : vector<4x8xf32> to vector<4x8x1xf32>
    %475 = tpu.reciprocal %474 : vector<4x8x1xf32> -> vector<4x8x1xf32>
    %476 = vector.broadcast %475 : vector<4x8x1xf32> to vector<4x8x8xf32>
    %477 = arith.mulf %472, %476 : vector<4x8x8xf32>
    %cst_144 = arith.constant dense<0.000000e+00> : vector<4x8x8xf32>
    %478 = tpu.matmul %477, %462, %cst_144 {dimension_numbers = #tpu.dot_dimension_numbers<[2], [1], [1], [2], [0, 0, 0, 1, 1, 2], [0], [0]>} : vector<4x8x8xf32>, vector<4x8x8xf32>, vector<4x8x8xf32> -> vector<4x8x8xf32>
    %479 = vector.shape_cast %478 : vector<4x8x8xf32> to vector<32x8xf32>
    %480 = vector.extract_strided_slice %384 {offsets = [8, 0], sizes = [8, 32], strides = [1, 1]} : vector<32x32xf32> to vector<8x32xf32>
    %cst_145 = arith.constant dense<0.000000e+00> : vector<32x32xf32>
    %481 = tpu.matmul %479, %480, %cst_145 {dimension_numbers = #tpu.dot_dimension_numbers<[1], [0], [0], [1], [0, 0, 1, 1], [], []>} : vector<32x8xf32>, vector<8x32xf32>, vector<32x32xf32> -> vector<32x32xf32>
    %482 = arith.addf %459, %481 : vector<32x32xf32>
    %483 = vector.extract_strided_slice %433 {offsets = [0, 0, 16], sizes = [4, 8, 8], strides = [1, 1, 1]} : vector<4x8x96xf32> to vector<4x8x8xf32>
    %484 = vector.extract_strided_slice %433 {offsets = [0, 0, 48], sizes = [4, 8, 8], strides = [1, 1, 1]} : vector<4x8x96xf32> to vector<4x8x8xf32>
    %485 = vector.extract_strided_slice %433 {offsets = [0, 0, 80], sizes = [4, 8, 8], strides = [1, 1, 1]} : vector<4x8x96xf32> to vector<4x8x8xf32>
    %cst_146 = arith.constant dense<0.000000e+00> : vector<4x8x8xf32>
    %486 = tpu.matmul %483, %484, %cst_146 {dimension_numbers = #tpu.dot_dimension_numbers<[2], [2], [1], [1], [0, 0, 0, 1, 1, 1], [0], [0]>} : vector<4x8x8xf32>, vector<4x8x8xf32>, vector<4x8x8xf32> -> vector<4x8x8xf32>
    %cst_147 = arith.constant 0.353553385 : f32
    %487 = vector.broadcast %cst_147 : f32 to vector<4x8x8xf32>
    %488 = arith.mulf %486, %487 : vector<4x8x8xf32>
    %cst_148 = arith.constant -1.000000e+30 : f32
    %489 = vector.broadcast %cst_148 : f32 to vector<4x8x8xf32>
    %490 = arith.select %8, %489, %488 : vector<4x8x8xi1>, vector<4x8x8xf32>
    %cst_149 = arith.constant dense<0xFF800000> : vector<4x8xf32>
    %491 = vector.multi_reduction <maximumf>, %490, %cst_149 [2] : vector<4x8x8xf32> to vector<4x8xf32>
    %492 = vector.shape_cast %491 : vector<4x8xf32> to vector<4x8x1xf32>
    %493 = vector.broadcast %492 : vector<4x8x1xf32> to vector<4x8x8xf32>
    %494 = arith.subf %490, %493 : vector<4x8x8xf32>
    %495 = math.exp %494 : vector<4x8x8xf32>
    %cst_150 = arith.constant dense<0.000000e+00> : vector<4x8xf32>
    %496 = vector.multi_reduction <add>, %495, %cst_150 [2] : vector<4x8x8xf32> to vector<4x8xf32>
    %497 = vector.shape_cast %496 : vector<4x8xf32> to vector<4x8x1xf32>
    %498 = tpu.reciprocal %497 : vector<4x8x1xf32> -> vector<4x8x1xf32>
    %499 = vector.broadcast %498 : vector<4x8x1xf32> to vector<4x8x8xf32>
    %500 = arith.mulf %495, %499 : vector<4x8x8xf32>
    %cst_151 = arith.constant dense<0.000000e+00> : vector<4x8x8xf32>
    %501 = tpu.matmul %500, %485, %cst_151 {dimension_numbers = #tpu.dot_dimension_numbers<[2], [1], [1], [2], [0, 0, 0, 1, 1, 2], [0], [0]>} : vector<4x8x8xf32>, vector<4x8x8xf32>, vector<4x8x8xf32> -> vector<4x8x8xf32>
    %502 = vector.shape_cast %501 : vector<4x8x8xf32> to vector<32x8xf32>
    %503 = vector.extract_strided_slice %384 {offsets = [16, 0], sizes = [8, 32], strides = [1, 1]} : vector<32x32xf32> to vector<8x32xf32>
    %cst_152 = arith.constant dense<0.000000e+00> : vector<32x32xf32>
    %504 = tpu.matmul %502, %503, %cst_152 {dimension_numbers = #tpu.dot_dimension_numbers<[1], [0], [0], [1], [0, 0, 1, 1], [], []>} : vector<32x8xf32>, vector<8x32xf32>, vector<32x32xf32> -> vector<32x32xf32>
    %505 = arith.addf %482, %504 : vector<32x32xf32>
    %506 = vector.extract_strided_slice %433 {offsets = [0, 0, 24], sizes = [4, 8, 8], strides = [1, 1, 1]} : vector<4x8x96xf32> to vector<4x8x8xf32>
    %507 = vector.extract_strided_slice %433 {offsets = [0, 0, 56], sizes = [4, 8, 8], strides = [1, 1, 1]} : vector<4x8x96xf32> to vector<4x8x8xf32>
    %508 = vector.extract_strided_slice %433 {offsets = [0, 0, 88], sizes = [4, 8, 8], strides = [1, 1, 1]} : vector<4x8x96xf32> to vector<4x8x8xf32>
    %cst_153 = arith.constant dense<0.000000e+00> : vector<4x8x8xf32>
    %509 = tpu.matmul %506, %507, %cst_153 {dimension_numbers = #tpu.dot_dimension_numbers<[2], [2], [1], [1], [0, 0, 0, 1, 1, 1], [0], [0]>} : vector<4x8x8xf32>, vector<4x8x8xf32>, vector<4x8x8xf32> -> vector<4x8x8xf32>
    %cst_154 = arith.constant 0.353553385 : f32
    %510 = vector.broadcast %cst_154 : f32 to vector<4x8x8xf32>
    %511 = arith.mulf %509, %510 : vector<4x8x8xf32>
    %cst_155 = arith.constant -1.000000e+30 : f32
    %512 = vector.broadcast %cst_155 : f32 to vector<4x8x8xf32>
    %513 = arith.select %8, %512, %511 : vector<4x8x8xi1>, vector<4x8x8xf32>
    %cst_156 = arith.constant dense<0xFF800000> : vector<4x8xf32>
    %514 = vector.multi_reduction <maximumf>, %513, %cst_156 [2] : vector<4x8x8xf32> to vector<4x8xf32>
    %515 = vector.shape_cast %514 : vector<4x8xf32> to vector<4x8x1xf32>
    %516 = vector.broadcast %515 : vector<4x8x1xf32> to vector<4x8x8xf32>
    %517 = arith.subf %513, %516 : vector<4x8x8xf32>
    %518 = math.exp %517 : vector<4x8x8xf32>
    %cst_157 = arith.constant dense<0.000000e+00> : vector<4x8xf32>
    %519 = vector.multi_reduction <add>, %518, %cst_157 [2] : vector<4x8x8xf32> to vector<4x8xf32>
    %520 = vector.shape_cast %519 : vector<4x8xf32> to vector<4x8x1xf32>
    %521 = tpu.reciprocal %520 : vector<4x8x1xf32> -> vector<4x8x1xf32>
    %522 = vector.broadcast %521 : vector<4x8x1xf32> to vector<4x8x8xf32>
    %523 = arith.mulf %518, %522 : vector<4x8x8xf32>
    %cst_158 = arith.constant dense<0.000000e+00> : vector<4x8x8xf32>
    %524 = tpu.matmul %523, %508, %cst_158 {dimension_numbers = #tpu.dot_dimension_numbers<[2], [1], [1], [2], [0, 0, 0, 1, 1, 2], [0], [0]>} : vector<4x8x8xf32>, vector<4x8x8xf32>, vector<4x8x8xf32> -> vector<4x8x8xf32>
    %525 = vector.shape_cast %524 : vector<4x8x8xf32> to vector<32x8xf32>
    %526 = vector.extract_strided_slice %384 {offsets = [24, 0], sizes = [8, 32], strides = [1, 1]} : vector<32x32xf32> to vector<8x32xf32>
    %cst_159 = arith.constant dense<0.000000e+00> : vector<32x32xf32>
    %527 = tpu.matmul %525, %526, %cst_159 {dimension_numbers = #tpu.dot_dimension_numbers<[1], [0], [0], [1], [0, 0, 1, 1], [], []>} : vector<32x8xf32>, vector<8x32xf32>, vector<32x32xf32> -> vector<32x32xf32>
    %528 = arith.addf %505, %527 : vector<32x32xf32>
    %cst_160 = arith.constant dense<0.000000e+00> : vector<32xf32>
    %529 = vector.multi_reduction <add>, %528, %cst_160 [1] : vector<32x32xf32> to vector<32xf32>
    %530 = vector.shape_cast %529 : vector<32xf32> to vector<32x1xf32>
    %cst_161 = arith.constant 3.200000e+01 : f32
    %531 = vector.broadcast %cst_161 : f32 to vector<32x1xf32>
    %532 = arith.divf %530, %531 : vector<32x1xf32>
    %533 = vector.broadcast %532 : vector<32x1xf32> to vector<32x32xf32>
    %534 = arith.subf %528, %533 : vector<32x32xf32>
    %535 = arith.mulf %534, %534 : vector<32x32xf32>
    %cst_162 = arith.constant dense<0.000000e+00> : vector<32xf32>
    %536 = vector.multi_reduction <add>, %535, %cst_162 [1] : vector<32x32xf32> to vector<32xf32>
    %537 = vector.shape_cast %536 : vector<32xf32> to vector<32x1xf32>
    %cst_163 = arith.constant 3.200000e+01 : f32
    %538 = vector.broadcast %cst_163 : f32 to vector<32x1xf32>
    %539 = arith.divf %537, %538 : vector<32x1xf32>
    %540 = vector.broadcast %532 : vector<32x1xf32> to vector<32x32xf32>
    %541 = arith.subf %528, %540 : vector<32x32xf32>
    %cst_164 = arith.constant 9.99999974E-6 : f32
    %542 = vector.broadcast %cst_164 : f32 to vector<32x1xf32>
    %543 = arith.addf %539, %542 : vector<32x1xf32>
    %544 = math.rsqrt %543 : vector<32x1xf32>
    %545 = vector.broadcast %544 : vector<32x1xf32> to vector<32x32xf32>
    %546 = arith.mulf %541, %545 : vector<32x32xf32>
    %547 = vector.shape_cast %396 : vector<32xf32> to vector<1x32xf32>
    %548 = vector.broadcast %547 : vector<1x32xf32> to vector<32x32xf32>
    %549 = arith.mulf %546, %548 : vector<32x32xf32>
    %550 = vector.shape_cast %398 : vector<32xf32> to vector<1x32xf32>
    %551 = vector.broadcast %550 : vector<1x32xf32> to vector<32x32xf32>
    %552 = arith.addf %549, %551 : vector<32x32xf32>
    %cst_165 = arith.constant dense<0.000000e+00> : vector<32x64xf32>
    %553 = tpu.matmul %552, %382, %cst_165 {dimension_numbers = #tpu.dot_dimension_numbers<[1], [0], [0], [1], [0, 0, 1, 1], [], []>} : vector<32x32xf32>, vector<32x64xf32>, vector<32x64xf32> -> vector<32x64xf32>
    %554 = vector.shape_cast %402 : vector<64xf32> to vector<1x64xf32>
    %555 = vector.broadcast %554 : vector<1x64xf32> to vector<32x64xf32>
    %556 = arith.addf %553, %555 : vector<32x64xf32>
    %cst_166 = arith.constant 0.000000e+00 : f32
    %557 = vector.broadcast %cst_166 : f32 to vector<32x64xf32>
    %558 = arith.maximumf %556, %557 : vector<32x64xf32>
    %cst_167 = arith.constant dense<0.000000e+00> : vector<32x32xf32>
    %559 = tpu.matmul %558, %386, %cst_167 {dimension_numbers = #tpu.dot_dimension_numbers<[1], [0], [0], [1], [0, 0, 1, 1], [], []>} : vector<32x64xf32>, vector<64x32xf32>, vector<32x32xf32> -> vector<32x32xf32>
    %560 = arith.addf %528, %559 : vector<32x32xf32>
    %561 = vector.shape_cast %404 : vector<32xf32> to vector<1x32xf32>
    %562 = vector.broadcast %561 : vector<1x32xf32> to vector<32x32xf32>
    %563 = arith.addf %560, %562 : vector<32x32xf32>
    %564 = vector.shape_cast %563 : vector<32x32xf32> to vector<4x8x32xf32>
    %c0_168 = arith.constant 0 : index
    %c0_169 = arith.constant 0 : index
    %c0_170 = arith.constant 0 : index
    %565 = vector.load %arg4[%c0_168, %c0_169, %c0_170] : memref<4x8x32xf32, #tpu.memory_space<vmem>>, vector<4x8x32xf32>
    tpu.vector_store %arg4[%c0_168, %c0_169, %c0_170], %564 {strides = array<i32>} : memref<4x8x32xf32, #tpu.memory_space<vmem>>, vector<4x8x32xf32>,
    return
  }
  func.func @transform_0(%arg0: i32) -> (i32, i32, i32) {
    %c0_i32 = arith.constant 0 : i32
    %c0_i32_0 = arith.constant 0 : i32
    %c0_i32_1 = arith.constant 0 : i32
    return %arg0, %c0_i32, %c0_i32_0 : i32, i32, i32
  }
  func.func @transform_1(%arg0: i32) -> (i32, i32) {
    %c0_i32 = arith.constant 0 : i32
    %c0_i32_0 = arith.constant 0 : i32
    return %arg0, %c0_i32 : i32, i32
  }
  func.func @transform_2(%arg0: i32) -> (i32, i32, i32) {
    %c0_i32 = arith.constant 0 : i32
    %c0_i32_0 = arith.constant 0 : i32
    %c0_i32_1 = arith.constant 0 : i32
    %c0_i32_2 = arith.constant 0 : i32
    return %c0_i32, %c0_i32_0, %c0_i32_1 : i32, i32, i32
  }
  func.func @transform_3(%arg0: i32) -> (i32, i32, i32) {
    %c0_i32 = arith.constant 0 : i32
    %c0_i32_0 = arith.constant 0 : i32
    %c0_i32_1 = arith.constant 0 : i32
    return %arg0, %c0_i32, %c0_i32_0 : i32, i32, i32
  }
}

</mosaic_0001>

<bundles_post_ra>
// kernel: tpu_custom_call.1
= control target key start
LH: loop header
LB: loop body
LE: loop exit
PB: predicated region body
PF: predicated region fallthrough
CT: control target
= control target key end

     0   :  { %8 = vsyncpa [#allocation3], 0  ;;  %s7702_s0 = inlined_call_operand.hbm [shape: f32[4,8,32], index: 0, kind: input, shape index: {}]   ;;  %s7703_s1 = inlined_call_operand.vmem [shape: s32[4,1], index: 1, kind: input, shape index: {}]   ;;  %s7704_s2 = inlined_call_operand.hbm [shape: f32[3,168,96], index: 2, kind: input, shape index: {}]   ;;  %s7705_s3 = inlined_call_operand.hbm [shape: f32[4,8,32], index: 3, kind: output, shape index: {}]  }
   0x1   :  { %9 = vsyncpa [#allocation6], 0 }
   0x2   :  { %10 = vsyncpa [#allocation4], 0  ;;  %s15_s14 = sshll.u32 %s7702_s0, 4  ;;  %s6170_s15 = smov [#allocation2]   ;;  %s16_s14 = int_to_ptr.hbm [resolvable:$true] %s15_s14 }
   0x3   :  { %s17_s16 = sshll.u32 %s6170_s15, 4  ;;  %s30_s19 = sshll.u32 %s7704_s2, 4  ;;  %s18_s16 = int_to_ptr.vmem [resolvable:$true] %s17_s16  ;;  %s31_s19 = int_to_ptr.hbm [resolvable:$true] %s30_s19 }
   0x4   :  { %s6171_s20 = smov 128   ;;  %s6172_s21 = smov 8  }
   0x5   :  { %23 = dma.hbm_to_vmem [thread:$0]  %s16_s14, 512, %s18_s16, [#allocation3], %s6171_s20, %s6171_s20, %s6172_s21  }
   0x6   :  { %s6173_s22 = smov [#allocation5]  }
   0x7   :  { %s32_s23 = sshll.u32 %s6173_s22, 4  ;;  %s33_s23 = int_to_ptr.vmem [resolvable:$true] %s32_s23 }
   0x8   :  { %38 = dma.hbm_to_vmem [thread:$0]  %s31_s19, 8064, %s33_s23, [#allocation6], %s6171_s20, %s6171_s20, %s6172_s21  }
   0x9   :  { %6164 = dma.done.wait [#allocation3], 512  }
   0xa   :  { %6165 = vsyncadd [#allocation3], 4294966784 }
   0xb   :  { %6166 = dma.done.wait [#allocation6], 8064  }
   0xc   :  { %6167 = vsyncadd [#allocation6], 4294959232  ;;  %vm97_vm0 = vcmask 261120   ;;  %v49_v0 = vld [vmem:[#allocation2 + $0x10] sm:$0xff]  ;;  %v47_v1 = vld [vmem:[#allocation2] sm:$0xff]  ;;  %v6174_v8 = vmov 32.0  }
   0xd   :  { %v104_v2 = vsel %vm97_vm0, %v49_v0, 0.0  ;;  %v98_v3 = vsel %vm97_vm0, %v47_v1, 0.0  ;;  %v50_v4 = vld [vmem:[#allocation2 + $0x18] sm:$0xff]  ;;  %v48_v5 = vld [vmem:[#allocation2 + $0x8] sm:$0xff]  ;;  %5843 = vrcp.f32 %v6174_v8  ;;  %v78_v36 = vld [vmem:[#allocation5 + $0x10] sm:$0xff]  ;;  %s6175_s0 = smov 96  }
   0xe   :  { %105 = vadd.xlane.f32.xlu1 %v104_v2  ;;  %99 = vadd.xlane.f32.xlu0 %v98_v3  ;;  %v107_v6 = vsel %vm97_vm0, %v50_v4, 0.0  ;;  %v101_v7 = vsel %vm97_vm0, %v48_v5, 0.0  ;;  %v79_v35 = vld [vmem:[#allocation5 + $0x18] sm:$0xff]  ;;  %v77_v37 = vld [vmem:[#allocation5 + $0x8] sm:$0xff]  ;;  %v76_v38 = vld [vmem:[#allocation5] sm:$0xff]  ;;  %s6176_s2 = smov 64  }
   0xf   :  { %228 = vmatpush.msra.mxu0 %v79_v35  ;;  %v96_v59 = vld [vmem:[#allocation5 + $0xa0] sm:$0xff]  ;;  %vm253_vm14 = vcmask 64512   ;;  %s6179_s26 = smov 120   ;;  %s6180_s27 = smov 56  }
  0x10   :  { %v193_v2 = vperm.slane %v96_v59, 1  ;;  %s6181_s28 = smov 80   ;;  %s6182_s29 = smov 112  }
  0x11   :  { %229 = vmatpush.msra.mxu0 %v78_v36  ;;  %s6183_s30 = smov 48   ;;  %s6184_s4 = smov 72  }
  0x12   :  { %s6185_s5 = smov 104   ;;  %s6186_s6 = smov 40  }
  0x13   :  { %v5844_v9 = vpop.eup %5843  ;;  %230 = vmatpush.msra.mxu0 %v77_v37  ;;  %s6187_s7 = smov [#allocation7]   ;;  %s5546_s11 = sshll.u32 %s7705_s3, 4  ;;  %s5547_s11 = int_to_ptr.hbm [resolvable:$true] %s5546_s11 }
  0x14   :  { %v111_v10 = vmul.f32 32.0, %v5844_v9  ;;  %vm115_vm1 = vweird.f32 %v5844_v9  ;;  %s5544_s8 = sshll.u32 %s6187_s7, 4  ;;  %s5545_s8 = int_to_ptr.vmem [resolvable:$true] %s5544_s8 }
  0x15   :  { %231 = vmatpush.msra.mxu0 %v76_v38 }
  0x16   :  { %108 = vadd.xlane.f32.xlu1 %v107_v6  ;;  %102 = vadd.xlane.f32.xlu0 %v101_v7  ;;  %v112_v11 = vsub.f32 1.0, %v111_v10  ;;  %v198_v6 = vperm.slane %v96_v59, 2 }
  0x18   :  { %v113_v12 = vmul.f32 %v5844_v9, %v112_v11 }
  0x1a   :  { %v114_v13 = vadd.f32 %v5844_v9, %v113_v12 }
  0x1c   :  { %v6224_v14 = vsel %vm115_vm1, %v5844_v9, %v114_v13 }
  0x81   :  { %v106_v15 = vpop.xlane.xlu1 %105  ;;  %v100_v16 = vpop.xlane.xlu0 %99 }
  0x82   :  { %v119_v17 = vmul.f32 %v6224_v14, %v106_v15  ;;  %v117_v18 = vmul.f32 %v6224_v14, %v100_v16 }
  0x84   :  { %v6228_v19 = vsub.f32 %v49_v0, %v119_v17  ;;  %v6230_v20 = vsub.f32 %v47_v1, %v117_v18 }
  0x86   :  { %v127_v21 = vmul.f32 %v6228_v19, %v6228_v19  ;;  %v125_v22 = vmul.f32 %v6230_v20, %v6230_v20 }
  0x88   :  { %v135_v23 = vsel %vm97_vm0, %v127_v21, 0.0  ;;  %v129_v24 = vsel %vm97_vm0, %v125_v22, 0.0 }
  0x89   :  { %v109_v25 = vpop.xlane.xlu1 %108  ;;  %136 = vadd.xlane.f32.xlu0 %v135_v23  ;;  %130 = vadd.xlane.f32.xlu2 %v129_v24  ;;  %v103_v26 = vpop.xlane.xlu0 %102 }
  0x8a   :  { %v120_v27 = vmul.f32 %v6224_v14, %v109_v25  ;;  %v118_v28 = vmul.f32 %v6224_v14, %v103_v26 }
  0x8c   :  { %v6240_v29 = vsub.f32 %v50_v4, %v120_v27  ;;  %v6242_v30 = vsub.f32 %v48_v5, %v118_v28 }
  0x8e   :  { %v128_v31 = vmul.f32 %v6240_v29, %v6240_v29  ;;  %v126_v32 = vmul.f32 %v6242_v30, %v6242_v30 }
  0x90   :  { %v138_v33 = vsel %vm97_vm0, %v128_v31, 0.0  ;;  %v132_v34 = vsel %vm97_vm0, %v126_v32, 0.0 }
  0x91   :  { %139 = vadd.xlane.f32.xlu1 %v138_v33  ;;  %133 = vadd.xlane.f32.xlu2 %v132_v34  ;;  %v203_v33 = vperm.slane %v96_v59, 0 }
  0xfc   :  { %v131_v39 = vpop.xlane.xlu2 %130  ;;  %v137_v40 = vpop.xlane.xlu0 %136 }
  0xfd   :  { %v141_v41 = vmul.f32 %v131_v39, %v6224_v14  ;;  %v143_v42 = vmul.f32 %v137_v40, %v6224_v14  ;;  %v51_v40 = vld [vmem:[%s7703_s1] sm:$0xf]  ;;  %s6178_s1 = smov 88  }
  0xff   :  { %v145_v43 = vadd.f32 1e-05, %v141_v41  ;;  %v147_v44 = vadd.f32 1e-05, %v143_v42  ;;  %v6177_v41 = vmov 0  }
 0x100   :  { %5807 = vset.pattern.permute.xlu0 %v6177_v41 }
 0x101   :  { %5845 = vrsqrt.f32 %v145_v43  ;;  %vm155_vm3 = vweird.f32 %v145_v43  ;;  %vm175_vm5 = vweird.f32 %v147_v44 }
 0x102   :  { %5847 = vrsqrt.f32 %v147_v44 }
 0x104   :  { %v140_v45 = vpop.xlane.xlu1 %139  ;;  %v134_v46 = vpop.xlane.xlu2 %133 }
 0x105   :  { %v144_v47 = vmul.f32 %v140_v45, %v6224_v14  ;;  %v142_v48 = vmul.f32 %v134_v46, %v6224_v14 }
 0x107   :  { %v5846_v49 = vpop.eup %5845  ;;  %v148_v50 = vadd.f32 1e-05, %v144_v47  ;;  %v146_v51 = vadd.f32 1e-05, %v142_v48  ;;  %v52_v47 = vlaneseq }
 0x108   :  { %v5848_v52 = vpop.eup %5847  ;;  %v150_v53 = vmul.f32 %v5846_v49, %v145_v43  ;;  %vm156_vm2 = vweird.f32 %v5846_v49 }
 0x109   :  { %v170_v54 = vmul.f32 %v5848_v52, %v147_v44  ;;  %5849 = vrsqrt.f32 %v148_v50  ;;  %vm157_vm4 = vmor %vm155_vm3, %vm156_vm2  ;;  %vm176_vm6 = vweird.f32 %v5848_v52  ;;  %vm165_vm9 = vweird.f32 %v146_v51 }
 0x10a   :  { %v151_v55 = vmul.f32 %v5846_v49, %v150_v53  ;;  %5851 = vrsqrt.f32 %v146_v51  ;;  %vm177_vm8 = vmor %vm175_vm5, %vm176_vm6  ;;  %vm185_vm11 = vweird.f32 %v148_v50  ;;  %v53_v48 = vand.u32 127, %v52_v47 }
 0x10b   :  { %v171_v57 = vmul.f32 %v5848_v52, %v170_v54 }
 0x10c   :  { %v152_v56 = vmul.f32 0.5, %v151_v55 }
 0x10d   :  { %v172_v63 = vmul.f32 0.5, %v171_v57 }
 0x10e   :  { %v153_v58 = vsub.f32 1.5, %v152_v56 }
 0x10f   :  { %v5850_v60 = vpop.eup %5849  ;;  %v173_v7 = vsub.f32 1.5, %v172_v63 }
 0x110   :  { %v5852_v61 = vpop.eup %5851  ;;  %v154_v62 = vmul.f32 %v5846_v49, %v153_v58  ;;  %v180_v0 = vmul.f32 %v5850_v60, %v148_v50  ;;  %vm186_vm12 = vweird.f32 %v5850_v60 }
 0x111   :  { %v160_v1 = vmul.f32 %v5852_v61, %v146_v51  ;;  %vm166_vm7 = vweird.f32 %v5852_v61  ;;  %v174_v13 = vmul.f32 %v5848_v52, %v173_v7  ;;  %vm187_vm13 = vmor %vm185_vm11, %vm186_vm12 }
 0x112   :  { %v158_v3 = vsel %vm157_vm4, %v5846_v49, %v154_v62  ;;  %v181_v8 = vmul.f32 %v5850_v60, %v180_v0  ;;  %vm167_vm10 = vmor %vm165_vm9, %vm166_vm7 }
 0x113   :  { %v161_v4 = vmul.f32 %v5852_v61, %v160_v1  ;;  %v189_v5 = vmul.f32 %v158_v3, %v6230_v20  ;;  %v178_v21 = vsel %vm177_vm8, %v5848_v52, %v174_v13 }
 0x114   :  { %v182_v15 = vmul.f32 0.5, %v181_v8  ;;  %v191_v24 = vmul.f32 %v178_v21, %v6228_v19 }
 0x115   :  { %v162_v9 = vmul.f32 0.5, %v161_v4  ;;  %v194_v10 = vmul.f32 %v193_v2, %v189_v5 }
 0x116   :  { %v183_v20 = vsub.f32 1.5, %v182_v15  ;;  %v196_v26 = vmul.f32 %v193_v2, %v191_v24 }
 0x117   :  { %v163_v11 = vsub.f32 1.5, %v162_v9  ;;  %v199_v12 = vadd.f32 %v198_v6, %v194_v10 }
 0x118   :  { %v184_v25 = vmul.f32 %v5850_v60, %v183_v20  ;;  %v201_v28 = vadd.f32 %v198_v6, %v196_v26 }
 0x119   :  { %v164_v16 = vmul.f32 %v5852_v61, %v163_v11  ;;  %5560 = vmatmul.msk.f32.vlgmr.msra.gmra.mxu0 %vm97_vm0, %v199_v12 }
 0x11a   :  { %v188_v27 = vsel %vm187_vm13, %v5850_v60, %v184_v25 }
 0x11b   :  { %v168_v17 = vsel %vm167_vm10, %v5852_v61, %v164_v16  ;;  %v192_v31 = vmul.f32 %v188_v27, %v6240_v29 }
 0x11c   :  { %v190_v18 = vmul.f32 %v168_v17, %v6242_v30 }
 0x11d   :  { %v197_v30 = vmul.f32 %v193_v2, %v192_v31 }
 0x11e   :  { %v195_v22 = vmul.f32 %v193_v2, %v190_v18 }
 0x11f   :  { %v202_v32 = vadd.f32 %v198_v6, %v197_v30 }
 0x120   :  { %v200_v23 = vadd.f32 %v198_v6, %v195_v22 }
 0x122   :  { %5561 = vmatmul.msk.f32.gmra.mxu0 %vm97_vm0, %v200_v23 }
 0x12a   :  { %5562 = vmatmul.msk.f32.gmra.mxu0 %vm97_vm0, %v201_v28 }
 0x132   :  { %5563 = vmatmul.msk.f32.gmra.mxu0 %vm97_vm0, %v202_v32 }
 0x196   :  { %v233_v34 = vpop.f32.mrf.mxu0 }
 0x197   :  { %v6262_v35 = vadd.f32 %v233_v34, %v203_v33 }
 0x199   :  { %251 = vrot.lane.b32.xlu2 %v6262_v35, %s6175_s0 }
 0x19f   :  { %v236_v19 = vpop.f32.mrf.mxu0 }
 0x1a0   :  { %v6266_v36 = vadd.f32 %v236_v19, %v203_v33 }
 0x1a2   :  { %279 = vrot.lane.b32.xlu0 %v6266_v36, %s6175_s0 }
 0x1a7   :  { %v239_v29 = vpop.f32.mrf.mxu0 }
 0x1a8   :  { %v6270_v37 = vadd.f32 %v239_v29, %v203_v33 }
 0x1aa   :  { %306 = vrot.lane.b32.xlu1 %v6270_v37, %s6175_s0  ;;  %55 = vperm.xlu0 %5807, %v51_v40  }
 0x1af   :  { %v242_v38 = vpop.f32.mrf.mxu0 }
 0x1b0   :  { %v6274_v39 = vadd.f32 %v242_v38, %v203_v33  ;;  %v5813_v33 = vpack.i.bf16 %v6270_v37, %v6262_v35 }
 0x1b2   :  { %333 = vrot.lane.b32.xlu2 %v6274_v39, %s6175_s0  ;;  %463 = vrot.lane.b32.xlu1 %v6262_v35, %s6176_s2  ;;  %v5808_v10 = vpack.i.bf16 %v6270_v37, %v6274_v39 }
 0x1f3   :  { %v252_v42 = vpop.permute.xlu2 %251 }
 0x1f4   :  { %5564 = vmatpush.xpose.msk.msra.mxu1 %vm253_vm14, %v252_v42 }
 0x1f7   :  { %5565 = vmatmul.msk.f32.vlgmr.msra.gmra.mxu1 %vm253_vm14, %v6262_v35 }
 0x20c   :  { %v334_v44 = vpop.permute.xlu2 %333 }
 0x214   :  { %v280_v43 = vpop.permute.xlu0 %279 }
 0x215   :  { %5566 = vmatpush.xpose.msk.msrb.mxu1 %vm253_vm14, %v280_v43 }
 0x218   :  { %5567 = vmatmul.msk.f32.vlgmr.msrb.gmra.mxu1 %vm253_vm14, %v6266_v36 }
 0x219   :  { %5570 = vmatpush.xpose.msk.msra.mxu1 %vm253_vm14, %v334_v44 }
 0x21c   :  { %v307_v45 = vpop.permute.xlu1 %306  ;;  %v56_v49 = vpop.permute.xlu0 %55 }
 0x21d   :  { %5568 = vmatpush.xpose.msk.msra.mxu3 %vm253_vm14, %v307_v45  ;;  %vm57_vm15 = vcmp.ge.s32.totalorder %v53_v48, %v56_v49 }
 0x21e   :  { %v6297_v50 = vsel %vm57_vm15, 1, %v6177_v41 }
 0x21f   :  { %v68_v51 = vperm.slane %v6297_v50, 0  ;;  %v61_v57 = vrot.slane %v6297_v50, 3  ;;  %v60_v60 = vrot.slane %v6297_v50, 2  ;;  %v59_v34 = vrot.slane %v6297_v50, 1 }
 0x220   :  { %5569 = vmatmul.msk.f32.vlgmr.msra.gmra.mxu3 %vm253_vm14, %v6270_v37  ;;  %5571 = vmatmul.msk.f32.vlgmr.msra.gmra.mxu1 %vm253_vm14, %v6274_v39 }
 0x221   :  { %vm6300_vm1 = vcmp.eq.s32.totalorder %v68_v51, 1  ;;  %vm64_vm2 = vcmp.ne.s32.totalorder %v61_v57, 0  ;;  %vm63_vm3 = vcmp.ne.s32.totalorder %v60_v60, 0  ;;  %vm62_vm6 = vcmp.ne.s32.totalorder %v59_v34, 0 }
 0x222   :  { %v67_v59 = vsel %vm64_vm2, 1, %v6177_v41  ;;  %v66_v0 = vsel %vm63_vm3, 1, %v6177_v41  ;;  %v65_v29 = vsel %vm62_vm6, 1, %v6177_v41 }
 0x223   :  { %v71_v61 = vperm.slane %v67_v59, 0  ;;  %v70_v3 = vperm.slane %v66_v0, 0  ;;  %v69_v38 = vperm.slane %v65_v29, 0 }
 0x224   :  { %v464_v46 = vpop.permute.xlu1 %463 }
 0x225   :  { %484 = vmatpush.msra.mxu2 %v464_v46  ;;  %vm6316_vm4 = vcmp.eq.s32.totalorder %v71_v61, 1  ;;  %vm6324_vm5 = vcmp.eq.s32.totalorder %v70_v3, 1  ;;  %vm6364_vm7 = vcmp.eq.s32.totalorder %v69_v38, 1 }
 0x274   :  { %v275_v53 = vpop.f32.mrf.mxu1 }
 0x275   :  { %v359_v54 = vmul.f32 0.35355338, %v275_v53 }
 0x277   :  { %v363_v55 = vsel %vm6300_vm1, -1e+30, %v359_v54 }
 0x278   :  { %v367_v56 = vsel %vm253_vm14, %v363_v55, -inf }
 0x279   :  { %368 = vmax.xlane.f32.xlu2 %v367_v56 }
 0x291   :  { %642 = vrot.lane.b32.xlu2 %v6266_v36, %s6178_s1 }
 0x295   :  { %v6310_v58 = vpop.f32.mrf.mxu1 }
 0x296   :  { %v360_v40 = vmul.f32 0.35355338, %v6310_v58 }
 0x298   :  { %v6370_v44 = vsel %vm6364_vm7, -1e+30, %v360_v40 }
 0x299   :  { %698 = vrot.lane.b32.xlu2 %v6274_v39, %s6178_s1  ;;  %v370_v45 = vsel %vm253_vm14, %v6370_v44, -inf }
 0x29d   :  { %v356_v63 = vpop.f32.mrf.mxu1 }
 0x29e   :  { %v362_v1 = vmul.f32 0.35355338, %v356_v63 }
 0x2a0   :  { %v366_v2 = vsel %vm6316_vm4, -1e+30, %v362_v1 }
 0x2a1   :  { %v376_v4 = vsel %vm253_vm14, %v366_v2, -inf }
 0x2a2   :  { %377 = vmax.xlane.f32.xlu1 %v376_v4 }
 0x2a3   :  { %v329_v5 = vpop.f32.mrf.mxu3 }
 0x2a4   :  { %v361_v6 = vmul.f32 0.35355338, %v329_v5 }
 0x2a6   :  { %v365_v8 = vsel %vm6324_vm5, -1e+30, %v361_v6 }
 0x2a7   :  { %v373_v9 = vsel %vm253_vm14, %v365_v8, -inf }
 0x2a8   :  { %374 = vmax.xlane.f32.xlu0 %v373_v9 }
 0x2bb   :  { %614 = vrot.lane.b32.xlu1 %v6262_v35, %s6178_s1 }
 0x2bc   :  { %5809 = vrot.lane.b32.xlu0 %v5808_v10, %s6176_s2 }
 0x2c4   :  { %640 = vrot.lane.b32.xlu0 %v6266_v36, %s6179_s26 }
 0x2cc   :  { %612 = vrot.lane.b32.xlu0 %v6262_v35, %s6179_s26 }
 0x2d4   :  { %668 = vrot.lane.b32.xlu0 %v6270_v37, %s6179_s26 }
 0x2dc   :  { %906 = vrot.lane.b32.xlu0 %v6274_v39, %s6180_s27 }
 0x2ec   :  { %v369_v11 = vpop.xlane.xlu2 %368 }
 0x2ed   :  { %v379_v12 = vsub.f32 %v363_v55, %v369_v11 }
 0x2ef   :  { %v383_v13 = vmul.f32 1.442695, %v379_v12 }
 0x2f1   :  { %5853 = vpow2.f32 %v383_v13 }
 0x2f4   :  { %v643_v19 = vpop.permute.xlu2 %642 }
 0x2f7   :  { %v5854_v15 = vpop.eup %5853 }
 0x2f8   :  { %v391_v16 = vsel %vm253_vm14, %v5854_v15, 0.0 }
 0x2f9   :  { %392 = vadd.xlane.f32.xlu2 %v391_v16 }
 0x2fc   :  { %v699_v43 = vpop.permute.xlu2 %698 }
 0x315   :  { %v378_v17 = vpop.xlane.xlu1 %377 }
 0x316   :  { %v382_v18 = vsub.f32 %v366_v2, %v378_v17 }
 0x318   :  { %v389_v20 = vmul.f32 1.442695, %v382_v18 }
 0x31a   :  { %5855 = vpow2.f32 %v389_v20 }
 0x31b   :  { %v375_v21 = vpop.xlane.xlu0 %374 }
 0x31c   :  { %v381_v22 = vsub.f32 %v365_v8, %v375_v21 }
 0x31e   :  { %v387_v23 = vmul.f32 1.442695, %v381_v22 }
 0x320   :  { %v6345_v24 = vpop.eup %5855  ;;  %5857 = vpow2.f32 %v387_v23 }
 0x321   :  { %v400_v25 = vsel %vm253_vm14, %v6345_v24, 0.0 }
 0x322   :  { %401 = vadd.xlane.f32.xlu1 %v400_v25 }
 0x326   :  { %v6349_v26 = vpop.eup %5857 }
 0x327   :  { %v397_v27 = vsel %vm253_vm14, %v6349_v26, 0.0 }
 0x328   :  { %398 = vadd.xlane.f32.xlu2 %v397_v27 }
 0x32d   :  { %v615_v32 = vpop.permute.xlu1 %614 }
 0x32e   :  { %v5810_v28 = vpop.permute.xlu0 %5809 }
 0x32f   :  { %v5812_v31 = vunpack.i.h.bf16 %v5810_v28  ;;  %v5811_v30 = vunpack.i.l.bf16 %v5810_v28 }
 0x331   :  { %536 = vmatpush.msrb.mxu1 %v5812_v31  ;;  %562 = vmatpush.msrb.mxu2 %v5811_v30 }
 0x333   :  { %5580 = vmatpush.xpose.msk.msra.mxu1 %vm253_vm14, %v615_v32 }
 0x336   :  { %v641_v59 = vpop.permute.xlu0 %640 }
 0x33b   :  { %696 = vrot.lane.b32.xlu1 %v6274_v39, %s6179_s26 }
 0x33e   :  { %v613_v8 = vpop.permute.xlu0 %612 }
 0x340   :  { %670 = vrot.lane.b32.xlu2 %v6270_v37, %s6178_s1 }
 0x343   :  { %5814 = vrot.lane.b32.xlu1 %v5813_v33, %s6180_s27 }
 0x346   :  { %v669_v27 = vpop.permute.xlu0 %668 }
 0x34e   :  { %v907_v32 = vpop.permute.xlu0 %906 }
 0x369   :  { %371 = vmax.xlane.f32.xlu2 %v370_v45 }
 0x36c   :  { %v393_v46 = vpop.xlane.xlu2 %392 }
 0x36d   :  { %5859 = vrcp.f32 %v393_v46  ;;  %v414_v49 = vand.u32 2147483648, %v393_v46  ;;  %v412_v51 = vand.u32 2147483647, %v393_v46  ;;  %vm408_vm9 = vweird.f32 %v393_v46 }
 0x36f   :  { %v415_v54 = vor.u32 1.1754944e-38, %v414_v49  ;;  %vm413_vm11 = vcmp.eq.f32.partialorder %v412_v51, 8.507059e+37 }
 0x373   :  { %v5860_v47 = vpop.eup %5859 }
 0x374   :  { %v404_v41 = vmul.f32 %v5860_v47, %v393_v46  ;;  %vm409_vm8 = vweird.f32 %v5860_v47 }
 0x375   :  { %vm410_vm10 = vmor %vm408_vm9, %vm409_vm8 }
 0x376   :  { %v405_v48 = vsub.f32 1.0, %v404_v41 }
 0x378   :  { %v406_v50 = vmul.f32 %v5860_v47, %v405_v48 }
 0x37a   :  { %v407_v53 = vadd.f32 %v5860_v47, %v406_v50 }
 0x37c   :  { %v411_v55 = vsel %vm410_vm10, %v5860_v47, %v407_v53 }
 0x37d   :  { %v416_v56 = vsel %vm413_vm11, %v415_v54, %v411_v55 }
 0x37e   :  { %v459_v57 = vmul.f32 %v5854_v15, %v416_v56 }
 0x380   :  { %5572 = vmatmul.msk.f32.vlgmr.msra.gmra.mxu2 %vm253_vm14, %v459_v57 }
 0x381   :  { %5582 = vmatpush.xpose.msk.msra.mxu2 %vm253_vm14, %v643_v19 }
 0x395   :  { %v402_v58 = vpop.xlane.xlu1 %401 }
 0x396   :  { %5861 = vrcp.f32 %v402_v58  ;;  %v456_v1 = vand.u32 2147483648, %v402_v58  ;;  %v454_v3 = vand.u32 2147483647, %v402_v58  ;;  %vm450_vm13 = vweird.f32 %v402_v58 }
 0x398   :  { %v457_v9 = vor.u32 1.1754944e-38, %v456_v1  ;;  %vm455_vm2 = vcmp.eq.f32.partialorder %v454_v3, 8.507059e+37 }
 0x39b   :  { %v399_v60 = vpop.xlane.xlu2 %398 }
 0x39c   :  { %v5862_v61 = vpop.eup %5861  ;;  %5863 = vrcp.f32 %v399_v60  ;;  %v442_v12 = vand.u32 2147483648, %v399_v60  ;;  %v440_v16 = vand.u32 2147483647, %v399_v60  ;;  %vm436_vm6 = vweird.f32 %v399_v60 }
 0x39d   :  { %v446_v63 = vmul.f32 %v5862_v61, %v402_v58  ;;  %vm451_vm12 = vweird.f32 %v5862_v61 }
 0x39e   :  { %vm452_vm15 = vmor %vm450_vm13, %vm451_vm12  ;;  %v443_v20 = vor.u32 1.1754944e-38, %v442_v12  ;;  %vm441_vm9 = vcmp.eq.f32.partialorder %v440_v16, 8.507059e+37 }
 0x39f   :  { %v447_v0 = vsub.f32 1.0, %v446_v63 }
 0x3a1   :  { %v448_v2 = vmul.f32 %v5862_v61, %v447_v0 }
 0x3a2   :  { %v5864_v4 = vpop.eup %5863 }
 0x3a3   :  { %v432_v5 = vmul.f32 %v5864_v4, %v399_v60  ;;  %v449_v6 = vadd.f32 %v5862_v61, %v448_v2  ;;  %vm437_vm3 = vweird.f32 %v5864_v4  ;;  %v671_v28 = vpop.permute.xlu2 %670 }
 0x3a4   :  { %vm438_vm8 = vmor %vm436_vm6, %vm437_vm3 }
 0x3a5   :  { %v433_v10 = vsub.f32 1.0, %v432_v5  ;;  %v453_v11 = vsel %vm452_vm15, %v5862_v61, %v449_v6 }
 0x3a6   :  { %v458_v13 = vsel %vm455_vm2, %v457_v9, %v453_v11 }
 0x3a7   :  { %v434_v15 = vmul.f32 %v5864_v4, %v433_v10  ;;  %v462_v17 = vmul.f32 %v6345_v24, %v458_v13 }
 0x3a9   :  { %v435_v18 = vadd.f32 %v5864_v4, %v434_v15  ;;  %5575 = vmatmul.msk.f32.vlgmr.msrb.gmra.mxu2 %vm253_vm14, %v462_v17 }
 0x3aa   :  { %5586 = vmatpush.xpose.msk.msrb.mxu2 %vm253_vm14, %v699_v43 }
 0x3ab   :  { %v439_v21 = vsel %vm438_vm8, %v5864_v4, %v435_v18 }
 0x3ac   :  { %v444_v22 = vsel %vm441_vm9, %v443_v20, %v439_v21 }
 0x3ad   :  { %v697_v23 = vpop.permute.xlu1 %696  ;;  %v461_v25 = vmul.f32 %v6349_v26, %v444_v22 }
 0x3af   :  { %5574 = vmatmul.msk.f32.vlgmr.msrb.gmra.mxu1 %vm253_vm14, %v461_v25 }
 0x3b0   :  { %5584 = vmatpush.xpose.msk.msrb.mxu1 %vm253_vm14, %v671_v28 }
 0x3b1   :  { %5583 = vmatmul.msk.f32.vlgmr.msra.gmra.mxu2 %vm253_vm14, %v641_v59 }
 0x3b5   :  { %v5815_v24 = vpop.permute.xlu1 %5814 }
 0x3b6   :  { %v5817_v31 = vunpack.i.h.bf16 %v5815_v24  ;;  %v5816_v30 = vunpack.i.l.bf16 %v5815_v24 }
 0x3b7   :  { %5581 = vmatmul.msk.f32.vlgmr.msra.gmra.mxu1 %vm253_vm14, %v613_v8 }
 0x3b8   :  { %849 = vmatpush.msrb.mxu0 %v5816_v30  ;;  %901 = vmatpush.msra.mxu2 %v5817_v31 }
 0x3b9   :  { %5587 = vmatmul.msk.f32.vlgmr.msrb.gmra.mxu2 %vm253_vm14, %v697_v23 }
 0x3ba   :  { %927 = vmatpush.msra.mxu0 %v907_v32 }
 0x3bf   :  { %5585 = vmatmul.msk.f32.vlgmr.msrb.gmra.mxu1 %vm253_vm14, %v669_v27 }
 0x3dc   :  { %v372_v53 = vpop.xlane.xlu2 %371 }
 0x3dd   :  { %v380_v8 = vsub.f32 %v6370_v44, %v372_v53 }
 0x3df   :  { %v385_v9 = vmul.f32 1.442695, %v380_v8 }
 0x403   :  { %v6386_v26 = vpop.f32.mrf.mxu2 }
 0x42c   :  { %v6388_v33 = vpop.f32.mrf.mxu1  ;;  %v6390_v34 = vpop.f32.mrf.mxu2 }
 0x434   :  { %v637_v19 = vpop.f32.mrf.mxu1  ;;  %v665_v29 = vpop.f32.mrf.mxu2 }
 0x435   :  { %v724_v38 = vmul.f32 0.35355338, %v637_v19  ;;  %v725_v10 = vmul.f32 0.35355338, %v665_v29 }
 0x437   :  { %v728_v40 = vsel %vm6300_vm1, -1e+30, %v724_v38  ;;  %v6431_v11 = vsel %vm6364_vm7, -1e+30, %v725_v10 }
 0x438   :  { %v732_v43 = vsel %vm253_vm14, %v728_v40, -inf  ;;  %v735_v13 = vsel %vm253_vm14, %v6431_v11, -inf }
 0x439   :  { %733 = vmax.xlane.f32.xlu1 %v732_v43 }
 0x43c   :  { %v693_v45 = vpop.f32.mrf.mxu1  ;;  %v721_v46 = vpop.f32.mrf.mxu2 }
 0x43d   :  { %v726_v47 = vmul.f32 0.35355338, %v693_v45  ;;  %v727_v41 = vmul.f32 0.35355338, %v721_v46 }
 0x43f   :  { %v731_v48 = vsel %vm6316_vm4, -1e+30, %v727_v41  ;;  %v730_v49 = vsel %vm6324_vm5, -1e+30, %v726_v47 }
 0x440   :  { %v741_v50 = vsel %vm253_vm14, %v731_v48, -inf  ;;  %v738_v51 = vsel %vm253_vm14, %v730_v49, -inf }
 0x441   :  { %742 = vmax.xlane.f32.xlu0 %v741_v50  ;;  %739 = vmax.xlane.f32.xlu2 %v738_v51 }
 0x452   :  { %1035 = vrot.lane.b32.xlu1 %v6270_v37, %s6181_s28 }
 0x455   :  { %977 = vrot.lane.b32.xlu0 %v6262_v35, %s6182_s29 }
 0x459   :  { %979 = vrot.lane.b32.xlu2 %v6262_v35, %s6181_s28 }
 0x4ac   :  { %v734_v54 = vpop.xlane.xlu1 %733 }
 0x4ad   :  { %v744_v55 = vsub.f32 %v728_v40, %v734_v54 }
 0x4af   :  { %v748_v56 = vmul.f32 1.442695, %v744_v55 }
 0x4b1   :  { %5865 = vpow2.f32 %v748_v56 }
 0x4b4   :  { %v743_v57 = vpop.xlane.xlu0 %742  ;;  %v740_v58 = vpop.xlane.xlu2 %739 }
 0x4b5   :  { %v747_v59 = vsub.f32 %v731_v48, %v743_v57  ;;  %v746_v60 = vsub.f32 %v730_v49, %v740_v58 }
 0x4b7   :  { %v6407_v61 = vpop.eup %5865  ;;  %v754_v63 = vmul.f32 1.442695, %v747_v59  ;;  %v752_v0 = vmul.f32 1.442695, %v746_v60 }
 0x4b8   :  { %v756_v1 = vsel %vm253_vm14, %v6407_v61, 0.0 }
 0x4b9   :  { %5867 = vpow2.f32 %v754_v63  ;;  %757 = vadd.xlane.f32.xlu1 %v756_v1 }
 0x4ba   :  { %5869 = vpow2.f32 %v752_v0 }
 0x4bb   :  { %5871 = vpow2.f32 %v385_v9 }
 0x4bc   :  { %v980_v2 = vpop.permute.xlu2 %979 }
 0x4bd   :  { %5596 = vmatpush.xpose.msk.msrb.mxu2 %vm253_vm14, %v980_v2 }
 0x4bf   :  { %v6412_v3 = vpop.eup %5867 }
 0x4c0   :  { %v6414_v4 = vpop.eup %5869  ;;  %v765_v5 = vsel %vm253_vm14, %v6412_v3, 0.0 }
 0x4c1   :  { %766 = vadd.xlane.f32.xlu0 %v765_v5  ;;  %v762_v6 = vsel %vm253_vm14, %v6414_v4, 0.0  ;;  %v6433_v12 = vpop.eup %5871 }
 0x4c2   :  { %763 = vadd.xlane.f32.xlu2 %v762_v6  ;;  %v394_v15 = vsel %vm253_vm14, %v6433_v12, 0.0  ;;  %v84_v6 = vld [vmem:[#allocation5 + $0x40] sm:$0xff] }
 0x4c4   :  { %v1036_v44 = vpop.permute.xlu1 %1035 }
 0x4c7   :  { %v6447_v16 = vpop.permute.xlu0 %977 }
 0x4d2   :  { %1033 = vrot.lane.b32.xlu1 %v6270_v37, %s6182_s29 }
 0x4d5   :  { %1063 = vrot.lane.b32.xlu0 %v6274_v39, %s6181_s28 }
 0x4da   :  { %1061 = vrot.lane.b32.xlu2 %v6274_v39, %s6182_s29 }
 0x4e2   :  { %489 = vrot.lane.b32.xlu2 %v6266_v36, %s6176_s2 }
 0x4fc   :  { %736 = vmax.xlane.f32.xlu1 %v735_v13 }
 0x4ff   :  { %395 = vadd.xlane.f32.xlu0 %v394_v15 }
 0x513   :  { %1245 = vrot.lane.b32.xlu0 %v6270_v37, %s6183_s30 }
 0x515   :  { %854 = vrot.lane.b32.xlu1 %v6266_v36, %s6180_s27 }
 0x51d   :  { %1007 = vrot.lane.b32.xlu1 %v6266_v36, %s6181_s28 }
 0x525   :  { %1193 = vrot.lane.b32.xlu1 %v6262_v35, %s6183_s30 }
 0x52c   :  { %v758_v17 = vpop.xlane.xlu1 %757 }
 0x52d   :  { %5873 = vrcp.f32 %v758_v17  ;;  %1344 = vrot.lane.b32.xlu1 %v6262_v35, %s6184_s4  ;;  %v779_v25 = vand.u32 2147483648, %v758_v17  ;;  %v777_v28 = vand.u32 2147483647, %v758_v17  ;;  %vm773_vm11 = vweird.f32 %v758_v17 }
 0x52f   :  { %v780_v30 = vor.u32 1.1754944e-38, %v779_v25  ;;  %vm778_vm13 = vcmp.eq.f32.partialorder %v777_v28, 8.507059e+37 }
 0x533   :  { %v5874_v18 = vpop.eup %5873 }
 0x534   :  { %v769_v20 = vmul.f32 %v5874_v18, %v758_v17  ;;  %v767_v21 = vpop.xlane.xlu0 %766  ;;  %vm774_vm10 = vweird.f32 %v5874_v18 }
 0x535   :  { %5875 = vrcp.f32 %v767_v21  ;;  %v764_v22 = vpop.xlane.xlu2 %763  ;;  %1342 = vrot.lane.b32.xlu1 %v6262_v35, %s6185_s5  ;;  %vm775_vm12 = vmor %vm773_vm11, %vm774_vm10  ;;  %v821_v47 = vand.u32 2147483648, %v767_v21  ;;  %v819_v49 = vand.u32 2147483647, %v767_v21  ;;  %vm815_vm3 = vweird.f32 %v767_v21 }
 0x536   :  { %v770_v23 = vsub.f32 1.0, %v769_v20  ;;  %5877 = vrcp.f32 %v764_v22  ;;  %v807_v50 = vand.u32 2147483648, %v764_v22  ;;  %v805_v53 = vand.u32 2147483647, %v764_v22 }
 0x537   :  { %v822_v55 = vor.u32 1.1754944e-38, %v821_v47  ;;  %vm801_vm8 = vweird.f32 %v764_v22  ;;  %vm820_vm9 = vcmp.eq.f32.partialorder %v819_v49, 8.507059e+37 }
 0x538   :  { %v771_v27 = vmul.f32 %v5874_v18, %v770_v23  ;;  %v808_v58 = vor.u32 1.1754944e-38, %v807_v50  ;;  %vm806_vm11 = vcmp.eq.f32.partialorder %v805_v53, 8.507059e+37 }
 0x53a   :  { %v772_v24 = vadd.f32 %v5874_v18, %v771_v27  ;;  %v85_v27 = vld [vmem:[#allocation5 + $0x48] sm:$0xff] }
 0x53b   :  { %v5876_v31 = vpop.eup %5875 }
 0x53c   :  { %v5878_v32 = vpop.eup %5877  ;;  %v811_v19 = vmul.f32 %v5876_v31, %v767_v21  ;;  %v776_v29 = vsel %vm775_vm12, %v5874_v18, %v772_v24  ;;  %vm816_vm15 = vweird.f32 %v5876_v31 }
 0x53d   :  { %v797_v38 = vmul.f32 %v5878_v32, %v764_v22  ;;  %v1062_v40 = vpop.permute.xlu2 %1061  ;;  %1370 = vrot.lane.b32.xlu1 %v6266_v36, %s6185_s5  ;;  %v781_v43 = vsel %vm778_vm13, %v780_v30, %v776_v29  ;;  %vm802_vm2 = vweird.f32 %v5878_v32  ;;  %vm817_vm6 = vmor %vm815_vm3, %vm816_vm15 }
 0x53e   :  { %v812_v45 = vsub.f32 1.0, %v811_v19  ;;  %v824_v46 = vmul.f32 %v6407_v61, %v781_v43  ;;  %vm803_vm10 = vmor %vm801_vm8, %vm802_vm2 }
 0x53f   :  { %v798_v41 = vsub.f32 1.0, %v797_v38 }
 0x540   :  { %v813_v48 = vmul.f32 %v5876_v31, %v812_v45  ;;  %5588 = vmatmul.msk.f32.vlgmr.msrb.gmra.mxu0 %vm253_vm14, %v824_v46 }
 0x541   :  { %v799_v51 = vmul.f32 %v5878_v32, %v798_v41  ;;  %5600 = vmatpush.xpose.msk.msrb.mxu0 %vm253_vm14, %v1036_v44 }
 0x542   :  { %v814_v54 = vadd.f32 %v5876_v31, %v813_v48 }
 0x543   :  { %v800_v56 = vadd.f32 %v5878_v32, %v799_v51 }
 0x544   :  { %v818_v57 = vsel %vm817_vm6, %v5876_v31, %v814_v54  ;;  %v1034_v5 = vpop.permute.xlu1 %1033 }
 0x545   :  { %v804_v59 = vsel %vm803_vm10, %v5878_v32, %v800_v56  ;;  %v490_v60 = vpop.permute.xlu2 %489  ;;  %1398 = vrot.lane.b32.xlu1 %v6270_v37, %s6185_s5  ;;  %v823_v61 = vsel %vm820_vm9, %v822_v55, %v818_v57 }
 0x546   :  { %510 = vmatpush.msrb.mxu3 %v490_v60  ;;  %v809_v63 = vsel %vm806_vm11, %v808_v58, %v804_v59  ;;  %v827_v0 = vmul.f32 %v6412_v3, %v823_v61 }
 0x547   :  { %v1064_v1 = vpop.permute.xlu0 %1063  ;;  %v826_v2 = vmul.f32 %v6414_v4, %v809_v63 }
 0x548   :  { %5591 = vmatmul.msk.f32.vlgmr.msra.gmra.mxu0 %vm253_vm14, %v827_v0  ;;  %594 = vmatpush.msra.mxu3 %v84_v6 }
 0x549   :  { %5590 = vmatmul.msk.f32.vlgmr.msra.gmra.mxu2 %vm253_vm14, %v826_v2 }
 0x54a   :  { %5602 = vmatpush.xpose.msk.msra.mxu2 %vm253_vm14, %v1064_v1 }
 0x550   :  { %5601 = vmatmul.msk.f32.vlgmr.msrb.gmra.mxu0 %vm253_vm14, %v1034_v5 }
 0x551   :  { %5597 = vmatmul.msk.f32.vlgmr.msrb.gmra.mxu2 %vm253_vm14, %v6447_v16 }
 0x559   :  { %5603 = vmatmul.msk.f32.vlgmr.msra.gmra.mxu2 %vm253_vm14, %v1062_v40 }
 0x56f   :  { %v737_v3 = vpop.xlane.xlu1 %736 }
 0x570   :  { %v745_v8 = vsub.f32 %v6431_v11, %v737_v3 }
 0x572   :  { %v750_v4 = vmul.f32 1.442695, %v745_v8  ;;  %v396_v9 = vpop.xlane.xlu0 %395 }
 0x573   :  { %5879 = vrcp.f32 %v396_v9  ;;  %v428_v16 = vand.u32 2147483648, %v396_v9  ;;  %v426_v20 = vand.u32 2147483647, %v396_v9  ;;  %vm422_vm13 = vweird.f32 %v396_v9 }
 0x574   :  { %5881 = vpow2.f32 %v750_v4 }
 0x575   :  { %v429_v11 = vor.u32 1.1754944e-38, %v428_v16  ;;  %vm427_vm2 = vcmp.eq.f32.partialorder %v426_v20, 8.507059e+37 }
 0x579   :  { %v5880_v10 = vpop.eup %5879 }
 0x57a   :  { %v6470_v13 = vpop.eup %5881  ;;  %v418_v15 = vmul.f32 %v5880_v10, %v396_v9  ;;  %vm423_vm12 = vweird.f32 %v5880_v10 }
 0x57b   :  { %v759_v44 = vsel %vm253_vm14, %v6470_v13, 0.0  ;;  %vm424_vm15 = vmor %vm422_vm13, %vm423_vm12 }
 0x57c   :  { %v419_v17 = vsub.f32 1.0, %v418_v15  ;;  %760 = vadd.xlane.f32.xlu2 %v759_v44 }
 0x57e   :  { %v420_v18 = vmul.f32 %v5880_v10, %v419_v17 }
 0x580   :  { %v421_v21 = vadd.f32 %v5880_v10, %v420_v18 }
 0x582   :  { %v425_v22 = vsel %vm424_vm15, %v5880_v10, %v421_v21 }
 0x583   :  { %v430_v23 = vsel %vm427_vm2, %v429_v11, %v425_v22 }
 0x584   :  { %v460_v25 = vmul.f32 %v6433_v12, %v430_v23 }
 0x585   :  { %v1246_v28 = vpop.permute.xlu0 %1245 }
 0x586   :  { %5573 = vmatmul.msk.f32.vlgmr.msrb.gmra.mxu3 %vm253_vm14, %v460_v25  ;;  %1266 = vmatpush.msrb.mxu2 %v1246_v28 }
 0x587   :  { %v855_v24 = vpop.permute.xlu1 %854  ;;  %5788 = vmatpush.msrb.mxu3 %v85_v27 }
 0x588   :  { %875 = vmatpush.msra.mxu1 %v855_v24 }
 0x58a   :  { %959 = vmatpush.msrb.mxu1 %v85_v27 }
 0x58e   :  { %5576 = vmatmul.msk.f32.vlgmr.msra.gmra.mxu3 %vm253_vm14, %v6386_v26 }
 0x58f   :  { %v1008_v31 = vpop.permute.xlu1 %1007 }
 0x590   :  { %5598 = vmatpush.xpose.msk.msra.mxu3 %vm253_vm14, %v1008_v31 }
 0x594   :  { %1005 = vrot.lane.b32.xlu2 %v6266_v36, %s6182_s29 }
 0x597   :  { %v6481_v30 = vpop.permute.xlu1 %1193 }
 0x59f   :  { %v1345_v12 = vpop.permute.xlu1 %1344 }
 0x5a0   :  { %5612 = vmatpush.xpose.msk.msra.mxu2 %vm253_vm14, %v1345_v12 }
 0x5a7   :  { %v6531_v22 = vpop.permute.xlu1 %1342 }
 0x5af   :  { %v6533_v27 = vpop.permute.xlu1 %1370 }
 0x5bd   :  { %v851_v32 = vpop.f32.mrf.mxu0 }
 0x5c5   :  { %v6484_v19 = vpop.f32.mrf.mxu0 }
 0x5cc   :  { %v6486_v29 = vpop.f32.mrf.mxu2 }
 0x5cd   :  { %v1058_v43 = vpop.f32.mrf.mxu0 }
 0x5ce   :  { %v1091_v46 = vmul.f32 0.35355338, %v1058_v43 }
 0x5d0   :  { %v1095_v48 = vsel %vm6324_vm5, -1e+30, %v1091_v46 }
 0x5d1   :  { %v1103_v50 = vsel %vm253_vm14, %v1095_v48, -inf }
 0x5d4   :  { %v1002_v38 = vpop.f32.mrf.mxu2 }
 0x5d5   :  { %v1089_v40 = vmul.f32 0.35355338, %v1002_v38 }
 0x5d7   :  { %v1093_v26 = vsel %vm6300_vm1, -1e+30, %v1089_v40 }
 0x5d8   :  { %v1097_v45 = vsel %vm253_vm14, %v1093_v26, -inf }
 0x5d9   :  { %1098 = vmax.xlane.f32.xlu0 %v1097_v45 }
 0x5dc   :  { %v1086_v47 = vpop.f32.mrf.mxu2 }
 0x5dd   :  { %v1092_v41 = vmul.f32 0.35355338, %v1086_v47 }
 0x5df   :  { %v1096_v49 = vsel %vm6316_vm4, -1e+30, %v1092_v41 }
 0x5e0   :  { %v1106_v51 = vsel %vm253_vm14, %v1096_v49, -inf }
 0x5e1   :  { %1104 = vmax.xlane.f32.xlu0 %v1103_v50  ;;  %1107 = vmax.xlane.f32.xlu2 %v1106_v51 }
 0x5ef   :  { %v761_v53 = vpop.xlane.xlu2 %760 }
 0x5f0   :  { %5883 = vrcp.f32 %v761_v53  ;;  %v793_v57 = vand.u32 2147483648, %v761_v53  ;;  %v791_v59 = vand.u32 2147483647, %v761_v53  ;;  %vm787_vm6 = vweird.f32 %v761_v53 }
 0x5f2   :  { %v794_v61 = vor.u32 1.1754944e-38, %v793_v57  ;;  %vm792_vm9 = vcmp.eq.f32.partialorder %v791_v59, 8.507059e+37 }
 0x5f5   :  { %1372 = vrot.lane.b32.xlu0 %v6266_v36, %s6184_s4 }
 0x5f6   :  { %v5884_v54 = vpop.eup %5883 }
 0x5f7   :  { %v783_v55 = vmul.f32 %v5884_v54, %v761_v53  ;;  %vm788_vm3 = vweird.f32 %v5884_v54  ;;  %v1006_v5 = vpop.permute.xlu2 %1005 }
 0x5f8   :  { %vm789_vm8 = vmor %vm787_vm6, %vm788_vm3 }
 0x5f9   :  { %v784_v56 = vsub.f32 1.0, %v783_v55  ;;  %1271 = vrot.lane.b32.xlu2 %v6274_v39, %s6183_s30 }
 0x5fb   :  { %v785_v58 = vmul.f32 %v5884_v54, %v784_v56 }
 0x5fd   :  { %v786_v60 = vadd.f32 %v5884_v54, %v785_v58 }
 0x5ff   :  { %v790_v63 = vsel %vm789_vm8, %v5884_v54, %v786_v60 }
 0x600   :  { %v795_v0 = vsel %vm792_vm9, %v794_v61, %v790_v63 }
 0x601   :  { %v825_v1 = vmul.f32 %v6470_v13, %v795_v0 }
 0x603   :  { %5589 = vmatmul.msk.f32.vlgmr.msra.gmra.mxu1 %vm253_vm14, %v825_v1 }
 0x609   :  { %v512_v2 = vpop.f32.mrf.mxu3 }
 0x60a   :  { %5577 = vmatmul.msk.f32.gmra.mxu3 %vm253_vm14, %v512_v2 }
 0x60b   :  { %5592 = vmatmul.msk.f32.vlgmr.msrb.gmra.mxu1 %vm253_vm14, %v851_v32  ;;  %v1399_v32 = vpop.permute.xlu1 %1398 }
 0x611   :  { %v6537_v51 = vpop.f32.mrf.mxu3 }
 0x612   :  { %5578 = vmatmul.msk.f32.gmra.mxu3 %vm253_vm14, %v6388_v33 }
 0x61a   :  { %5579 = vmatmul.msk.f32.gmra.mxu3 %vm253_vm14, %v6390_v34 }
 0x64c   :  { %v1099_v6 = vpop.xlane.xlu0 %1098 }
 0x64d   :  { %v1109_v3 = vsub.f32 %v1093_v26, %v1099_v6 }
 0x64f   :  { %v1113_v8 = vmul.f32 1.442695, %v1109_v3 }
 0x651   :  { %5885 = vpow2.f32 %v1113_v8 }
 0x654   :  { %v1105_v4 = vpop.xlane.xlu0 %1104  ;;  %v1108_v9 = vpop.xlane.xlu2 %1107 }
 0x655   :  { %v1111_v10 = vsub.f32 %v1095_v48, %v1105_v4  ;;  %v1112_v44 = vsub.f32 %v1096_v49, %v1108_v9 }
 0x657   :  { %v5886_v13 = vpop.eup %5885  ;;  %v1117_v15 = vmul.f32 1.442695, %v1111_v10  ;;  %v1119_v16 = vmul.f32 1.442695, %v1112_v44 }
 0x658   :  { %v1121_v17 = vsel %vm253_vm14, %v5886_v13, 0.0 }
 0x659   :  { %5887 = vpow2.f32 %v1117_v15  ;;  %1122 = vadd.xlane.f32.xlu2 %v1121_v17 }
 0x65a   :  { %5889 = vpow2.f32 %v1119_v16 }
 0x65c   :  { %v1272_v11 = vpop.permute.xlu2 %1271 }
 0x65f   :  { %v6510_v33 = vpop.eup %5887 }
 0x660   :  { %v1127_v34 = vsel %vm253_vm14, %v6510_v33, 0.0  ;;  %v6514_v18 = vpop.eup %5889 }
 0x661   :  { %1128 = vadd.xlane.f32.xlu0 %v1127_v34  ;;  %v1130_v20 = vsel %vm253_vm14, %v6514_v18, 0.0 }
 0x667   :  { %v1373_v23 = vpop.permute.xlu0 %1372 }
 0x669   :  { %1131 = vadd.xlane.f32.xlu0 %v1130_v20 }
 0x671   :  { %1400 = vrot.lane.b32.xlu2 %v6270_v37, %s6184_s4 }
 0x679   :  { %1426 = vrot.lane.b32.xlu2 %v6274_v39, %s6185_s5 }
 0x67d   :  { %1428 = vrot.lane.b32.xlu0 %v6274_v39, %s6184_s4 }
 0x680   :  { %v877_v21 = vpop.f32.mrf.mxu1 }
 0x681   :  { %5593 = vmatmul.msk.f32.vlgmr.msrb.gmra.mxu3 %vm253_vm14, %v877_v21 }
 0x682   :  { %1214 = vmatpush.msrb.mxu3 %v6481_v30 }
 0x689   :  { %5594 = vmatmul.msk.f32.gmra.mxu3 %vm253_vm14, %v6486_v29 }
 0x68d   :  { %v6542_v1 = vpop.f32.mrf.mxu3 }
 0x691   :  { %5595 = vmatmul.msk.f32.gmra.mxu3 %vm253_vm14, %v6484_v19 }
 0x699   :  { %5599 = vmatmul.msk.f32.vlgmr.msra.gmra.mxu3 %vm253_vm14, %v1006_v5 }
 0x69a   :  { %1292 = vmatpush.msra.mxu3 %v1272_v11 }
 0x6cc   :  { %v1123_v25 = vpop.xlane.xlu2 %1122 }
 0x6cd   :  { %5891 = vrcp.f32 %v1123_v25  ;;  %v1144_v29 = vand.u32 2147483648, %v1123_v25  ;;  %v1142_v38 = vand.u32 2147483647, %v1123_v25  ;;  %vm1138_vm11 = vweird.f32 %v1123_v25 }
 0x6cf   :  { %v1145_v45 = vor.u32 1.1754944e-38, %v1144_v29  ;;  %vm1143_vm13 = vcmp.eq.f32.partialorder %v1142_v38, 8.507059e+37 }
 0x6d3   :  { %v5892_v28 = vpop.eup %5891 }
 0x6d4   :  { %v1134_v24 = vmul.f32 %v5892_v28, %v1123_v25  ;;  %v1129_v31 = vpop.xlane.xlu0 %1128  ;;  %v1401_v30 = vpop.permute.xlu2 %1400  ;;  %vm1139_vm10 = vweird.f32 %v5892_v28 }
 0x6d5   :  { %5893 = vrcp.f32 %v1129_v31  ;;  %5616 = vmatpush.xpose.msk.msra.mxu1 %vm253_vm14, %v1401_v30  ;;  %vm1140_vm12 = vmor %vm1138_vm11, %vm1139_vm10  ;;  %v1172_v49 = vand.u32 2147483648, %v1129_v31  ;;  %v1170_v54 = vand.u32 2147483647, %v1129_v31  ;;  %vm1166_vm2 = vweird.f32 %v1129_v31 }
 0x6d6   :  { %v1135_v12 = vsub.f32 1.0, %v1134_v24 }
 0x6d7   :  { %v1173_v57 = vor.u32 1.1754944e-38, %v1172_v49  ;;  %vm1171_vm6 = vcmp.eq.f32.partialorder %v1170_v54, 8.507059e+37 }
 0x6d8   :  { %v1136_v19 = vmul.f32 %v5892_v28, %v1135_v12  ;;  %5617 = vmatmul.msk.f32.vlgmr.msra.gmra.mxu1 %vm253_vm14, %v1399_v32 }
 0x6da   :  { %v1137_v40 = vadd.f32 %v5892_v28, %v1136_v19 }
 0x6db   :  { %v5894_v43 = vpop.eup %5893 }
 0x6dc   :  { %v1141_v26 = vsel %vm1140_vm12, %v5892_v28, %v1137_v40  ;;  %v1162_v46 = vmul.f32 %v5894_v43, %v1129_v31  ;;  %v1132_v47 = vpop.xlane.xlu0 %1131  ;;  %vm1167_vm15 = vweird.f32 %v5894_v43  ;;  %v1427_v15 = vpop.permute.xlu2 %1426 }
 0x6dd   :  { %5895 = vrcp.f32 %v1132_v47  ;;  %v1146_v48 = vsel %vm1143_vm13, %v1145_v45, %v1141_v26  ;;  %vm1168_vm3 = vmor %vm1166_vm2, %vm1167_vm15  ;;  %v1186_v0 = vand.u32 2147483648, %v1132_v47  ;;  %v1184_v5 = vand.u32 2147483647, %v1132_v47 }
 0x6de   :  { %v1163_v41 = vsub.f32 1.0, %v1162_v46  ;;  %v1189_v50 = vmul.f32 %v5886_v13, %v1146_v48  ;;  %vm1180_vm9 = vweird.f32 %v1132_v47  ;;  %v6550_v13 = vpop.f32.mrf.mxu3 }
 0x6df   :  { %v1187_v3 = vor.u32 1.1754944e-38, %v1186_v0  ;;  %vm1185_vm11 = vcmp.eq.f32.partialorder %v1184_v5, 8.507059e+37 }
 0x6e0   :  { %v1164_v53 = vmul.f32 %v5894_v43, %v1163_v41  ;;  %5604 = vmatmul.msk.f32.vlgmr.msrb.gmra.mxu3 %vm253_vm14, %v1189_v50 }
 0x6e1   :  { %5614 = vmatpush.xpose.msk.msrb.mxu3 %vm253_vm14, %v1373_v23  ;;  %v6570_v23 = vpop.f32.mrf.mxu1 }
 0x6e2   :  { %v1165_v55 = vadd.f32 %v5894_v43, %v1164_v53 }
 0x6e3   :  { %v5896_v56 = vpop.eup %5895 }
 0x6e4   :  { %v1169_v58 = vsel %vm1168_vm3, %v5894_v43, %v1165_v55  ;;  %v1176_v59 = vmul.f32 %v5896_v56, %v1132_v47  ;;  %vm1181_vm8 = vweird.f32 %v5896_v56 }
 0x6e5   :  { %v1174_v60 = vsel %vm1171_vm6, %v1173_v57, %v1169_v58  ;;  %vm1182_vm10 = vmor %vm1180_vm9, %vm1181_vm8 }
 0x6e6   :  { %v1177_v61 = vsub.f32 1.0, %v1176_v59  ;;  %v1191_v63 = vmul.f32 %v6510_v33, %v1174_v60  ;;  %v6555_v44 = vpop.f32.mrf.mxu3 }
 0x6e8   :  { %v1178_v2 = vmul.f32 %v5896_v56, %v1177_v61  ;;  %5606 = vmatmul.msk.f32.vlgmr.msrb.gmra.mxu2 %vm253_vm14, %v1191_v63 }
 0x6ea   :  { %v1179_v6 = vadd.f32 %v5896_v56, %v1178_v2 }
 0x6ec   :  { %v1183_v8 = vsel %vm1182_vm10, %v5896_v56, %v1179_v6 }
 0x6ed   :  { %v1188_v4 = vsel %vm1185_vm11, %v1187_v3, %v1183_v8 }
 0x6ee   :  { %v1192_v9 = vmul.f32 %v6514_v18, %v1188_v4 }
 0x6ef   :  { %v1429_v10 = vpop.permute.xlu0 %1428 }
 0x6f0   :  { %5607 = vmatmul.msk.f32.vlgmr.msra.gmra.mxu3 %vm253_vm14, %v1192_v9  ;;  %5613 = vmatmul.msk.f32.vlgmr.msra.gmra.mxu2 %vm253_vm14, %v6531_v22 }
 0x6f1   :  { %5618 = vmatpush.xpose.msk.msrb.mxu2 %vm253_vm14, %v1429_v10 }
 0x6f8   :  { %5615 = vmatmul.msk.f32.vlgmr.msrb.gmra.mxu3 %vm253_vm14, %v6533_v27  ;;  %5619 = vmatmul.msk.f32.vlgmr.msrb.gmra.mxu2 %vm253_vm14, %v1427_v15 }
 0x704   :  { %v6557_v17 = vpop.f32.mrf.mxu3 }
 0x70c   :  { %v6559_v16 = vpop.f32.mrf.mxu3 }
 0x714   :  { %v6561_v33 = vpop.f32.mrf.mxu3 }
 0x71c   :  { %v1030_v34 = vpop.f32.mrf.mxu3 }
 0x71d   :  { %v1090_v18 = vmul.f32 0.35355338, %v1030_v34  ;;  %v5818_v34 = vpack.i.bf16 %v6270_v37, %v6266_v36 }
 0x71f   :  { %v1094_v20 = vsel %vm6364_vm7, -1e+30, %v1090_v18 }
 0x720   :  { %v1100_v21 = vsel %vm253_vm14, %v1094_v20, -inf }
 0x721   :  { %1101 = vmax.xlane.f32.xlu1 %v1100_v21 }
 0x755   :  { %v1423_v24 = vpop.f32.mrf.mxu1 }
 0x756   :  { %v1456_v12 = vmul.f32 0.35355338, %v1423_v24 }
 0x758   :  { %v1460_v40 = vsel %vm6324_vm5, -1e+30, %v1456_v12 }
 0x759   :  { %v1468_v46 = vsel %vm253_vm14, %v1460_v40, -inf }
 0x763   :  { %v6566_v11 = vpop.f32.mrf.mxu3 }
 0x76b   :  { %v6568_v22 = vpop.f32.mrf.mxu2 }
 0x773   :  { %v6572_v25 = vpop.f32.mrf.mxu3  ;;  %v1367_v27 = vpop.f32.mrf.mxu2 }
 0x774   :  { %v1454_v28 = vmul.f32 0.35355338, %v1367_v27 }
 0x776   :  { %v1458_v31 = vsel %vm6300_vm1, -1e+30, %v1454_v28 }
 0x777   :  { %v1462_v30 = vsel %vm253_vm14, %v1458_v31, -inf }
 0x778   :  { %1463 = vmax.xlane.f32.xlu0 %v1462_v30 }
 0x77b   :  { %v1395_v32 = vpop.f32.mrf.mxu3  ;;  %v1451_v19 = vpop.f32.mrf.mxu2 }
 0x77c   :  { %v1455_v29 = vmul.f32 0.35355338, %v1395_v32  ;;  %v1457_v38 = vmul.f32 0.35355338, %v1451_v19 }
 0x77e   :  { %v1459_v43 = vsel %vm6364_vm7, -1e+30, %v1455_v29  ;;  %v1461_v26 = vsel %vm6316_vm4, -1e+30, %v1457_v38 }
 0x77f   :  { %v1465_v45 = vsel %vm253_vm14, %v1459_v43, -inf  ;;  %v1471_v47 = vsel %vm253_vm14, %v1461_v26, -inf }
 0x780   :  { %1466 = vmax.xlane.f32.xlu2 %v1465_v45  ;;  %1469 = vmax.xlane.f32.xlu0 %v1468_v46 }
 0x781   :  { %1472 = vmax.xlane.f32.xlu1 %v1471_v47 }
 0x794   :  { %v1102_v41 = vpop.xlane.xlu1 %1101 }
 0x795   :  { %v1110_v48 = vsub.f32 %v1094_v20, %v1102_v41 }
 0x797   :  { %v1115_v49 = vmul.f32 1.442695, %v1110_v48 }
 0x799   :  { %5897 = vpow2.f32 %v1115_v49 }
 0x79f   :  { %v6586_v50 = vpop.eup %5897 }
 0x7a0   :  { %v1124_v53 = vsel %vm253_vm14, %v6586_v50, 0.0 }
 0x7a1   :  { %1125 = vadd.xlane.f32.xlu0 %v1124_v53  ;;  %v86_v53 = vld [vmem:[#allocation5 + $0x50] sm:$0xff] }
 0x7b5   :  { %1558 = vrot.lane.b32.xlu0 %v6262_v35, %s6186_s6 }
 0x7bd   :  { %1636 = vrot.lane.b32.xlu0 %v6274_v39, %s6186_s6 }
 0x7eb   :  { %v1464_v54 = vpop.xlane.xlu0 %1463 }
 0x7ec   :  { %v1474_v60 = vsub.f32 %v1458_v31, %v1464_v54 }
 0x7ee   :  { %v1478_v2 = vmul.f32 1.442695, %v1474_v60 }
 0x7f3   :  { %v1470_v55 = vpop.xlane.xlu0 %1469  ;;  %v1467_v56 = vpop.xlane.xlu2 %1466 }
 0x7f4   :  { %v1476_v57 = vsub.f32 %v1460_v40, %v1470_v55  ;;  %v1475_v58 = vsub.f32 %v1459_v43, %v1467_v56  ;;  %v1473_v59 = vpop.xlane.xlu1 %1472 }
 0x7f5   :  { %v1477_v0 = vsub.f32 %v1461_v26, %v1473_v59 }
 0x7f6   :  { %v1482_v61 = vmul.f32 1.442695, %v1476_v57  ;;  %v1480_v63 = vmul.f32 1.442695, %v1475_v58 }
 0x7f7   :  { %v1484_v5 = vmul.f32 1.442695, %v1477_v0 }
 0x7f8   :  { %5899 = vpow2.f32 %v1482_v61 }
 0x7f9   :  { %5901 = vpow2.f32 %v1480_v63 }
 0x7fa   :  { %5903 = vpow2.f32 %v1478_v2 }
 0x7fb   :  { %5905 = vpow2.f32 %v1484_v5 }
 0x7fe   :  { %v6594_v6 = vpop.eup %5899 }
 0x7ff   :  { %v1492_v35 = vsel %vm253_vm14, %v6594_v6, 0.0  ;;  %v6598_v39 = vpop.eup %5901 }
 0x800   :  { %1493 = vadd.xlane.f32.xlu2 %v1492_v35  ;;  %v1489_v3 = vsel %vm253_vm14, %v6598_v39, 0.0  ;;  %v6602_v8 = vpop.eup %5903 }
 0x801   :  { %1490 = vadd.xlane.f32.xlu1 %v1489_v3  ;;  %v6604_v4 = vpop.eup %5905  ;;  %v1486_v9 = vsel %vm253_vm14, %v6602_v8, 0.0 }
 0x802   :  { %v1495_v10 = vsel %vm253_vm14, %v6604_v4, 0.0 }
 0x808   :  { %1487 = vadd.xlane.f32.xlu2 %v1486_v9 }
 0x809   :  { %1496 = vadd.xlane.f32.xlu1 %v1495_v10 }
 0x814   :  { %v1126_v15 = vpop.xlane.xlu0 %1125 }
 0x815   :  { %5907 = vrcp.f32 %v1126_v15  ;;  %v1158_v37 = vand.u32 2147483648, %v1126_v15  ;;  %vm1152_vm13 = vweird.f32 %v1126_v15  ;;  %v1156_v12 = vand.u32 2147483647, %v1126_v15 }
 0x817   :  { %v1159_v43 = vor.u32 1.1754944e-38, %v1158_v37  ;;  %vm1157_vm2 = vcmp.eq.f32.partialorder %v1156_v12, 8.507059e+37 }
 0x81b   :  { %v5908_v21 = vpop.eup %5907 }
 0x81c   :  { %v1148_v27 = vmul.f32 %v5908_v21, %v1126_v15  ;;  %vm1153_vm12 = vweird.f32 %v5908_v21 }
 0x81d   :  { %vm1154_vm15 = vmor %vm1152_vm13, %vm1153_vm12 }
 0x81e   :  { %v1149_v28 = vsub.f32 1.0, %v1148_v27 }
 0x820   :  { %1219 = vrot.lane.b32.xlu2 %v6266_v36, %s6183_s30  ;;  %v1150_v31 = vmul.f32 %v5908_v21, %v1149_v28 }
 0x822   :  { %5819 = vrot.lane.b32.xlu1 %v5818_v34, %s6186_s6  ;;  %v1151_v36 = vadd.f32 %v5908_v21, %v1150_v31 }
 0x824   :  { %v1155_v29 = vsel %vm1154_vm15, %v5908_v21, %v1151_v36 }
 0x825   :  { %v1160_v26 = vsel %vm1157_vm2, %v1159_v43, %v1155_v29 }
 0x826   :  { %v1190_v49 = vmul.f32 %v6586_v50, %v1160_v26 }
 0x827   :  { %v1559_v18 = vpop.permute.xlu0 %1558 }
 0x828   :  { %1579 = vmatpush.msra.mxu3 %v1559_v18 }
 0x82f   :  { %v1637_v20 = vpop.permute.xlu0 %1636 }
 0x830   :  { %1657 = vmatpush.msrb.mxu3 %v1637_v20 }
 0x873   :  { %v6615_v24 = vpop.xlane.xlu2 %1493 }
 0x874   :  { %v6617_v30 = vpop.xlane.xlu1 %1490  ;;  %5909 = vrcp.f32 %v6615_v24  ;;  %vm1531_vm15 = vweird.f32 %v6615_v24  ;;  %v1537_v28 = vand.u32 2147483648, %v6615_v24 }
 0x875   :  { %5911 = vrcp.f32 %v6617_v30  ;;  %v1523_v27 = vand.u32 2147483648, %v6617_v30  ;;  %v1521_v31 = vand.u32 2147483647, %v6617_v30 }
 0x876   :  { %v1538_v29 = vor.u32 1.1754944e-38, %v1537_v28 }
 0x87a   :  { %v6621_v19 = vpop.eup %5909 }
 0x87b   :  { %v1488_v32 = vpop.xlane.xlu2 %1487  ;;  %v6623_v40 = vpop.eup %5911  ;;  %v1527_v46 = vmul.f32 %v6621_v19, %v6615_v24  ;;  %vm1532_vm8 = vweird.f32 %v6621_v19 }
 0x87c   :  { %5913 = vrcp.f32 %v1488_v32  ;;  %v1497_v38 = vpop.xlane.xlu1 %1496  ;;  %v1513_v45 = vmul.f32 %v6623_v40, %v6617_v30  ;;  %v1509_v59 = vand.u32 2147483648, %v1488_v32  ;;  %v1507_v63 = vand.u32 2147483647, %v1488_v32 }
 0x87d   :  { %5915 = vrcp.f32 %v1497_v38  ;;  %v1528_v56 = vsub.f32 1.0, %v1527_v46  ;;  %vm1503_vm6 = vweird.f32 %v1488_v32  ;;  %vm1518_vm12 = vweird.f32 %v6623_v40 }
 0x87e   :  { %v1514_v55 = vsub.f32 1.0, %v1513_v45  ;;  %v1510_v35 = vor.u32 1.1754944e-38, %v1509_v59  ;;  %vm1508_vm11 = vcmp.eq.f32.partialorder %v1507_v63, 8.507059e+37  ;;  %vm1545_vm13 = vweird.f32 %v1497_v38 }
 0x87f   :  { %v1529_v50 = vmul.f32 %v6621_v19, %v1528_v56  ;;  %v1551_v10 = vand.u32 2147483648, %v1497_v38  ;;  %v1549_v20 = vand.u32 2147483647, %v1497_v38 }
 0x880   :  { %v1515_v0 = vmul.f32 %v6623_v40, %v1514_v55 }
 0x881   :  { %v1530_v18 = vadd.f32 %v6621_v19, %v1529_v50  ;;  %v1552_v37 = vor.u32 1.1754944e-38, %v1551_v10 }
 0x882   :  { %v5914_v47 = vpop.eup %5913  ;;  %v1516_v34 = vadd.f32 %v6623_v40, %v1515_v0 }
 0x883   :  { %v1499_v41 = vmul.f32 %v5914_v47, %v1488_v32  ;;  %v1220_v48 = vpop.permute.xlu2 %1219  ;;  %v5916_v54 = vpop.eup %5915  ;;  %vm1504_vm3 = vweird.f32 %v5914_v47  ;;  %v1524_v32 = vor.u32 1.1754944e-38, %v1523_v27 }
 0x884   :  { %1240 = vmatpush.msra.mxu0 %v1220_v48  ;;  %v1541_v57 = vmul.f32 %v5916_v54, %v1497_v38  ;;  %vm1505_vm9 = vmor %vm1503_vm6, %vm1504_vm3  ;;  %vm1546_vm10 = vweird.f32 %v5916_v54  ;;  %vm1517_vm3 = vweird.f32 %v6617_v30 }
 0x885   :  { %v1500_v58 = vsub.f32 1.0, %v1499_v41  ;;  %5605 = vmatmul.msk.f32.vlgmr.msra.gmra.mxu0 %vm253_vm14, %v1190_v49  ;;  %vm1547_vm2 = vmor %vm1545_vm13, %vm1546_vm10  ;;  %vm1550_vm10 = vcmp.eq.f32.partialorder %v1549_v20, 8.507059e+37 }
 0x886   :  { %1324 = vmatpush.msrb.mxu0 %v86_v53  ;;  %v1542_v60 = vsub.f32 1.0, %v1541_v57  ;;  %vm6648_vm6 = vmor %vm1531_vm15, %vm1532_vm8  ;;  %vm1522_vm8 = vcmp.eq.f32.partialorder %v1521_v31, 8.507059e+37  ;;  %v6675_v53 = vld [vmem:[#allocation5 + $0xa0] sm:$0xff] }
 0x887   :  { %v1501_v61 = vmul.f32 %v5914_v47, %v1500_v58  ;;  %v1534_v30 = vsel %vm6648_vm6, %v6621_v19, %v1530_v18  ;;  %v87_v19 = vld [vmem:[#allocation5 + $0x58] sm:$0xff]  ;;  %v6087_v58 = vld [vmem:[#allocation2 + $0x8] sm:$0xff] }
 0x888   :  { %v1543_v2 = vmul.f32 %v5916_v54, %v1542_v60  ;;  %v6089_v18 = vld [vmem:[#allocation2 + $0x18] sm:$0xff] }
 0x889   :  { %v1502_v5 = vadd.f32 %v5914_v47, %v1501_v61 }
 0x88a   :  { %v1544_v3 = vadd.f32 %v5916_v54, %v1543_v2 }
 0x88b   :  { %v1506_v9 = vsel %vm1505_vm9, %v5914_v47, %v1502_v5  ;;  %vm1519_vm9 = vmor %vm1517_vm3, %vm1518_vm12 }
 0x88c   :  { %v1511_v15 = vsel %vm1508_vm11, %v1510_v35, %v1506_v9  ;;  %v1520_v12 = vsel %vm1519_vm9, %v6623_v40, %v1516_v34  ;;  %v6088_v35 = vld [vmem:[#allocation2 + $0x10] sm:$0xff] }
 0x88d   :  { %5608 = vmatmul.msk.f32.vlgmr.msrb.gmra.mxu0 %vm253_vm14, %v6566_v11  ;;  %v1554_v21 = vmul.f32 %v6602_v8, %v1511_v15  ;;  %v1535_v11 = vand.u32 2147483647, %v6615_v24  ;;  %v1548_v8 = vsel %vm1547_vm2, %v5916_v54, %v1544_v3  ;;  %v1525_v24 = vsel %vm1522_vm8, %v1524_v32, %v1520_v12 }
 0x88e   :  { %v1553_v38 = vsel %vm1550_vm10, %v1552_v37, %v1548_v8  ;;  %v1555_v41 = vmul.f32 %v6598_v39, %v1525_v24  ;;  %v245_v54 = vperm.slane %v6675_v53, 5 }
 0x88f   :  { %5620 = vmatmul.msk.f32.vlgmr.msra.gmra.mxu3 %vm253_vm14, %v1554_v21  ;;  %vm1536_vm11 = vcmp.eq.f32.partialorder %v1535_v11, 8.507059e+37  ;;  %v1557_v45 = vmul.f32 %v6604_v4, %v1553_v38 }
 0x890   :  { %v1539_v43 = vsel %vm1536_vm11, %v1538_v29, %v1534_v30  ;;  %v247_v59 = vadd.f32 %v6087_v58, %v245_v54  ;;  %v248_v3 = vadd.f32 %v6088_v35, %v245_v54  ;;  %v249_v20 = vadd.f32 %v6089_v18, %v245_v54  ;;  %v94_v18 = vld [vmem:[#allocation5 + $0x90] sm:$0xff] }
 0x891   :  { %v1556_v40 = vmul.f32 %v6594_v6, %v1539_v43 }
 0x892   :  { %v609_v50 = vadd.f32 %v6542_v1, %v247_v59  ;;  %v610_v15 = vadd.f32 %v6550_v13, %v248_v3  ;;  %v611_v28 = vadd.f32 %v6555_v44, %v249_v20 }
 0x894   :  { %v5820_v26 = vpop.permute.xlu1 %5819  ;;  %v974_v5 = vadd.f32 %v6557_v17, %v609_v50  ;;  %v975_v1 = vadd.f32 %v6559_v16, %v610_v15  ;;  %v976_v13 = vadd.f32 %v6561_v33, %v611_v28  ;;  %v1800_v28 = vperm.slane %v6675_v53, 4 }
 0x895   :  { %v5822_v46 = vunpack.i.h.bf16 %v5820_v26  ;;  %v5821_v47 = vunpack.i.l.bf16 %v5820_v26 }
 0x897   :  { %5623 = vmatmul.msk.f32.vlgmr.msrb.gmra.mxu3 %vm253_vm14, %v1557_v45  ;;  %1605 = vmatpush.msrb.mxu1 %v5821_v47 }
 0x898   :  { %1631 = vmatpush.msra.mxu2 %v5822_v46  ;;  %5621 = vmatmul.msk.f32.vlgmr.msrb.gmra.mxu1 %vm253_vm14, %v1555_v41 }
 0x899   :  { %5622 = vmatmul.msk.f32.vlgmr.msra.gmra.mxu2 %vm253_vm14, %v1556_v40  ;;  %1689 = vmatpush.msra.mxu1 %v87_v19 }
 0x902   :  { %v1242_v48 = vpop.f32.mrf.mxu0 }
 0x903   :  { %5609 = vmatmul.msk.f32.gmra.mxu0 %vm253_vm14, %v1242_v48 }
 0x90a   :  { %v1326_v56 = vpop.f32.mrf.mxu0 }
 0x90b   :  { %5610 = vmatmul.msk.f32.gmra.mxu0 %vm253_vm14, %v6568_v22  ;;  %v6086_v22 = vld [vmem:[#allocation2] sm:$0xff] }
 0x90c   :  { %v246_v55 = vadd.f32 %v6086_v22, %v245_v54  ;;  %v82_v54 = vld [vmem:[#allocation5 + $0x30] sm:$0xff]  ;;  %v81_v22 = vld [vmem:[#allocation5 + $0x28] sm:$0xff] }
 0x912   :  { %v1581_v4 = vpop.f32.mrf.mxu3 }
 0x913   :  { %5611 = vmatmul.msk.f32.gmra.mxu0 %vm253_vm14, %v6572_v25  ;;  %5624 = vmatmul.msk.f32.vlgmr.msra.gmra.mxu1 %vm253_vm14, %v1581_v4  ;;  %v608_v25 = vadd.f32 %v6537_v51, %v246_v55  ;;  %v80_v55 = vld [vmem:[#allocation5 + $0x20] sm:$0xff] }
 0x915   :  { %v1607_v6 = vpop.f32.mrf.mxu1  ;;  %v973_v57 = vadd.f32 %v6570_v23, %v608_v25 }
 0x917   :  { %v1338_v60 = vadd.f32 %v1326_v56, %v973_v57 }
 0x91a   :  { %v1659_v49 = vpop.f32.mrf.mxu3 }
 0x91b   :  { %5625 = vmatmul.msk.f32.gmra.mxu1 %vm253_vm14, %v1607_v6 }
 0x91c   :  { %v1633_v39 = vpop.f32.mrf.mxu2 }
 0x923   :  { %5626 = vmatmul.msk.f32.gmra.mxu1 %vm253_vm14, %v1633_v39 }
 0x92b   :  { %5627 = vmatmul.msk.f32.gmra.mxu1 %vm253_vm14, %v1659_v49  ;;  %v83_v49 = vld [vmem:[#allocation5 + $0x38] sm:$0xff] }
 0x92c   :  { %1830 = vmatpush.msrb.mxu2 %v83_v49 }
 0x92e   :  { %1831 = vmatpush.msrb.mxu2 %v82_v54 }
 0x930   :  { %1832 = vmatpush.msrb.mxu2 %v81_v22 }
 0x932   :  { %1833 = vmatpush.msrb.mxu2 %v80_v55 }
 0x980   :  { %v1329_v61 = vpop.f32.mrf.mxu0 }
 0x981   :  { %v1339_v51 = vadd.f32 %v1329_v61, %v974_v5 }
 0x988   :  { %v1332_v10 = vpop.f32.mrf.mxu0 }
 0x989   :  { %v1340_v21 = vadd.f32 %v1332_v10, %v975_v1  ;;  %v95_v1 = vld [vmem:[#allocation5 + $0x98] sm:$0xff] }
 0x98a   :  { %1872 = vmatpush.msra.mxu0 %v95_v1 }
 0x98c   :  { %1873 = vmatpush.msra.mxu0 %v94_v18 }
 0x990   :  { %v1691_v63 = vpop.f32.mrf.mxu1  ;;  %v1335_v36 = vpop.f32.mrf.mxu0 }
 0x991   :  { %v6680_v0 = vadd.f32 %v1691_v63, %v1338_v60  ;;  %v1341_v11 = vadd.f32 %v1335_v36, %v976_v13 }
 0x993   :  { %v1707_v2 = vsel %vm97_vm0, %v6680_v0, 0.0 }
 0x994   :  { %1708 = vadd.xlane.f32.xlu0 %v1707_v2 }
 0x998   :  { %v1694_v9 = vpop.f32.mrf.mxu1 }
 0x999   :  { %v6686_v23 = vadd.f32 %v1694_v9, %v1339_v51 }
 0x99b   :  { %v1710_v34 = vsel %vm97_vm0, %v6686_v23, 0.0 }
 0x99c   :  { %1711 = vadd.xlane.f32.xlu2 %v1710_v34  ;;  %v1795_v34 = vperm.slane %v6675_v53, 3 }
 0x9a0   :  { %v1697_v27 = vpop.f32.mrf.mxu1 }
 0x9a1   :  { %v6692_v17 = vadd.f32 %v1697_v27, %v1340_v21 }
 0x9a3   :  { %v1713_v31 = vsel %vm97_vm0, %v6692_v17, 0.0 }
 0x9a4   :  { %1714 = vadd.xlane.f32.xlu1 %v1713_v31  ;;  %v93_v31 = vld [vmem:[#allocation5 + $0x88] sm:$0xff] }
 0x9a5   :  { %1874 = vmatpush.msra.mxu0 %v93_v31 }
 0x9a8   :  { %v1700_v8 = vpop.f32.mrf.mxu1 }
 0x9a9   :  { %v6698_v37 = vadd.f32 %v1700_v8, %v1341_v11 }
 0x9ab   :  { %v1716_v16 = vsel %vm97_vm0, %v6698_v37, 0.0 }
 0x9ac   :  { %1717 = vadd.xlane.f32.xlu2 %v1716_v16  ;;  %v92_v16 = vld [vmem:[#allocation5 + $0x80] sm:$0xff] }
 0x9ad   :  { %1875 = vmatpush.msra.mxu0 %v92_v16 }
 0xa07   :  { %v1709_v12 = vpop.xlane.xlu0 %1708 }
 0xa08   :  { %v1719_v30 = vmul.f32 %v1709_v12, %v6224_v14 }
 0xa0a   :  { %v1723_v44 = vsub.f32 %v6680_v0, %v1719_v30 }
 0xa0c   :  { %v1727_v32 = vmul.f32 %v1723_v44, %v1723_v44 }
 0xa0e   :  { %v1731_v29 = vsel %vm97_vm0, %v1727_v32, 0.0 }
 0xa0f   :  { %1732 = vadd.xlane.f32.xlu0 %v1731_v29  ;;  %v1712_v38 = vpop.xlane.xlu2 %1711 }
 0xa10   :  { %v1720_v33 = vmul.f32 %v1712_v38, %v6224_v14  ;;  %v91_v38 = vld [vmem:[#allocation5 + $0x78] sm:$0xff] }
 0xa11   :  { %1876 = vmatpush.msra.mxu0 %v91_v38 }
 0xa12   :  { %v6707_v24 = vsub.f32 %v6686_v23, %v1720_v33 }
 0xa14   :  { %v1728_v43 = vmul.f32 %v6707_v24, %v6707_v24 }
 0xa16   :  { %v1734_v26 = vsel %vm97_vm0, %v1728_v43, 0.0 }
 0xa17   :  { %v1715_v45 = vpop.xlane.xlu1 %1714  ;;  %1735 = vadd.xlane.f32.xlu2 %v1734_v26 }
 0xa18   :  { %v1721_v46 = vmul.f32 %v1715_v45, %v6224_v14 }
 0xa1a   :  { %v6714_v47 = vsub.f32 %v6692_v17, %v1721_v46 }
 0xa1c   :  { %v1729_v41 = vmul.f32 %v6714_v47, %v6714_v47 }
 0xa1e   :  { %v1737_v40 = vsel %vm97_vm0, %v1729_v41, 0.0 }
 0xa1f   :  { %1738 = vadd.xlane.f32.xlu0 %v1737_v40  ;;  %v1718_v19 = vpop.xlane.xlu2 %1717 }
 0xa20   :  { %v1722_v48 = vmul.f32 %v1718_v19, %v6224_v14 }
 0xa22   :  { %v6721_v4 = vsub.f32 %v6698_v37, %v1722_v48 }
 0xa24   :  { %v1730_v6 = vmul.f32 %v6721_v4, %v6721_v4 }
 0xa26   :  { %v1740_v39 = vsel %vm97_vm0, %v1730_v6, 0.0 }
 0xa27   :  { %1741 = vadd.xlane.f32.xlu1 %v1740_v39 }
 0xa82   :  { %v1733_v56 = vpop.xlane.xlu0 %1732 }
 0xa83   :  { %v1743_v25 = vmul.f32 %v1733_v56, %v6224_v14 }
 0xa85   :  { %v1747_v57 = vadd.f32 1e-05, %v1743_v25 }
 0xa87   :  { %5917 = vrsqrt.f32 %v1747_v57  ;;  %vm1757_vm13 = vweird.f32 %v1747_v57 }
 0xa8a   :  { %v1736_v58 = vpop.xlane.xlu2 %1735 }
 0xa8b   :  { %v1744_v59 = vmul.f32 %v1736_v58, %v6224_v14 }
 0xa8d   :  { %v5918_v60 = vpop.eup %5917  ;;  %v1748_v61 = vadd.f32 1e-05, %v1744_v59 }
 0xa8e   :  { %v1752_v63 = vmul.f32 %v5918_v60, %v1747_v57  ;;  %vm1758_vm12 = vweird.f32 %v5918_v60 }
 0xa8f   :  { %5919 = vrsqrt.f32 %v1748_v61  ;;  %vm1759_vm15 = vmor %vm1757_vm13, %vm1758_vm12  ;;  %vm1767_vm3 = vweird.f32 %v1748_v61 }
 0xa90   :  { %v1753_v50 = vmul.f32 %v5918_v60, %v1752_v63  ;;  %v90_v63 = vld [vmem:[#allocation5 + $0x70] sm:$0xff] }
 0xa91   :  { %1877 = vmatpush.msra.mxu0 %v90_v63 }
 0xa92   :  { %v1754_v2 = vmul.f32 0.5, %v1753_v50  ;;  %v1739_v5 = vpop.xlane.xlu0 %1738  ;;  %v88_v50 = vld [vmem:[#allocation5 + $0x60] sm:$0xff] }
 0xa93   :  { %v1745_v35 = vmul.f32 %v1739_v5, %v6224_v14 }
 0xa94   :  { %v1755_v3 = vsub.f32 1.5, %v1754_v2  ;;  %v1805_v2 = vperm.slane %v6675_v53, 6 }
 0xa95   :  { %v5920_v51 = vpop.eup %5919  ;;  %v1749_v9 = vadd.f32 1e-05, %v1745_v35 }
 0xa96   :  { %v1756_v10 = vmul.f32 %v5918_v60, %v1755_v3  ;;  %v1762_v15 = vmul.f32 %v5920_v51, %v1748_v61  ;;  %vm1768_vm2 = vweird.f32 %v5920_v51 }
 0xa97   :  { %5921 = vrsqrt.f32 %v1749_v9  ;;  %vm1769_vm6 = vmor %vm1767_vm3, %vm1768_vm2  ;;  %vm1777_vm10 = vweird.f32 %v1749_v9 }
 0xa98   :  { %v1760_v20 = vsel %vm1759_vm15, %v5918_v60, %v1756_v10  ;;  %v1763_v21 = vmul.f32 %v5920_v51, %v1762_v15  ;;  %vm1851_vm15 = vcmask 523264  }
 0xa99   :  { %v1791_v27 = vmul.f32 %v1760_v20, %v1723_v44 }
 0xa9a   :  { %v1764_v36 = vmul.f32 0.5, %v1763_v21  ;;  %v1742_v13 = vpop.xlane.xlu1 %1741  ;;  %v1897_v21 = vperm.slane %v6675_v53, 7 }
 0xa9b   :  { %v1796_v11 = vmul.f32 %v1795_v34, %v1791_v27  ;;  %v1746_v8 = vmul.f32 %v1742_v13, %v6224_v14 }
 0xa9c   :  { %v1765_v12 = vsub.f32 1.5, %v1764_v36 }
 0xa9d   :  { %v5922_v30 = vpop.eup %5921  ;;  %v1750_v32 = vadd.f32 1e-05, %v1746_v8  ;;  %v1801_v29 = vadd.f32 %v1800_v28, %v1796_v11 }
 0xa9e   :  { %v1766_v33 = vmul.f32 %v5920_v51, %v1765_v12  ;;  %v1772_v44 = vmul.f32 %v5922_v30, %v1749_v9  ;;  %vm1778_vm9 = vweird.f32 %v5922_v30 }
 0xa9f   :  { %5923 = vrsqrt.f32 %v1750_v32  ;;  %5628 = vmatmul.msk.f32.vlgmr.msrb.gmra.mxu2 %vm97_vm0, %v1801_v29  ;;  %vm1779_vm8 = vmor %vm1777_vm10, %vm1778_vm9  ;;  %vm1787_vm12 = vweird.f32 %v1750_v32 }
 0xaa0   :  { %v1773_v43 = vmul.f32 %v5922_v30, %v1772_v44  ;;  %v1770_v26 = vsel %vm1769_vm6, %v5920_v51, %v1766_v33 }
 0xaa1   :  { %v1792_v45 = vmul.f32 %v1770_v26, %v6707_v24 }
 0xaa2   :  { %v1774_v46 = vmul.f32 0.5, %v1773_v43 }
 0xaa3   :  { %v1797_v41 = vmul.f32 %v1795_v34, %v1792_v45 }
 0xaa4   :  { %v1775_v40 = vsub.f32 1.5, %v1774_v46 }
 0xaa5   :  { %v5924_v19 = vpop.eup %5923  ;;  %v1802_v48 = vadd.f32 %v1800_v28, %v1797_v41 }
 0xaa6   :  { %v1776_v6 = vmul.f32 %v5922_v30, %v1775_v40  ;;  %v1782_v39 = vmul.f32 %v5924_v19, %v1750_v32  ;;  %vm1788_vm11 = vweird.f32 %v5924_v19 }
 0xaa7   :  { %5629 = vmatmul.msk.f32.gmra.mxu2 %vm97_vm0, %v1802_v48  ;;  %vm1789_vm13 = vmor %vm1787_vm12, %vm1788_vm11 }
 0xaa8   :  { %v1783_v49 = vmul.f32 %v5924_v19, %v1782_v39  ;;  %v1780_v54 = vsel %vm1779_vm8, %v5922_v30, %v1776_v6 }
 0xaa9   :  { %v1793_v22 = vmul.f32 %v1780_v54, %v6714_v47  ;;  %v89_v47 = vld [vmem:[#allocation5 + $0x68] sm:$0xff] }
 0xaaa   :  { %v1784_v55 = vmul.f32 0.5, %v1783_v49  ;;  %1878 = vmatpush.msra.mxu0 %v89_v47 }
 0xaab   :  { %v1798_v56 = vmul.f32 %v1795_v34, %v1793_v22 }
 0xaac   :  { %v1785_v25 = vsub.f32 1.5, %v1784_v55  ;;  %1879 = vmatpush.msra.mxu0 %v88_v50 }
 0xaad   :  { %v1803_v24 = vadd.f32 %v1800_v28, %v1798_v56 }
 0xaae   :  { %v1786_v57 = vmul.f32 %v5924_v19, %v1785_v25 }
 0xaaf   :  { %5630 = vmatmul.msk.f32.gmra.mxu2 %vm97_vm0, %v1803_v24  ;;  %v1906_v24 = vld [vmem:[#allocation5 + $0xc0] sm:$0xff] }
 0xab0   :  { %v1790_v58 = vsel %vm1789_vm13, %v5924_v19, %v1786_v57  ;;  %2047 = vmatpush.msra.mxu3 %v1906_v24  ;;  %v1905_v57 = vld [vmem:[#allocation5 + $0xb8] sm:$0xff] }
 0xab1   :  { %v1794_v59 = vmul.f32 %v1790_v58, %v6721_v4  ;;  %v1904_v58 = vld [vmem:[#allocation5 + $0xb0] sm:$0xff] }
 0xab2   :  { %2048 = vmatpush.msra.mxu3 %v1905_v57 }
 0xab3   :  { %v1799_v60 = vmul.f32 %v1795_v34, %v1794_v59  ;;  %v1903_v59 = vld [vmem:[#allocation5 + $0xa8] sm:$0xff] }
 0xab4   :  { %2049 = vmatpush.msra.mxu3 %v1904_v58 }
 0xab5   :  { %v1804_v61 = vadd.f32 %v1800_v28, %v1799_v60 }
 0xab6   :  { %2050 = vmatpush.msra.mxu3 %v1903_v59 }
 0xab7   :  { %5631 = vmatmul.msk.f32.gmra.mxu2 %vm97_vm0, %v1804_v61 }
 0xb22   :  { %v1835_v5 = vpop.f32.mrf.mxu2 }
 0xb23   :  { %v1836_v35 = vadd.f32 %v1835_v5, %v1805_v2 }
 0xb25   :  { %v1847_v3 = vmax.f32 %v1836_v35, 0.0 }
 0xb27   :  { %5632 = vmatmul.msk.f32.vlgmr.msra.gmra.mxu0 %vm1851_vm15, %v1847_v3 }
 0xb2a   :  { %v1838_v51 = vpop.f32.mrf.mxu2 }
 0xb2b   :  { %v1839_v4 = vadd.f32 %v1838_v51, %v1805_v2 }
 0xb2d   :  { %v1848_v9 = vmax.f32 %v1839_v4, 0.0 }
 0xb2f   :  { %5633 = vmatmul.msk.f32.gmra.mxu0 %vm1851_vm15, %v1848_v9 }
 0xb32   :  { %v1841_v10 = vpop.f32.mrf.mxu2 }
 0xb33   :  { %v1842_v15 = vadd.f32 %v1841_v10, %v1805_v2 }
 0xb35   :  { %v1849_v34 = vmax.f32 %v1842_v15, 0.0 }
 0xb37   :  { %5634 = vmatmul.msk.f32.gmra.mxu0 %vm1851_vm15, %v1849_v34 }
 0xb3a   :  { %v1844_v1 = vpop.f32.mrf.mxu2 }
 0xb3b   :  { %v1845_v18 = vadd.f32 %v1844_v1, %v1805_v2  ;;  %v1923_v1 = vld [vmem:[#allocation5 + $0x148] sm:$0xff] }
 0xb3d   :  { %v1850_v20 = vmax.f32 %v1845_v18, 0.0 }
 0xb3f   :  { %5635 = vmatmul.msk.f32.gmra.mxu0 %vm1851_vm15, %v1850_v20 }
 0xba4   :  { %v1881_v27 = vpop.f32.mrf.mxu0 }
 0xba5   :  { %v1893_v28 = vadd.f32 %v1881_v27, %v6680_v0 }
 0xba7   :  { %v6746_v31 = vadd.f32 %v1897_v21, %v1893_v28 }
 0xba9   :  { %v1924_v36 = vsel %vm97_vm0, %v6746_v31, 0.0 }
 0xbaa   :  { %1925 = vadd.xlane.f32.xlu2 %v1924_v36 }
 0xbac   :  { %v1884_v13 = vpop.f32.mrf.mxu0 }
 0xbad   :  { %v1894_v11 = vadd.f32 %v1884_v13, %v6686_v23  ;;  %v2017_v13 = vperm.slane %v1923_v1, 2 }
 0xbaf   :  { %v6751_v8 = vadd.f32 %v1897_v21, %v1894_v11 }
 0xbb1   :  { %v1927_v16 = vsel %vm97_vm0, %v6751_v8, 0.0 }
 0xbb2   :  { %1928 = vadd.xlane.f32.xlu0 %v1927_v16 }
 0xbb4   :  { %v1887_v12 = vpop.f32.mrf.mxu0 }
 0xbb5   :  { %v1895_v53 = vadd.f32 %v1887_v12, %v6692_v17 }
 0xbb7   :  { %v6756_v30 = vadd.f32 %v1897_v21, %v1895_v53 }
 0xbb9   :  { %v1930_v0 = vsel %vm97_vm0, %v6756_v30, 0.0 }
 0xbba   :  { %1931 = vadd.xlane.f32.xlu1 %v1930_v0 }
 0xbbc   :  { %v1890_v32 = vpop.f32.mrf.mxu0 }
 0xbbd   :  { %v1896_v29 = vadd.f32 %v1890_v32, %v6698_v37 }
 0xbbf   :  { %v6761_v38 = vadd.f32 %v1897_v21, %v1896_v29  ;;  %v2012_v21 = vperm.slane %v1923_v1, 1 }
 0xbc1   :  { %v1933_v23 = vsel %vm97_vm0, %v6761_v38, 0.0 }
 0xbc2   :  { %1934 = vadd.xlane.f32.xlu2 %v1933_v23 }
 0xc1d   :  { %v1926_v33 = vpop.xlane.xlu2 %1925 }
 0xc1e   :  { %v1936_v44 = vmul.f32 %v1926_v33, %v6224_v14 }
 0xc20   :  { %v1940_v17 = vsub.f32 %v6746_v31, %v1936_v44 }
 0xc22   :  { %v1944_v43 = vmul.f32 %v1940_v17, %v1940_v17 }
 0xc24   :  { %v1948_v26 = vsel %vm97_vm0, %v1944_v43, 0.0 }
 0xc25   :  { %v1929_v45 = vpop.xlane.xlu0 %1928  ;;  %1949 = vadd.xlane.f32.xlu0 %v1948_v26 }
 0xc26   :  { %v1937_v46 = vmul.f32 %v1929_v45, %v6224_v14 }
 0xc28   :  { %v6770_v37 = vsub.f32 %v6751_v8, %v1937_v46 }
 0xc2a   :  { %v1945_v41 = vmul.f32 %v6770_v37, %v6770_v37 }
 0xc2c   :  { %v1951_v40 = vsel %vm97_vm0, %v1945_v41, 0.0 }
 0xc2d   :  { %1952 = vadd.xlane.f32.xlu1 %v1951_v40  ;;  %v1932_v19 = vpop.xlane.xlu1 %1931 }
 0xc2e   :  { %v1938_v48 = vmul.f32 %v1932_v19, %v6224_v14 }
 0xc30   :  { %v6777_v6 = vsub.f32 %v6756_v30, %v1938_v48 }
 0xc32   :  { %v1946_v39 = vmul.f32 %v6777_v6, %v6777_v6 }
 0xc34   :  { %v1954_v49 = vsel %vm97_vm0, %v1946_v39, 0.0 }
 0xc35   :  { %1955 = vadd.xlane.f32.xlu2 %v1954_v49  ;;  %v1935_v54 = vpop.xlane.xlu2 %1934 }
 0xc36   :  { %v1939_v22 = vmul.f32 %v1935_v54, %v6224_v14 }
 0xc38   :  { %v6784_v55 = vsub.f32 %v6761_v38, %v1939_v22 }
 0xc3a   :  { %v1947_v56 = vmul.f32 %v6784_v55, %v6784_v55 }
 0xc3c   :  { %v1957_v25 = vsel %vm97_vm0, %v1947_v56, 0.0 }
 0xc3d   :  { %1958 = vadd.xlane.f32.xlu0 %v1957_v25 }
 0xc98   :  { %v1950_v60 = vpop.xlane.xlu0 %1949 }
 0xc99   :  { %v1960_v61 = vmul.f32 %v1950_v60, %v6224_v14 }
 0xc9b   :  { %v1964_v63 = vadd.f32 1e-05, %v1960_v61 }
 0xc9d   :  { %5925 = vrsqrt.f32 %v1964_v63  ;;  %vm1974_vm3 = vweird.f32 %v1964_v63 }
 0xca0   :  { %v1953_v47 = vpop.xlane.xlu1 %1952 }
 0xca1   :  { %v1961_v50 = vmul.f32 %v1953_v47, %v6224_v14 }
 0xca3   :  { %v5926_v2 = vpop.eup %5925  ;;  %v1965_v5 = vadd.f32 1e-05, %v1961_v50 }
 0xca4   :  { %v1969_v35 = vmul.f32 %v5926_v2, %v1964_v63  ;;  %vm1975_vm2 = vweird.f32 %v5926_v2  ;;  %v2022_v63 = vperm.slane %v1923_v1, 0 }
 0xca5   :  { %5927 = vrsqrt.f32 %v1965_v5  ;;  %vm1976_vm6 = vmor %vm1974_vm3, %vm1975_vm2  ;;  %vm1984_vm10 = vweird.f32 %v1965_v5 }
 0xca6   :  { %v1970_v3 = vmul.f32 %v5926_v2, %v1969_v35 }
 0xca8   :  { %v1971_v51 = vmul.f32 0.5, %v1970_v3  ;;  %v1956_v4 = vpop.xlane.xlu2 %1955 }
 0xca9   :  { %v1962_v9 = vmul.f32 %v1956_v4, %v6224_v14 }
 0xcaa   :  { %v1972_v10 = vsub.f32 1.5, %v1971_v51 }
 0xcab   :  { %v5928_v15 = vpop.eup %5927  ;;  %v1966_v34 = vadd.f32 1e-05, %v1962_v9 }
 0xcac   :  { %v1973_v18 = vmul.f32 %v5926_v2, %v1972_v10  ;;  %v1979_v20 = vmul.f32 %v5928_v15, %v1965_v5  ;;  %vm1985_vm9 = vweird.f32 %v5928_v15 }
 0xcad   :  { %5929 = vrsqrt.f32 %v1966_v34  ;;  %vm1986_vm8 = vmor %vm1984_vm10, %vm1985_vm9  ;;  %vm1994_vm12 = vweird.f32 %v1966_v34 }
 0xcae   :  { %v1977_v27 = vsel %vm1976_vm6, %v5926_v2, %v1973_v18  ;;  %v1980_v28 = vmul.f32 %v5928_v15, %v1979_v20 }
 0xcaf   :  { %v2008_v36 = vmul.f32 %v1977_v27, %v1940_v17 }
 0xcb0   :  { %v1981_v11 = vmul.f32 0.5, %v1980_v28  ;;  %v1959_v16 = vpop.xlane.xlu0 %1958 }
 0xcb1   :  { %v2013_v12 = vmul.f32 %v2012_v21, %v2008_v36  ;;  %v1963_v53 = vmul.f32 %v1959_v16, %v6224_v14 }
 0xcb2   :  { %v1982_v0 = vsub.f32 1.5, %v1981_v11 }
 0xcb3   :  { %v5930_v32 = vpop.eup %5929  ;;  %v1967_v29 = vadd.f32 1e-05, %v1963_v53  ;;  %v2018_v23 = vadd.f32 %v2017_v13, %v2013_v12 }
 0xcb4   :  { %v1983_v33 = vmul.f32 %v5928_v15, %v1982_v0  ;;  %v1989_v44 = vmul.f32 %v5930_v32, %v1966_v34  ;;  %vm1995_vm11 = vweird.f32 %v5930_v32 }
 0xcb5   :  { %5931 = vrsqrt.f32 %v1967_v29  ;;  %5636 = vmatmul.msk.f32.vlgmr.msra.gmra.mxu3 %vm97_vm0, %v2018_v23  ;;  %vm1996_vm13 = vmor %vm1994_vm12, %vm1995_vm11  ;;  %vm2004_vm3 = vweird.f32 %v1967_v29 }
 0xcb6   :  { %v1990_v43 = vmul.f32 %v5930_v32, %v1989_v44  ;;  %v1987_v17 = vsel %vm1986_vm8, %v5928_v15, %v1983_v33 }
 0xcb7   :  { %v2009_v26 = vmul.f32 %v1987_v17, %v6770_v37 }
 0xcb8   :  { %v1991_v45 = vmul.f32 0.5, %v1990_v43 }
 0xcb9   :  { %v2014_v46 = vmul.f32 %v2012_v21, %v2009_v26 }
 0xcba   :  { %v1992_v41 = vsub.f32 1.5, %v1991_v45 }
 0xcbb   :  { %v5932_v40 = vpop.eup %5931  ;;  %v2019_v19 = vadd.f32 %v2017_v13, %v2014_v46 }
 0xcbc   :  { %v1993_v48 = vmul.f32 %v5930_v32, %v1992_v41  ;;  %v1999_v39 = vmul.f32 %v5932_v40, %v1967_v29  ;;  %vm2005_vm2 = vweird.f32 %v5932_v40 }
 0xcbd   :  { %5637 = vmatmul.msk.f32.gmra.mxu3 %vm97_vm0, %v2019_v19  ;;  %vm2006_vm6 = vmor %vm2004_vm3, %vm2005_vm2 }
 0xcbe   :  { %v2000_v49 = vmul.f32 %v5932_v40, %v1999_v39  ;;  %v1997_v54 = vsel %vm1996_vm13, %v5930_v32, %v1993_v48 }
 0xcbf   :  { %v2010_v22 = vmul.f32 %v1997_v54, %v6777_v6 }
 0xcc0   :  { %v2001_v56 = vmul.f32 0.5, %v2000_v49 }
 0xcc1   :  { %v2015_v25 = vmul.f32 %v2012_v21, %v2010_v22 }
 0xcc2   :  { %v2002_v24 = vsub.f32 1.5, %v2001_v56 }
 0xcc3   :  { %v2020_v37 = vadd.f32 %v2017_v13, %v2015_v25 }
 0xcc4   :  { %v2003_v57 = vmul.f32 %v5932_v40, %v2002_v24 }
 0xcc5   :  { %5638 = vmatmul.msk.f32.gmra.mxu3 %vm97_vm0, %v2020_v37 }
 0xcc6   :  { %v2007_v58 = vsel %vm2006_vm6, %v5932_v40, %v2003_v57 }
 0xcc7   :  { %v2011_v59 = vmul.f32 %v2007_v58, %v6784_v55 }
 0xcc9   :  { %v2016_v60 = vmul.f32 %v2012_v21, %v2011_v59 }
 0xccb   :  { %v2021_v61 = vadd.f32 %v2017_v13, %v2016_v60 }
 0xccd   :  { %5639 = vmatmul.msk.f32.gmra.mxu3 %vm97_vm0, %v2021_v61 }
 0xd38   :  { %v2052_v47 = vpop.f32.mrf.mxu3 }
 0xd39   :  { %v6800_v6 = vadd.f32 %v2052_v47, %v2022_v63 }
 0xd3b   :  { %2070 = vrot.lane.b32.xlu0 %v6800_v6, %s6175_s0 }
 0xd40   :  { %v2055_v50 = vpop.f32.mrf.mxu3 }
 0xd41   :  { %v6804_v2 = vadd.f32 %v2055_v50, %v2022_v63 }
 0xd43   :  { %2097 = vrot.lane.b32.xlu2 %v6804_v2, %s6175_s0  ;;  %v5823_v25 = vpack.i.bf16 %v6804_v2, %v6800_v6 }
 0xd48   :  { %v2058_v5 = vpop.f32.mrf.mxu3 }
 0xd49   :  { %v6812_v3 = vadd.f32 %v2058_v5, %v2022_v63 }
 0xd50   :  { %v2061_v35 = vpop.f32.mrf.mxu3 }
 0xd51   :  { %v6808_v55 = vadd.f32 %v2061_v35, %v2022_v63 }
 0xd53   :  { %2151 = vrot.lane.b32.xlu1 %v6808_v55, %s6175_s0 }
 0xd5b   :  { %2124 = vrot.lane.b32.xlu1 %v6812_v3, %s6175_s0 }
 0xd63   :  { %2359 = vrot.lane.b32.xlu1 %v6808_v55, %s6176_s2 }
 0xd6b   :  { %2488 = vrot.lane.b32.xlu1 %v6812_v3, %s6178_s1 }
 0xd73   :  { %2486 = vrot.lane.b32.xlu1 %v6812_v3, %s6179_s26 }
 0xd9d   :  { %v2098_v51 = vpop.permute.xlu2 %2097 }
 0xd9e   :  { %5642 = vmatpush.xpose.msk.msra.mxu2 %vm253_vm14, %v2098_v51 }
 0xda1   :  { %5643 = vmatmul.msk.f32.vlgmr.msra.gmra.mxu2 %vm253_vm14, %v6804_v2 }
 0xdad   :  { %v2071_v4 = vpop.permute.xlu0 %2070 }
 0xdae   :  { %5640 = vmatpush.xpose.msk.msrb.mxu1 %vm253_vm14, %v2071_v4 }
 0xdb1   :  { %5641 = vmatmul.msk.f32.vlgmr.msrb.gmra.mxu1 %vm253_vm14, %v6800_v6 }
 0xdc5   :  { %v2152_v9 = vpop.permute.xlu1 %2151 }
 0xdc6   :  { %5646 = vmatpush.xpose.msk.msrb.mxu0 %vm253_vm14, %v2152_v9 }
 0xdc9   :  { %5647 = vmatmul.msk.f32.vlgmr.msrb.gmra.mxu0 %vm253_vm14, %v6808_v55 }
 0xdcd   :  { %v2125_v10 = vpop.permute.xlu1 %2124 }
 0xdce   :  { %5644 = vmatpush.xpose.msk.msrb.mxu3 %vm253_vm14, %v2125_v10 }
 0xdd1   :  { %5645 = vmatmul.msk.f32.vlgmr.msrb.gmra.mxu3 %vm253_vm14, %v6812_v3 }
 0xdd5   :  { %v2360_v15 = vpop.permute.xlu1 %2359 }
 0xdd6   :  { %2380 = vmatpush.msra.mxu0 %v2360_v15 }
 0xddd   :  { %v2489_v34 = vpop.permute.xlu1 %2488 }
 0xdde   :  { %5660 = vmatpush.xpose.msk.msrb.mxu0 %vm253_vm14, %v2489_v34 }
 0xde5   :  { %v6858_v0 = vpop.permute.xlu1 %2486 }
 0xe24   :  { %v2120_v36 = vpop.f32.mrf.mxu2 }
 0xe25   :  { %v2178_v16 = vmul.f32 0.35355338, %v2120_v36 }
 0xe27   :  { %v2182_v12 = vsel %vm6364_vm7, -1e+30, %v2178_v16 }
 0xe28   :  { %v2188_v53 = vsel %vm253_vm14, %v2182_v12, -inf }
 0xe2e   :  { %v2093_v1 = vpop.f32.mrf.mxu1 }
 0xe2f   :  { %v2177_v18 = vmul.f32 0.35355338, %v2093_v1 }
 0xe31   :  { %v2181_v20 = vsel %vm6300_vm1, -1e+30, %v2177_v18 }
 0xe32   :  { %v2185_v21 = vsel %vm253_vm14, %v2181_v20, -inf }
 0xe33   :  { %2186 = vmax.xlane.f32.xlu1 %v2185_v21 }
 0xe46   :  { %v2174_v27 = vpop.f32.mrf.mxu0 }
 0xe47   :  { %v2180_v28 = vmul.f32 0.35355338, %v2174_v27 }
 0xe49   :  { %v2184_v13 = vsel %vm6316_vm4, -1e+30, %v2180_v28 }
 0xe4a   :  { %v2194_v11 = vsel %vm253_vm14, %v2184_v13, -inf }
 0xe4b   :  { %2195 = vmax.xlane.f32.xlu0 %v2194_v11 }
 0xe4c   :  { %2432 = vrot.lane.b32.xlu1 %v6800_v6, %s6178_s1 }
 0xe53   :  { %2189 = vmax.xlane.f32.xlu0 %v2188_v53 }
 0xe54   :  { %2514 = vrot.lane.b32.xlu1 %v6808_v55, %s6179_s26  ;;  %v2147_v46 = vpop.f32.mrf.mxu3 }
 0xe55   :  { %v2179_v48 = vmul.f32 0.35355338, %v2147_v46 }
 0xe57   :  { %v2183_v49 = vsel %vm6324_vm5, -1e+30, %v2179_v48 }
 0xe58   :  { %v2191_v54 = vsel %vm253_vm14, %v2183_v49, -inf }
 0xe5c   :  { %2698 = vrot.lane.b32.xlu1 %v6812_v3, %s6180_s27 }
 0xe64   :  { %2797 = vrot.lane.b32.xlu1 %v6800_v6, %s6181_s28 }
 0xe6c   :  { %2853 = vrot.lane.b32.xlu1 %v6812_v3, %s6181_s28 }
 0xe74   :  { %2795 = vrot.lane.b32.xlu1 %v6800_v6, %s6182_s29 }
 0xe7c   :  { %2851 = vrot.lane.b32.xlu1 %v6812_v3, %s6182_s29 }
 0xea6   :  { %v2187_v32 = vpop.xlane.xlu1 %2186 }
 0xea7   :  { %v2197_v29 = vsub.f32 %v2181_v20, %v2187_v32 }
 0xea9   :  { %v2201_v23 = vmul.f32 1.442695, %v2197_v29 }
 0xeab   :  { %5933 = vpow2.f32 %v2201_v23 }
 0xeb1   :  { %v6860_v33 = vpop.eup %5933 }
 0xeb2   :  { %v2209_v44 = vsel %vm253_vm14, %v6860_v33, 0.0 }
 0xeb3   :  { %2210 = vadd.xlane.f32.xlu0 %v2209_v44 }
 0xebe   :  { %v2196_v43 = vpop.xlane.xlu0 %2195  ;;  %v2433_v24 = vpop.permute.xlu1 %2432 }
 0xebf   :  { %v2200_v17 = vsub.f32 %v2184_v13, %v2196_v43 }
 0xec1   :  { %v2207_v26 = vmul.f32 1.442695, %v2200_v17 }
 0xec3   :  { %5935 = vpow2.f32 %v2207_v26 }
 0xec6   :  { %v2190_v45 = vpop.xlane.xlu0 %2189  ;;  %v6879_v57 = vpop.permute.xlu1 %2514 }
 0xec7   :  { %v2198_v40 = vsub.f32 %v2182_v12, %v2190_v45 }
 0xec9   :  { %v5936_v41 = vpop.eup %5935  ;;  %v2203_v39 = vmul.f32 1.442695, %v2198_v40 }
 0xeca   :  { %v2218_v19 = vsel %vm253_vm14, %v5936_v41, 0.0 }
 0xecb   :  { %2219 = vadd.xlane.f32.xlu2 %v2218_v19  ;;  %5937 = vpow2.f32 %v2203_v39  ;;  %v1911_v19 = vld [vmem:[#allocation5 + $0xe8] sm:$0xff] }
 0xece   :  { %v6881_v5 = vpop.permute.xlu1 %2698 }
 0xed1   :  { %v6868_v22 = vpop.eup %5937 }
 0xed2   :  { %v2212_v56 = vsel %vm253_vm14, %v6868_v22, 0.0 }
 0xed3   :  { %2192 = vmax.xlane.f32.xlu2 %v2191_v54 }
 0xed6   :  { %v6885_v16 = vpop.permute.xlu1 %2797 }
 0xedb   :  { %2213 = vadd.xlane.f32.xlu2 %v2212_v56 }
 0xef3   :  { %5824 = vrot.lane.b32.xlu2 %v5823_v25, %s6176_s2 }
 0xefb   :  { %2430 = vrot.lane.b32.xlu2 %v6800_v6, %s6179_s26 }
 0xf03   :  { %2458 = vrot.lane.b32.xlu2 %v6804_v2, %s6179_s26 }
 0xf26   :  { %v2211_v37 = vpop.xlane.xlu0 %2210 }
 0xf27   :  { %5939 = vrcp.f32 %v2211_v37  ;;  %v2232_v28 = vand.u32 2147483648, %v2211_v37  ;;  %vm2226_vm13 = vweird.f32 %v2211_v37  ;;  %v2230_v36 = vand.u32 2147483647, %v2211_v37 }
 0xf29   :  { %v2233_v29 = vor.u32 1.1754944e-38, %v2232_v28  ;;  %vm2231_vm3 = vcmp.eq.f32.partialorder %v2230_v36, 8.507059e+37 }
 0xf2d   :  { %v5940_v59 = vpop.eup %5939 }
 0xf2e   :  { %v2222_v60 = vmul.f32 %v5940_v59, %v2211_v37  ;;  %vm2227_vm11 = vweird.f32 %v5940_v59 }
 0xf2f   :  { %vm2228_vm2 = vmor %vm2226_vm13, %vm2227_vm11 }
 0xf30   :  { %v2223_v63 = vsub.f32 1.0, %v2222_v60 }
 0xf32   :  { %v2224_v9 = vmul.f32 %v5940_v59, %v2223_v63 }
 0xf34   :  { %v2225_v18 = vadd.f32 %v5940_v59, %v2224_v9 }
 0xf36   :  { %v2229_v53 = vsel %vm2228_vm2, %v5940_v59, %v2225_v18 }
 0xf37   :  { %v2234_v44 = vsel %vm2231_vm3, %v2233_v29, %v2229_v53 }
 0xf38   :  { %v2277_v40 = vmul.f32 %v6860_v33, %v2234_v44 }
 0xf3e   :  { %v2220_v58 = vpop.xlane.xlu2 %2219 }
 0xf3f   :  { %5941 = vrcp.f32 %v2220_v58  ;;  %v2274_v15 = vand.u32 2147483648, %v2220_v58  ;;  %v2272_v34 = vand.u32 2147483647, %v2220_v58  ;;  %vm2268_vm10 = vweird.f32 %v2220_v58 }
 0xf41   :  { %v2275_v21 = vor.u32 1.1754944e-38, %v2274_v15  ;;  %vm2273_vm12 = vcmp.eq.f32.partialorder %v2272_v34, 8.507059e+37 }
 0xf45   :  { %v5942_v61 = vpop.eup %5941 }
 0xf46   :  { %v2264_v47 = vmul.f32 %v5942_v61, %v2220_v58  ;;  %v2193_v50 = vpop.xlane.xlu2 %2192  ;;  %vm2269_vm9 = vweird.f32 %v5942_v61 }
 0xf47   :  { %v2199_v35 = vsub.f32 %v2183_v49, %v2193_v50  ;;  %vm2270_vm8 = vmor %vm2268_vm10, %vm2269_vm9  ;;  %v2854_v49 = vpop.permute.xlu1 %2853 }
 0xf48   :  { %v2265_v51 = vsub.f32 1.0, %v2264_v47 }
 0xf49   :  { %v2205_v4 = vmul.f32 1.442695, %v2199_v35 }
 0xf4a   :  { %v2266_v10 = vmul.f32 %v5942_v61, %v2265_v51 }
 0xf4b   :  { %5943 = vpow2.f32 %v2205_v4 }
 0xf4c   :  { %v2267_v1 = vadd.f32 %v5942_v61, %v2266_v10 }
 0xf4e   :  { %v2271_v20 = vsel %vm2270_vm8, %v5942_v61, %v2267_v1  ;;  %v2214_v27 = vpop.xlane.xlu2 %2213 }
 0xf4f   :  { %5945 = vrcp.f32 %v2214_v27  ;;  %v2276_v13 = vsel %vm2273_vm12, %v2275_v21, %v2271_v20  ;;  %v2244_v39 = vand.u32 2147483647, %v2214_v27  ;;  %vm2240_vm9 = vweird.f32 %v2214_v27 }
 0xf50   :  { %v2280_v12 = vmul.f32 %v5936_v41, %v2276_v13  ;;  %v2246_v41 = vand.u32 2147483648, %v2214_v27 }
 0xf51   :  { %v6883_v11 = vpop.eup %5943  ;;  %vm2245_vm8 = vcmp.eq.f32.partialorder %v2244_v39, 8.507059e+37 }
 0xf52   :  { %v2215_v32 = vsel %vm253_vm14, %v6883_v11, 0.0  ;;  %5651 = vmatmul.msk.f32.vlgmr.msra.gmra.mxu0 %vm253_vm14, %v2280_v12  ;;  %v2247_v33 = vor.u32 1.1754944e-38, %v2246_v41 }
 0xf53   :  { %2216 = vadd.xlane.f32.xlu0 %v2215_v32 }
 0xf55   :  { %v5946_v23 = vpop.eup %5945 }
 0xf56   :  { %v2236_v43 = vmul.f32 %v5946_v23, %v2214_v27  ;;  %v5825_v17 = vpop.permute.xlu2 %5824  ;;  %vm2241_vm6 = vweird.f32 %v5946_v23 }
 0xf57   :  { %v5827_v26 = vunpack.i.h.bf16 %v5825_v17  ;;  %v5826_v45 = vunpack.i.l.bf16 %v5825_v17  ;;  %vm2242_vm10 = vmor %vm2240_vm9, %vm2241_vm6 }
 0xf58   :  { %v2237_v46 = vsub.f32 1.0, %v2236_v43 }
 0xf59   :  { %2302 = vmatpush.msra.mxu1 %v5826_v45  ;;  %2328 = vmatpush.msrb.mxu2 %v5827_v26 }
 0xf5a   :  { %v2238_v48 = vmul.f32 %v5946_v23, %v2237_v46  ;;  %5648 = vmatmul.msk.f32.vlgmr.msra.gmra.mxu1 %vm253_vm14, %v2277_v40  ;;  %5661 = vmatmul.msk.f32.vlgmr.msrb.gmra.mxu0 %vm253_vm14, %v6858_v0 }
 0xf5b   :  { %5656 = vmatpush.xpose.msk.msra.mxu2 %vm253_vm14, %v2433_v24  ;;  %2412 = vmatpush.msrb.mxu1 %v1911_v19 }
 0xf5c   :  { %v2239_v54 = vadd.f32 %v5946_v23, %v2238_v48 }
 0xf5d   :  { %5676 = vmatpush.xpose.msk.msra.mxu1 %vm253_vm14, %v2854_v49 }
 0xf5e   :  { %v2243_v56 = vsel %vm2242_vm10, %v5946_v23, %v2239_v54  ;;  %v2431_v24 = vpop.permute.xlu2 %2430 }
 0xf5f   :  { %v2248_v25 = vsel %vm2245_vm8, %v2247_v33, %v2243_v56 }
 0xf60   :  { %v2278_v37 = vmul.f32 %v6868_v22, %v2248_v25 }
 0xf62   :  { %5649 = vmatmul.msk.f32.vlgmr.msrb.gmra.mxu2 %vm253_vm14, %v2278_v37 }
 0xf66   :  { %v2459_v27 = vpop.permute.xlu2 %2458 }
 0xf67   :  { %2333 = vrot.lane.b32.xlu0 %v6812_v3, %s6176_s2 }
 0xf6a   :  { %5657 = vmatmul.msk.f32.vlgmr.msra.gmra.mxu2 %vm253_vm14, %v2431_v24 }
 0xf6f   :  { %2460 = vrot.lane.b32.xlu0 %v6804_v2, %s6178_s1 }
 0xf77   :  { %2516 = vrot.lane.b32.xlu0 %v6808_v55, %s6178_s1 }
 0xfc6   :  { %v2217_v0 = vpop.xlane.xlu0 %2216 }
 0xfc7   :  { %5947 = vrcp.f32 %v2217_v0  ;;  %v2260_v61 = vand.u32 2147483648, %v2217_v0  ;;  %v2258_v47 = vand.u32 2147483647, %v2217_v0  ;;  %vm2254_vm12 = vweird.f32 %v2217_v0 }
 0xfc9   :  { %v2261_v35 = vor.u32 1.1754944e-38, %v2260_v61  ;;  %vm2259_vm2 = vcmp.eq.f32.partialorder %v2258_v47, 8.507059e+37 }
 0xfcd   :  { %v5948_v58 = vpop.eup %5947 }
 0xfce   :  { %v2250_v59 = vmul.f32 %v5948_v58, %v2217_v0  ;;  %vm2255_vm11 = vweird.f32 %v5948_v58 }
 0xfcf   :  { %v2382_v22 = vpop.f32.mrf.mxu0  ;;  %vm2256_vm13 = vmor %vm2254_vm12, %vm2255_vm11 }
 0xfd0   :  { %v2251_v60 = vsub.f32 1.0, %v2250_v59 }
 0xfd2   :  { %v2252_v63 = vmul.f32 %v5948_v58, %v2251_v60 }
 0xfd4   :  { %v2253_v50 = vadd.f32 %v5948_v58, %v2252_v63 }
 0xfd6   :  { %v2257_v51 = vsel %vm2256_vm13, %v5948_v58, %v2253_v50 }
 0xfd7   :  { %v2304_v4 = vpop.f32.mrf.mxu1  ;;  %v2262_v9 = vsel %vm2259_vm2, %v2261_v35, %v2257_v51  ;;  %v2511_v10 = vpop.f32.mrf.mxu0 }
 0xfd8   :  { %5652 = vmatmul.msk.f32.vlgmr.msrb.gmra.mxu1 %vm253_vm14, %v2304_v4  ;;  %v2279_v15 = vmul.f32 %v6883_v11, %v2262_v9  ;;  %v2544_v34 = vmul.f32 0.35355338, %v2511_v10 }
 0xfd9   :  { %v2334_v1 = vpop.permute.xlu0 %2333 }
 0xfda   :  { %2354 = vmatpush.msra.mxu3 %v2334_v1  ;;  %v2548_v18 = vsel %vm6324_vm5, -1e+30, %v2544_v34 }
 0xfdb   :  { %5650 = vmatmul.msk.f32.vlgmr.msra.gmra.mxu3 %vm253_vm14, %v2279_v15  ;;  %v2556_v20 = vsel %vm253_vm14, %v2548_v18, -inf }
 0xfdc   :  { %2557 = vmax.xlane.f32.xlu2 %v2556_v20 }
 0xfe1   :  { %v2461_v21 = vpop.permute.xlu0 %2460 }
 0xfe2   :  { %5658 = vmatpush.xpose.msk.msrb.mxu3 %vm253_vm14, %v2461_v21 }
 0xfe5   :  { %v2330_v28 = vpop.f32.mrf.mxu2  ;;  %5659 = vmatmul.msk.f32.vlgmr.msrb.gmra.mxu3 %vm253_vm14, %v2459_v27 }
 0xfe6   :  { %5653 = vmatmul.msk.f32.gmra.mxu1 %vm253_vm14, %v2330_v28 }
 0xfe9   :  { %v2517_v36 = vpop.permute.xlu0 %2516 }
 0xfea   :  { %5662 = vmatpush.xpose.msk.msrb.mxu2 %vm253_vm14, %v2517_v36 }
 0xfed   :  { %v2455_v13 = vpop.f32.mrf.mxu2  ;;  %5663 = vmatmul.msk.f32.vlgmr.msrb.gmra.mxu2 %vm253_vm14, %v6879_v57 }
 0xfee   :  { %2719 = vmatpush.msra.mxu2 %v6881_v5  ;;  %v2542_v11 = vmul.f32 0.35355338, %v2455_v13  ;;  %v2796_v5 = vpop.permute.xlu1 %2795 }
 0xff0   :  { %5672 = vmatpush.xpose.msk.msrb.mxu2 %vm253_vm14, %v6885_v16  ;;  %v2546_v12 = vsel %vm6300_vm1, -1e+30, %v2542_v11 }
 0xff1   :  { %v2550_v53 = vsel %vm253_vm14, %v2546_v12, -inf }
 0xff2   :  { %2551 = vmax.xlane.f32.xlu1 %v2550_v53 }
 0xff4   :  { %2881 = vrot.lane.b32.xlu2 %v6808_v55, %s6181_s28 }
 0xff6   :  { %v2852_v43 = vpop.permute.xlu1 %2851 }
0x104f   :  { %v2558_v32 = vpop.xlane.xlu2 %2557 }
0x1050   :  { %v2564_v29 = vsub.f32 %v2548_v18, %v2558_v32 }
0x1052   :  { %v2570_v23 = vmul.f32 1.442695, %v2564_v29 }
0x1054   :  { %5949 = vpow2.f32 %v2570_v23 }
0x1057   :  { %v2882_v63 = vpop.permute.xlu2 %2881 }
0x105a   :  { %v5950_v44 = vpop.eup %5949 }
0x105b   :  { %v2580_v57 = vsel %vm253_vm14, %v5950_v44, 0.0 }
0x105c   :  { %2581 = vadd.xlane.f32.xlu0 %v2580_v57 }
0x105e   :  { %v2356_v16 = vpop.f32.mrf.mxu3 }
0x105f   :  { %5654 = vmatmul.msk.f32.gmra.mxu1 %vm253_vm14, %v2356_v16 }
0x1065   :  { %v2552_v17 = vpop.xlane.xlu1 %2551 }
0x1066   :  { %v2562_v26 = vsub.f32 %v2546_v12, %v2552_v17 }
0x1067   :  { %5655 = vmatmul.msk.f32.gmra.mxu1 %vm253_vm14, %v2382_v22 }
0x1068   :  { %v2566_v45 = vmul.f32 1.442695, %v2562_v26  ;;  %v2483_v49 = vpop.f32.mrf.mxu3 }
0x1069   :  { %v2543_v54 = vmul.f32 0.35355338, %v2483_v49 }
0x106a   :  { %5951 = vpow2.f32 %v2566_v45  ;;  %v6967_v45 = vpop.f32.mrf.mxu1 }
0x106b   :  { %v2547_v33 = vsel %vm6364_vm7, -1e+30, %v2543_v54 }
0x106c   :  { %v2553_v56 = vsel %vm253_vm14, %v2547_v33, -inf }
0x106f   :  { %5677 = vmatmul.msk.f32.vlgmr.msra.gmra.mxu1 %vm253_vm14, %v2852_v43 }
0x1070   :  { %v6929_v46 = vpop.eup %5951  ;;  %v2539_v40 = vpop.f32.mrf.mxu2  ;;  %2879 = vrot.lane.b32.xlu0 %v6808_v55, %s6182_s29 }
0x1071   :  { %v2545_v19 = vmul.f32 0.35355338, %v2539_v40  ;;  %v2574_v41 = vsel %vm253_vm14, %v6929_v46, 0.0 }
0x1072   :  { %2575 = vadd.xlane.f32.xlu1 %v2574_v41 }
0x1073   :  { %v2549_v48 = vsel %vm6316_vm4, -1e+30, %v2545_v19 }
0x1074   :  { %v2559_v39 = vsel %vm253_vm14, %v2549_v48, -inf }
0x1075   :  { %2560 = vmax.xlane.f32.xlu2 %v2559_v39 }
0x108b   :  { %2646 = vrot.lane.b32.xlu1 %v6800_v6, %s6180_s27 }
0x108d   :  { %2672 = vrot.lane.b32.xlu2 %v6804_v2, %s6180_s27 }
0x1095   :  { %2823 = vrot.lane.b32.xlu2 %v6804_v2, %s6182_s29 }
0x109a   :  { %2554 = vmax.xlane.f32.xlu0 %v2553_v56 }
0x10ae   :  { %2724 = vrot.lane.b32.xlu0 %v6808_v55, %s6180_s27 }
0x10b6   :  { %3063 = vrot.lane.b32.xlu0 %v6812_v3, %s6183_s30 }
0x10cf   :  { %v2582_v25 = vpop.xlane.xlu0 %2581 }
0x10d0   :  { %5953 = vrcp.f32 %v2582_v25  ;;  %v2625_v58 = vand.u32 2147483648, %v2582_v25  ;;  %v2623_v60 = vand.u32 2147483647, %v2582_v25  ;;  %vm2619_vm6 = vweird.f32 %v2582_v25 }
0x10d2   :  { %v2626_v61 = vor.u32 1.1754944e-38, %v2625_v58  ;;  %vm2624_vm10 = vcmp.eq.f32.partialorder %v2623_v60, 8.507059e+37 }
0x10d6   :  { %v5954_v37 = vpop.eup %5953 }
0x10d7   :  { %v2615_v24 = vmul.f32 %v5954_v37, %v2582_v25  ;;  %vm2620_vm3 = vweird.f32 %v5954_v37 }
0x10d8   :  { %vm2621_vm9 = vmor %vm2619_vm6, %vm2620_vm3 }
0x10d9   :  { %v2616_v0 = vsub.f32 1.0, %v2615_v24 }
0x10db   :  { %v2617_v59 = vmul.f32 %v5954_v37, %v2616_v0 }
0x10dd   :  { %v2618_v22 = vadd.f32 %v5954_v37, %v2617_v59 }
0x10df   :  { %v2622_v47 = vsel %vm2621_vm9, %v5954_v37, %v2618_v22 }
0x10e0   :  { %v2627_v50 = vsel %vm2624_vm10, %v2626_v61, %v2622_v47 }
0x10e1   :  { %v2644_v35 = vmul.f32 %v5950_v44, %v2627_v50 }
0x10e2   :  { %v2880_v27 = vpop.permute.xlu0 %2879 }
0x10e3   :  { %5666 = vmatmul.msk.f32.vlgmr.msra.gmra.mxu2 %vm253_vm14, %v2644_v35 }
0x10e4   :  { %5678 = vmatpush.xpose.msk.msra.mxu2 %vm253_vm14, %v2882_v63 }
0x10e5   :  { %v2576_v51 = vpop.xlane.xlu1 %2575 }
0x10e6   :  { %5955 = vrcp.f32 %v2576_v51  ;;  %v2597_v36 = vand.u32 2147483648, %v2576_v51  ;;  %vm2591_vm11 = vweird.f32 %v2576_v51  ;;  %v2595_v11 = vand.u32 2147483647, %v2576_v51 }
0x10e8   :  { %v2561_v4 = vpop.xlane.xlu2 %2560  ;;  %v2598_v53 = vor.u32 1.1754944e-38, %v2597_v36  ;;  %vm2596_vm13 = vcmp.eq.f32.partialorder %v2595_v11, 8.507059e+37 }
0x10e9   :  { %v2565_v9 = vsub.f32 %v2549_v48, %v2561_v4 }
0x10eb   :  { %v2572_v10 = vmul.f32 1.442695, %v2565_v9  ;;  %5673 = vmatmul.msk.f32.vlgmr.msrb.gmra.mxu2 %vm253_vm14, %v2796_v5 }
0x10ec   :  { %v5956_v15 = vpop.eup %5955 }
0x10ed   :  { %v2587_v34 = vmul.f32 %v5956_v15, %v2576_v51  ;;  %5957 = vpow2.f32 %v2572_v10  ;;  %vm2592_vm8 = vweird.f32 %v5956_v15 }
0x10ee   :  { %vm2593_vm12 = vmor %vm2591_vm11, %vm2592_vm8 }
0x10ef   :  { %v2588_v1 = vsub.f32 1.0, %v2587_v34  ;;  %v1912_v34 = vld [vmem:[#allocation5 + $0xf0] sm:$0xff] }
0x10f0   :  { %v2673_v18 = vpop.permute.xlu2 %2672 }
0x10f1   :  { %v2589_v20 = vmul.f32 %v5956_v15, %v2588_v1  ;;  %2693 = vmatpush.msra.mxu0 %v2673_v18 }
0x10f3   :  { %v6954_v21 = vpop.eup %5957  ;;  %v2590_v28 = vadd.f32 %v5956_v15, %v2589_v20  ;;  %5679 = vmatmul.msk.f32.vlgmr.msra.gmra.mxu2 %vm253_vm14, %v2880_v27  ;;  %2777 = vmatpush.msrb.mxu0 %v1912_v34 }
0x10f4   :  { %v2583_v13 = vsel %vm253_vm14, %v6954_v21, 0.0 }
0x10f5   :  { %2584 = vadd.xlane.f32.xlu0 %v2583_v13  ;;  %v2594_v12 = vsel %vm2593_vm12, %v5956_v15, %v2590_v28 }
0x10f6   :  { %v2599_v32 = vsel %vm2596_vm13, %v2598_v53, %v2594_v12 }
0x10f7   :  { %v2642_v5 = vmul.f32 %v6929_v46, %v2599_v32  ;;  %v6971_v46 = vpop.f32.mrf.mxu1 }
0x10fd   :  { %v2647_v29 = vpop.permute.xlu1 %2646 }
0x10fe   :  { %2667 = vmatpush.msra.mxu3 %v2647_v29 }
0x10ff   :  { %5664 = vmatmul.msk.f32.vlgmr.msra.gmra.mxu3 %vm253_vm14, %v2642_v5  ;;  %v6973_v40 = vpop.f32.mrf.mxu1  ;;  %v2824_v5 = vpop.permute.xlu2 %2823 }
0x1107   :  { %v6975_v19 = vpop.f32.mrf.mxu1 }
0x1109   :  { %3160 = vrot.lane.b32.xlu0 %v6800_v6, %s6185_s5 }
0x110d   :  { %v2555_v23 = vpop.xlane.xlu0 %2554 }
0x110e   :  { %v2563_v44 = vsub.f32 %v2547_v33, %v2555_v23 }
0x110f   :  { %v2876_v41 = vpop.f32.mrf.mxu1 }
0x1110   :  { %v2568_v57 = vmul.f32 1.442695, %v2563_v44  ;;  %v2909_v48 = vmul.f32 0.35355338, %v2876_v41 }
0x1112   :  { %5959 = vpow2.f32 %v2568_v57  ;;  %v6979_v39 = vsel %vm6324_vm5, -1e+30, %v2909_v48 }
0x1113   :  { %v2921_v49 = vsel %vm253_vm14, %v6979_v39, -inf }
0x1118   :  { %v6963_v43 = vpop.eup %5959 }
0x1119   :  { %v2577_v16 = vsel %vm253_vm14, %v6963_v43, 0.0 }
0x111a   :  { %2578 = vadd.xlane.f32.xlu1 %v2577_v16 }
0x1120   :  { %v2725_v17 = vpop.permute.xlu0 %2724 }
0x1121   :  { %2745 = vmatpush.msrb.mxu3 %v2725_v17 }
0x1128   :  { %v3064_v26 = vpop.permute.xlu0 %3063 }
0x1129   :  { %3084 = vmatpush.msrb.mxu2 %v3064_v26 }
0x1133   :  { %2825 = vrot.lane.b32.xlu1 %v6804_v2, %s6181_s28 }
0x115d   :  { %2922 = vmax.xlane.f32.xlu1 %v2921_v49 }
0x1166   :  { %v6983_v54 = vpop.f32.mrf.mxu2 }
0x1168   :  { %v2585_v33 = vpop.xlane.xlu0 %2584 }
0x1169   :  { %5961 = vrcp.f32 %v2585_v33  ;;  %v2639_v59 = vand.u32 2147483648, %v2585_v33  ;;  %v2637_v61 = vand.u32 2147483647, %v2585_v33  ;;  %vm2633_vm3 = vweird.f32 %v2585_v33 }
0x116b   :  { %v2640_v47 = vor.u32 1.1754944e-38, %v2639_v59  ;;  %vm2638_vm9 = vcmp.eq.f32.partialorder %v2637_v61, 8.507059e+37 }
0x116e   :  { %v2820_v25 = vpop.f32.mrf.mxu2 }
0x116f   :  { %v5962_v56 = vpop.eup %5961  ;;  %v2907_v24 = vmul.f32 0.35355338, %v2820_v25 }
0x1170   :  { %v2629_v37 = vmul.f32 %v5962_v56, %v2585_v33  ;;  %vm2634_vm2 = vweird.f32 %v5962_v56 }
0x1171   :  { %v2911_v58 = vsel %vm6300_vm1, -1e+30, %v2907_v24  ;;  %vm2635_vm6 = vmor %vm2633_vm3, %vm2634_vm2 }
0x1172   :  { %v2630_v0 = vsub.f32 1.0, %v2629_v37  ;;  %v2915_v60 = vsel %vm253_vm14, %v2911_v58, -inf }
0x1173   :  { %2916 = vmax.xlane.f32.xlu2 %v2915_v60 }
0x1174   :  { %v2631_v22 = vmul.f32 %v5962_v56, %v2630_v0 }
0x1176   :  { %v2632_v63 = vadd.f32 %v5962_v56, %v2631_v22  ;;  %v2904_v50 = vpop.f32.mrf.mxu2  ;;  %3011 = vrot.lane.b32.xlu1 %v6800_v6, %s6183_s30 }
0x1177   :  { %v2910_v51 = vmul.f32 0.35355338, %v2904_v50 }
0x1178   :  { %v2636_v35 = vsel %vm2635_vm6, %v5962_v56, %v2632_v63 }
0x1179   :  { %v2641_v4 = vsel %vm2638_vm9, %v2640_v47, %v2636_v35  ;;  %v2914_v9 = vsel %vm6316_vm4, -1e+30, %v2910_v51 }
0x117a   :  { %v2645_v10 = vmul.f32 %v6954_v21, %v2641_v4  ;;  %v2924_v15 = vsel %vm253_vm14, %v2914_v9, -inf }
0x117b   :  { %2925 = vmax.xlane.f32.xlu0 %v2924_v15 }
0x117c   :  { %5667 = vmatmul.msk.f32.vlgmr.msrb.gmra.mxu3 %vm253_vm14, %v2645_v10 }
0x1182   :  { %v2669_v23 = vpop.f32.mrf.mxu3 }
0x118b   :  { %3162 = vrot.lane.b32.xlu2 %v6800_v6, %s6184_s4 }
0x118d   :  { %v2579_v1 = vpop.xlane.xlu1 %2578 }
0x118e   :  { %5963 = vrcp.f32 %v2579_v1  ;;  %v2611_v28 = vand.u32 2147483648, %v2579_v1  ;;  %v2609_v36 = vand.u32 2147483647, %v2579_v1  ;;  %vm2605_vm8 = vweird.f32 %v2579_v1 }
0x118f   :  { %3188 = vrot.lane.b32.xlu0 %v6804_v2, %s6185_s5 }
0x1190   :  { %v2612_v11 = vor.u32 1.1754944e-38, %v2611_v28  ;;  %vm2610_vm12 = vcmp.eq.f32.partialorder %v2609_v36, 8.507059e+37 }
0x1194   :  { %v5964_v18 = vpop.eup %5963 }
0x1195   :  { %v2601_v20 = vmul.f32 %v5964_v18, %v2579_v1  ;;  %vm2606_vm10 = vweird.f32 %v5964_v18 }
0x1196   :  { %vm2607_vm11 = vmor %vm2605_vm8, %vm2606_vm10 }
0x1197   :  { %v2602_v27 = vsub.f32 1.0, %v2601_v20 }
0x1199   :  { %v2603_v21 = vmul.f32 %v5964_v18, %v2602_v27 }
0x119b   :  { %v2604_v13 = vadd.f32 %v5964_v18, %v2603_v21 }
0x119d   :  { %v2608_v12 = vsel %vm2607_vm11, %v5964_v18, %v2604_v13 }
0x119e   :  { %v2613_v53 = vsel %vm2610_vm12, %v2612_v11, %v2608_v12 }
0x119f   :  { %v2643_v32 = vmul.f32 %v6963_v43, %v2613_v53  ;;  %v3161_v43 = vpop.permute.xlu0 %3160 }
0x11a1   :  { %5665 = vmatmul.msk.f32.vlgmr.msra.gmra.mxu0 %vm253_vm14, %v2643_v32 }
0x11a5   :  { %v2826_v29 = vpop.permute.xlu1 %2825 }
0x11a6   :  { %5674 = vmatpush.xpose.msk.msra.mxu3 %vm253_vm14, %v2826_v29 }
0x11a9   :  { %5668 = vmatmul.msk.f32.vlgmr.msrb.gmra.mxu0 %vm253_vm14, %v2669_v23  ;;  %5675 = vmatmul.msk.f32.vlgmr.msra.gmra.mxu3 %vm253_vm14, %v2824_v5 }
0x11d0   :  { %v2923_v44 = vpop.xlane.xlu1 %2922 }
0x11d1   :  { %v2929_v57 = vsub.f32 %v6979_v39, %v2923_v44 }
0x11d3   :  { %v2935_v16 = vmul.f32 1.442695, %v2929_v57 }
0x11d5   :  { %5965 = vpow2.f32 %v2935_v16 }
0x11db   :  { %v5966_v17 = vpop.eup %5965 }
0x11dc   :  { %v2945_v26 = vsel %vm253_vm14, %v5966_v17, 0.0 }
0x11dd   :  { %2946 = vadd.xlane.f32.xlu1 %v2945_v26 }
0x11e6   :  { %v2917_v41 = vpop.xlane.xlu2 %2916 }
0x11e7   :  { %v2927_v48 = vsub.f32 %v2911_v58, %v2917_v41 }
0x11e8   :  { %v3012_v49 = vpop.permute.xlu1 %3011 }
0x11e9   :  { %v2931_v33 = vmul.f32 1.442695, %v2927_v48  ;;  %3032 = vmatpush.msrb.mxu3 %v3012_v49 }
0x11eb   :  { %5967 = vpow2.f32 %v2931_v33 }
0x11ee   :  { %v2926_v56 = vpop.xlane.xlu0 %2925  ;;  %v3163_v25 = vpop.permute.xlu2 %3162 }
0x11ef   :  { %v2930_v37 = vsub.f32 %v2914_v9, %v2926_v56  ;;  %5688 = vmatpush.xpose.msk.msra.mxu2 %vm253_vm14, %v3163_v25 }
0x11f1   :  { %v7007_v24 = vpop.eup %5967  ;;  %v2937_v39 = vmul.f32 1.442695, %v2930_v37 }
0x11f2   :  { %v2939_v0 = vsel %vm253_vm14, %v7007_v24, 0.0 }
0x11f3   :  { %5969 = vpow2.f32 %v2937_v39  ;;  %2940 = vadd.xlane.f32.xlu2 %v2939_v0 }
0x11f6   :  { %3089 = vrot.lane.b32.xlu1 %v6808_v55, %s6183_s30 }
0x11f9   :  { %v7013_v58 = vpop.eup %5969 }
0x11fa   :  { %v2948_v59 = vsel %vm253_vm14, %v7013_v58, 0.0 }
0x11fb   :  { %2949 = vadd.xlane.f32.xlu0 %v2948_v59 }
0x11fe   :  { %3218 = vrot.lane.b32.xlu1 %v6812_v3, %s6184_s4 }
0x11ff   :  { %v2747_v22 = vpop.f32.mrf.mxu3 }
0x1201   :  { %v3189_v28 = vpop.permute.xlu0 %3188 }
0x1206   :  { %3244 = vrot.lane.b32.xlu1 %v6808_v55, %s6185_s5 }
0x120b   :  { %3190 = vrot.lane.b32.xlu2 %v6804_v2, %s6184_s4 }
0x120f   :  { %3216 = vrot.lane.b32.xlu0 %v6812_v3, %s6185_s5 }
0x1213   :  { %3246 = vrot.lane.b32.xlu2 %v6808_v55, %s6184_s4 }
0x121e   :  { %v2695_v60 = vpop.f32.mrf.mxu0 }
0x121f   :  { %5669 = vmatmul.msk.f32.gmra.mxu0 %vm253_vm14, %v2695_v60 }
0x1227   :  { %5670 = vmatmul.msk.f32.gmra.mxu0 %vm253_vm14, %v6983_v54 }
0x122c   :  { %v2848_v61 = vpop.f32.mrf.mxu3 }
0x122d   :  { %v2908_v63 = vmul.f32 0.35355338, %v2848_v61 }
0x122f   :  { %5671 = vmatmul.msk.f32.gmra.mxu0 %vm253_vm14, %v2747_v22  ;;  %v7033_v47 = vsel %vm6364_vm7, -1e+30, %v2908_v63  ;;  %v7049_v63 = vpop.f32.mrf.mxu0 }
0x1230   :  { %v2918_v50 = vsel %vm253_vm14, %v7033_v47, -inf }
0x1239   :  { %2919 = vmax.xlane.f32.xlu0 %v2918_v50 }
0x1250   :  { %v2947_v35 = vpop.xlane.xlu1 %2946 }
0x1251   :  { %5971 = vrcp.f32 %v2947_v35  ;;  %v2990_v10 = vand.u32 2147483648, %v2947_v35  ;;  %v2988_v54 = vand.u32 2147483647, %v2947_v35  ;;  %vm2984_vm2 = vweird.f32 %v2947_v35 }
0x1253   :  { %v2991_v1 = vor.u32 1.1754944e-38, %v2990_v10  ;;  %vm2989_vm6 = vcmp.eq.f32.partialorder %v2988_v54, 8.507059e+37 }
0x1257   :  { %v5972_v51 = vpop.eup %5971 }
0x1258   :  { %v2980_v4 = vmul.f32 %v5972_v51, %v2947_v35  ;;  %vm2985_vm13 = vweird.f32 %v5972_v51 }
0x1259   :  { %vm2986_vm3 = vmor %vm2984_vm2, %vm2985_vm13 }
0x125a   :  { %v2981_v9 = vsub.f32 1.0, %v2980_v4 }
0x125c   :  { %v2982_v15 = vmul.f32 %v5972_v51, %v2981_v9 }
0x125e   :  { %v2983_v34 = vadd.f32 %v5972_v51, %v2982_v15 }
0x1260   :  { %v2987_v18 = vsel %vm2986_vm3, %v5972_v51, %v2983_v34 }
0x1261   :  { %v2992_v20 = vsel %vm2989_vm6, %v2991_v1, %v2987_v18 }
0x1262   :  { %v3009_v27 = vmul.f32 %v5966_v17, %v2992_v20 }
0x1264   :  { %5682 = vmatmul.msk.f32.vlgmr.msrb.gmra.mxu2 %vm253_vm14, %v3009_v27 }
0x1266   :  { %v2941_v21 = vpop.xlane.xlu2 %2940 }
0x1267   :  { %5973 = vrcp.f32 %v2941_v21  ;;  %v2962_v5 = vand.u32 2147483648, %v2941_v21  ;;  %v2960_v44 = vand.u32 2147483647, %v2941_v21  ;;  %vm2956_vm10 = vweird.f32 %v2941_v21 }
0x1268   :  { %v3090_v36 = vpop.permute.xlu1 %3089 }
0x1269   :  { %3110 = vmatpush.msra.mxu3 %v3090_v36  ;;  %v2963_v17 = vor.u32 1.1754944e-38, %v2962_v5  ;;  %vm2961_vm11 = vcmp.eq.f32.partialorder %v2960_v44, 8.507059e+37 }
0x126c   :  { %5689 = vmatmul.msk.f32.vlgmr.msra.gmra.mxu2 %vm253_vm14, %v3161_v43 }
0x126d   :  { %v5974_v13 = vpop.eup %5973 }
0x126e   :  { %v2952_v11 = vmul.f32 %v5974_v13, %v2941_v21  ;;  %v2950_v12 = vpop.xlane.xlu0 %2949  ;;  %v3191_v53 = vpop.permute.xlu2 %3190  ;;  %vm2957_vm9 = vweird.f32 %v5974_v13 }
0x126f   :  { %5975 = vrcp.f32 %v2950_v12  ;;  %vm2958_vm8 = vmor %vm2956_vm10, %vm2957_vm9  ;;  %v3004_v25 = vand.u32 2147483648, %v2950_v12  ;;  %v3002_v39 = vand.u32 2147483647, %v2950_v12  ;;  %vm2998_vm13 = vweird.f32 %v2950_v12 }
0x1270   :  { %v2953_v32 = vsub.f32 1.0, %v2952_v11  ;;  %v3219_v29 = vpop.permute.xlu1 %3218 }
0x1271   :  { %5692 = vmatpush.xpose.msk.msra.mxu0 %vm253_vm14, %v3219_v29  ;;  %v3005_v59 = vor.u32 1.1754944e-38, %v3004_v25  ;;  %vm3003_vm3 = vcmp.eq.f32.partialorder %v3002_v39, 8.507059e+37 }
0x1272   :  { %v2954_v23 = vmul.f32 %v5974_v13, %v2953_v32 }
0x1274   :  { %v2955_v57 = vadd.f32 %v5974_v13, %v2954_v23 }
0x1275   :  { %v5976_v16 = vpop.eup %5975 }
0x1276   :  { %v2959_v26 = vsel %vm2958_vm8, %v5974_v13, %v2955_v57  ;;  %v2994_v43 = vmul.f32 %v5976_v16, %v2950_v12  ;;  %v3247_v41 = vpop.permute.xlu2 %3246  ;;  %vm2999_vm12 = vweird.f32 %v5976_v16 }
0x1277   :  { %v2964_v48 = vsel %vm2961_vm11, %v2963_v17, %v2959_v26  ;;  %5694 = vmatpush.xpose.msk.msrb.mxu2 %vm253_vm14, %v3247_v41  ;;  %vm3000_vm2 = vmor %vm2998_vm13, %vm2999_vm12 }
0x1278   :  { %v3007_v49 = vmul.f32 %v7007_v24, %v2964_v48  ;;  %v2995_v33 = vsub.f32 1.0, %v2994_v43  ;;  %v3245_v56 = vpop.permute.xlu1 %3244 }
0x127a   :  { %v2996_v37 = vmul.f32 %v5976_v16, %v2995_v33  ;;  %5680 = vmatmul.msk.f32.vlgmr.msrb.gmra.mxu3 %vm253_vm14, %v3007_v49  ;;  %5695 = vmatmul.msk.f32.vlgmr.msrb.gmra.mxu2 %vm253_vm14, %v3245_v56 }
0x127b   :  { %5690 = vmatpush.xpose.msk.msrb.mxu3 %vm253_vm14, %v3191_v53 }
0x127c   :  { %v2997_v0 = vadd.f32 %v5976_v16, %v2996_v37 }
0x127e   :  { %v3001_v60 = vsel %vm3000_vm2, %v5976_v16, %v2997_v0 }
0x127f   :  { %v3006_v22 = vsel %vm3003_vm3, %v3005_v59, %v3001_v60 }
0x1280   :  { %v3010_v24 = vmul.f32 %v7013_v58, %v3006_v22 }
0x1281   :  { %v3217_v61 = vpop.permute.xlu0 %3216 }
0x1282   :  { %5683 = vmatmul.msk.f32.vlgmr.msra.gmra.mxu3 %vm253_vm14, %v3010_v24  ;;  %5693 = vmatmul.msk.f32.vlgmr.msra.gmra.mxu0 %vm253_vm14, %v3217_v61 }
0x128a   :  { %5691 = vmatmul.msk.f32.vlgmr.msrb.gmra.mxu3 %vm253_vm14, %v3189_v28 }
0x129c   :  { %v7051_v50 = vpop.f32.mrf.mxu0 }
0x12a4   :  { %v7055_v51 = vpop.f32.mrf.mxu0 }
0x12ac   :  { %v7060_v15 = vpop.f32.mrf.mxu0  ;;  %v2920_v13 = vpop.xlane.xlu0 %2919 }
0x12ad   :  { %v2928_v12 = vsub.f32 %v7033_v47, %v2920_v13 }
0x12af   :  { %v2933_v53 = vmul.f32 1.442695, %v2928_v12 }
0x12b1   :  { %5977 = vpow2.f32 %v2933_v53 }
0x12b7   :  { %v7076_v44 = vpop.eup %5977 }
0x12b8   :  { %v2942_v57 = vsel %vm253_vm14, %v7076_v44, 0.0 }
0x12e7   :  { %v7053_v35 = vpop.f32.mrf.mxu2 }
0x12ef   :  { %v3185_v4 = vpop.f32.mrf.mxu2 }
0x12f0   :  { %v3272_v9 = vmul.f32 0.35355338, %v3185_v4  ;;  %v5828_v4 = vpack.i.bf16 %v6812_v3, %v6804_v2 }
0x12f2   :  { %v3276_v58 = vsel %vm6300_vm1, -1e+30, %v3272_v9 }
0x12f3   :  { %v3280_v10 = vsel %vm253_vm14, %v3276_v58, -inf }
0x12f4   :  { %3281 = vmax.xlane.f32.xlu2 %v3280_v10 }
0x12fd   :  { %v7062_v54 = vpop.f32.mrf.mxu3  ;;  %v3269_v34 = vpop.f32.mrf.mxu2 }
0x12fe   :  { %v3275_v1 = vmul.f32 0.35355338, %v3269_v34 }
0x12ff   :  { %v3241_v18 = vpop.f32.mrf.mxu0 }
0x1300   :  { %v3279_v20 = vsel %vm6316_vm4, -1e+30, %v3275_v1  ;;  %v3274_v27 = vmul.f32 0.35355338, %v3241_v18 }
0x1301   :  { %v3289_v28 = vsel %vm253_vm14, %v3279_v20, -inf }
0x1302   :  { %v3278_v21 = vsel %vm6324_vm5, -1e+30, %v3274_v27  ;;  %3290 = vmax.xlane.f32.xlu0 %v3289_v28 }
0x1303   :  { %v3286_v36 = vsel %vm253_vm14, %v3278_v21, -inf }
0x1304   :  { %3287 = vmax.xlane.f32.xlu2 %v3286_v36 }
0x1305   :  { %v7070_v11 = vpop.f32.mrf.mxu3 }
0x130d   :  { %v3213_v32 = vpop.f32.mrf.mxu3 }
0x130e   :  { %v3273_v29 = vmul.f32 0.35355338, %v3213_v32 }
0x1310   :  { %v3277_v5 = vsel %vm6364_vm7, -1e+30, %v3273_v29 }
0x1311   :  { %v3283_v23 = vsel %vm253_vm14, %v3277_v5, -inf }
0x1312   :  { %3284 = vmax.xlane.f32.xlu1 %v3283_v23 }
0x131a   :  { %2943 = vadd.xlane.f32.xlu1 %v2942_v57 }
0x1333   :  { %3376 = vrot.lane.b32.xlu1 %v6800_v6, %s6186_s6 }
0x133b   :  { %3454 = vrot.lane.b32.xlu1 %v6808_v55, %s6186_s6 }
0x1367   :  { %v3282_v47 = vpop.xlane.xlu2 %3281 }
0x1368   :  { %v3292_v16 = vsub.f32 %v3276_v58, %v3282_v47 }
0x136a   :  { %v3296_v17 = vmul.f32 1.442695, %v3292_v16 }
0x136c   :  { %5979 = vpow2.f32 %v3296_v17 }
0x1372   :  { %v7084_v26 = vpop.eup %5979 }
0x1373   :  { %v3304_v43 = vsel %vm253_vm14, %v7084_v26, 0.0 }
0x1374   :  { %3305 = vadd.xlane.f32.xlu2 %v3304_v43 }
0x1375   :  { %v3291_v41 = vpop.xlane.xlu0 %3290 }
0x1376   :  { %v3295_v48 = vsub.f32 %v3279_v20, %v3291_v41 }
0x1377   :  { %v3288_v49 = vpop.xlane.xlu2 %3287 }
0x1378   :  { %v3302_v33 = vmul.f32 1.442695, %v3295_v48  ;;  %v3294_v56 = vsub.f32 %v3278_v21, %v3288_v49 }
0x137a   :  { %5981 = vpow2.f32 %v3302_v33  ;;  %v3300_v6 = vmul.f32 1.442695, %v3294_v56 }
0x137c   :  { %5983 = vpow2.f32 %v3300_v6 }
0x1380   :  { %v7088_v25 = vpop.eup %5981 }
0x1381   :  { %v3313_v55 = vsel %vm253_vm14, %v7088_v25, 0.0 }
0x1382   :  { %v7092_v37 = vpop.eup %5983  ;;  %3314 = vadd.xlane.f32.xlu0 %v3313_v55  ;;  %v1913_v55 = vld [vmem:[#allocation5 + $0xf8] sm:$0xff] }
0x1383   :  { %v3310_v39 = vsel %vm253_vm14, %v7092_v37, 0.0 }
0x1384   :  { %3311 = vadd.xlane.f32.xlu2 %v3310_v39 }
0x1385   :  { %v3285_v0 = vpop.xlane.xlu1 %3284 }
0x1386   :  { %v3293_v59 = vsub.f32 %v3277_v5, %v3285_v0 }
0x1388   :  { %v3298_v60 = vmul.f32 1.442695, %v3293_v59 }
0x138a   :  { %5985 = vpow2.f32 %v3298_v60 }
0x138d   :  { %v2944_v61 = vpop.xlane.xlu1 %2943 }
0x138e   :  { %5987 = vrcp.f32 %v2944_v61  ;;  %v2976_v32 = vand.u32 2147483648, %v2944_v61  ;;  %vm2970_vm11 = vweird.f32 %v2944_v61  ;;  %v2974_v5 = vand.u32 2147483647, %v2944_v61 }
0x1390   :  { %v7096_v22 = vpop.eup %5985  ;;  %v2977_v43 = vor.u32 1.1754944e-38, %v2976_v32  ;;  %vm2975_vm2 = vcmp.eq.f32.partialorder %v2974_v5, 8.507059e+37 }
0x1391   :  { %v3307_v24 = vsel %vm253_vm14, %v7096_v22, 0.0 }
0x1392   :  { %3308 = vadd.xlane.f32.xlu0 %v3307_v24 }
0x1394   :  { %v5988_v10 = vpop.eup %5987 }
0x1395   :  { %v2966_v1 = vmul.f32 %v5988_v10, %v2944_v61  ;;  %vm2971_vm9 = vweird.f32 %v5988_v10 }
0x1396   :  { %vm2972_vm13 = vmor %vm2970_vm11, %vm2971_vm9 }
0x1397   :  { %v2967_v18 = vsub.f32 1.0, %v2966_v1 }
0x1399   :  { %v2968_v28 = vmul.f32 %v5988_v10, %v2967_v18 }
0x139b   :  { %v2969_v3 = vadd.f32 %v5988_v10, %v2968_v28 }
0x139c   :  { %3037 = vrot.lane.b32.xlu2 %v6804_v2, %s6183_s30 }
0x139d   :  { %v2973_v16 = vsel %vm2972_vm13, %v5988_v10, %v2969_v3 }
0x139e   :  { %v2978_v48 = vsel %vm2975_vm2, %v2977_v43, %v2973_v16 }
0x139f   :  { %v3008_v6 = vmul.f32 %v7076_v44, %v2978_v48 }
0x13a5   :  { %v3377_v9 = vpop.permute.xlu1 %3376 }
0x13a6   :  { %5829 = vrot.lane.b32.xlu0 %v5828_v4, %s6186_s6  ;;  %3397 = vmatpush.msra.mxu3 %v3377_v9 }
0x13ad   :  { %v3455_v58 = vpop.permute.xlu1 %3454 }
0x13ae   :  { %3475 = vmatpush.msrb.mxu3 %v3455_v58 }
0x13e7   :  { %v3306_v34 = vpop.xlane.xlu2 %3305 }
0x13e8   :  { %5989 = vrcp.f32 %v3306_v34  ;;  %v3327_v36 = vand.u32 2147483648, %v3306_v34  ;;  %v3325_v2 = vand.u32 2147483647, %v3306_v34  ;;  %vm3321_vm10 = vweird.f32 %v3306_v34 }
0x13ea   :  { %v3328_v29 = vor.u32 1.1754944e-38, %v3327_v36  ;;  %vm3326_vm12 = vcmp.eq.f32.partialorder %v3325_v2, 8.507059e+37 }
0x13ee   :  { %v5990_v20 = vpop.eup %5989 }
0x13ef   :  { %v3317_v27 = vmul.f32 %v5990_v20, %v3306_v34  ;;  %vm3322_vm6 = vweird.f32 %v5990_v20 }
0x13f0   :  { %vm3323_vm8 = vmor %vm3321_vm10, %vm3322_vm6 }
0x13f1   :  { %v3318_v21 = vsub.f32 1.0, %v3317_v27 }
0x13f3   :  { %v3319_v13 = vmul.f32 %v5990_v20, %v3318_v21 }
0x13f5   :  { %v3320_v12 = vadd.f32 %v5990_v20, %v3319_v13  ;;  %v3315_v53 = vpop.xlane.xlu0 %3314 }
0x13f6   :  { %5991 = vrcp.f32 %v3315_v53  ;;  %v3369_v39 = vand.u32 2147483648, %v3315_v53  ;;  %v3367_v60 = vand.u32 2147483647, %v3315_v53  ;;  %vm3363_vm6 = vweird.f32 %v3315_v53 }
0x13f7   :  { %v3324_v23 = vsel %vm3323_vm8, %v5990_v20, %v3320_v12  ;;  %v3312_v57 = vpop.xlane.xlu2 %3311 }
0x13f8   :  { %v3329_v47 = vsel %vm3326_vm12, %v3328_v29, %v3324_v23  ;;  %5993 = vrcp.f32 %v3312_v57  ;;  %v3370_v24 = vor.u32 1.1754944e-38, %v3369_v39  ;;  %vm3368_vm10 = vcmp.eq.f32.partialorder %v3367_v60, 8.507059e+37 }
0x13f9   :  { %v3372_v17 = vmul.f32 %v7084_v26, %v3329_v47  ;;  %v3355_v28 = vand.u32 2147483648, %v3312_v57  ;;  %vm3349_vm12 = vweird.f32 %v3312_v57  ;;  %v3353_v13 = vand.u32 2147483647, %v3312_v57 }
0x13fb   :  { %5696 = vmatmul.msk.f32.vlgmr.msra.gmra.mxu3 %vm253_vm14, %v3372_v17  ;;  %v1914_v17 = vld [vmem:[#allocation5 + $0x100] sm:$0xff] }
0x13fc   :  { %v5992_v41 = vpop.eup %5991 }
0x13fd   :  { %v3359_v49 = vmul.f32 %v5992_v41, %v3315_v53  ;;  %vm3364_vm3 = vweird.f32 %v5992_v41 }
0x13fe   :  { %v5994_v0 = vpop.eup %5993  ;;  %vm3365_vm9 = vmor %vm3363_vm6, %vm3364_vm3  ;;  %vm3354_vm6 = vcmp.eq.f32.partialorder %v3353_v13, 8.507059e+37 }
0x13ff   :  { %v3360_v33 = vsub.f32 1.0, %v3359_v49  ;;  %v3038_v56 = vpop.permute.xlu2 %3037  ;;  %v3345_v61 = vmul.f32 %v5994_v0, %v3312_v57  ;;  %vm3350_vm8 = vweird.f32 %v5994_v0  ;;  %v7126_v49 = vld [vmem:[#allocation5 + $0x148] sm:$0xff] }
0x1400   :  { %3058 = vmatpush.msrb.mxu1 %v3038_v56  ;;  %vm3351_vm13 = vmor %vm3349_vm12, %vm3350_vm8 }
0x1401   :  { %v3361_v59 = vmul.f32 %v5992_v41, %v3360_v33  ;;  %5681 = vmatmul.msk.f32.vlgmr.msrb.gmra.mxu1 %vm253_vm14, %v3008_v6  ;;  %v3346_v10 = vsub.f32 1.0, %v3345_v61  ;;  %v2064_v33 = vperm.slane %v7126_v49, 5 }
0x1402   :  { %3142 = vmatpush.msra.mxu1 %v1913_v55 }
0x1403   :  { %v3362_v26 = vadd.f32 %v5992_v41, %v3361_v59  ;;  %v3347_v1 = vmul.f32 %v5994_v0, %v3346_v10  ;;  %v2065_v56 = vadd.f32 %v2064_v33, %v6746_v31 }
0x1405   :  { %v3366_v4 = vsel %vm3365_vm9, %v5992_v41, %v3362_v26  ;;  %v3309_v9 = vpop.xlane.xlu0 %3308  ;;  %v3348_v27 = vadd.f32 %v5994_v0, %v3347_v1  ;;  %v2066_v26 = vadd.f32 %v2064_v33, %v6751_v8 }
0x1406   :  { %v3371_v58 = vsel %vm3368_vm10, %v3370_v24, %v3366_v4  ;;  %5995 = vrcp.f32 %v3309_v9  ;;  %v3341_v36 = vand.u32 2147483648, %v3309_v9  ;;  %v3339_v2 = vand.u32 2147483647, %v3309_v9 }
0x1407   :  { %v3375_v44 = vmul.f32 %v7088_v25, %v3371_v58  ;;  %vm3335_vm2 = vweird.f32 %v3309_v9  ;;  %v3352_v3 = vsel %vm3351_vm13, %v5994_v0, %v3348_v27  ;;  %v2427_v24 = vadd.f32 %v6971_v46, %v2066_v26 }
0x1408   :  { %v3342_v53 = vor.u32 1.1754944e-38, %v3341_v36  ;;  %vm3340_vm9 = vcmp.eq.f32.partialorder %v3339_v2, 8.507059e+37  ;;  %v2067_v4 = vadd.f32 %v2064_v33, %v6756_v30  ;;  %v2068_v46 = vadd.f32 %v2064_v33, %v6761_v38 }
0x1409   :  { %5684 = vmatmul.msk.f32.vlgmr.msra.gmra.mxu1 %vm253_vm14, %v7062_v54  ;;  %5699 = vmatmul.msk.f32.vlgmr.msrb.gmra.mxu3 %vm253_vm14, %v3375_v44  ;;  %v3356_v54 = vor.u32 1.1754944e-38, %v3355_v28  ;;  %v2792_v31 = vadd.f32 %v7051_v50, %v2427_v24  ;;  %v7186_v24 = vperm.slane %v7126_v49, 4 }
0x140a   :  { %v2428_v58 = vadd.f32 %v6973_v40, %v2067_v4  ;;  %v2429_v1 = vadd.f32 %v6975_v19, %v2068_v46 }
0x140b   :  { %v3357_v32 = vsel %vm3354_vm6, %v3356_v54, %v3352_v3 }
0x140c   :  { %v5996_v34 = vpop.eup %5995  ;;  %v3374_v16 = vmul.f32 %v7092_v37, %v3357_v32  ;;  %v2793_v10 = vadd.f32 %v7055_v51, %v2428_v58  ;;  %v2794_v40 = vadd.f32 %v7060_v15, %v2429_v1  ;;  %v1922_v1 = vld [vmem:[#allocation5 + $0x140] sm:$0xff] }
0x140d   :  { %v3331_v18 = vmul.f32 %v5996_v34, %v3309_v9  ;;  %vm3336_vm11 = vweird.f32 %v5996_v34  ;;  %3689 = vmatpush.msrb.mxu1 %v1922_v1 }
0x140e   :  { %vm3337_vm3 = vmor %vm3335_vm2, %vm3336_vm11 }
0x140f   :  { %v3332_v20 = vsub.f32 1.0, %v3331_v18 }
0x1411   :  { %v3333_v21 = vmul.f32 %v5996_v34, %v3332_v20 }
0x1413   :  { %v3334_v25 = vadd.f32 %v5996_v34, %v3333_v21 }
0x1415   :  { %v3338_v12 = vsel %vm3337_vm3, %v5996_v34, %v3334_v25 }
0x1416   :  { %v3343_v29 = vsel %vm3340_vm9, %v3342_v53, %v3338_v12 }
0x1417   :  { %v3373_v57 = vmul.f32 %v7096_v22, %v3343_v29 }
0x1418   :  { %v5830_v5 = vpop.permute.xlu0 %5829 }
0x1419   :  { %v5832_v23 = vunpack.i.h.bf16 %v5830_v5  ;;  %v5831_v47 = vunpack.i.l.bf16 %v5830_v5 }
0x141b   :  { %3423 = vmatpush.msrb.mxu0 %v5831_v47  ;;  %3449 = vmatpush.msra.mxu2 %v5832_v23 }
0x141c   :  { %5697 = vmatmul.msk.f32.vlgmr.msrb.gmra.mxu0 %vm253_vm14, %v3373_v57  ;;  %5698 = vmatmul.msk.f32.vlgmr.msra.gmra.mxu2 %vm253_vm14, %v3374_v16 }
0x141d   :  { %3507 = vmatpush.msra.mxu0 %v1914_v17 }
0x147e   :  { %v3060_v43 = vpop.f32.mrf.mxu1  ;;  %v3399_v41 = vpop.f32.mrf.mxu3 }
0x147f   :  { %5685 = vmatmul.msk.f32.gmra.mxu1 %vm253_vm14, %v3060_v43  ;;  %5700 = vmatmul.msk.f32.vlgmr.msra.gmra.mxu0 %vm253_vm14, %v3399_v41  ;;  %v1910_v43 = vld [vmem:[#allocation5 + $0xe0] sm:$0xff]  ;;  %v1909_v41 = vld [vmem:[#allocation5 + $0xd8] sm:$0xff] }
0x1480   :  { %3648 = vmatpush.msrb.mxu2 %v1910_v43 }
0x1482   :  { %3649 = vmatpush.msrb.mxu2 %v1909_v41 }
0x1486   :  { %v3144_v6 = vpop.f32.mrf.mxu1 }
0x1487   :  { %5686 = vmatmul.msk.f32.gmra.mxu1 %vm253_vm14, %v7053_v35  ;;  %v2426_v35 = vadd.f32 %v6967_v45, %v2065_v56 }
0x148c   :  { %v3477_v48 = vpop.f32.mrf.mxu3 }
0x148f   :  { %5687 = vmatmul.msk.f32.gmra.mxu1 %vm253_vm14, %v7070_v11  ;;  %v2791_v11 = vadd.f32 %v7049_v63, %v2426_v35 }
0x1491   :  { %v3156_v55 = vadd.f32 %v3144_v6, %v2791_v11 }
0x1499   :  { %v3425_v37 = vpop.f32.mrf.mxu0 }
0x149a   :  { %5701 = vmatmul.msk.f32.gmra.mxu0 %vm253_vm14, %v3425_v37  ;;  %v1908_v37 = vld [vmem:[#allocation5 + $0xd0] sm:$0xff] }
0x149b   :  { %3650 = vmatpush.msrb.mxu2 %v1908_v37 }
0x149f   :  { %v3451_v22 = vpop.f32.mrf.mxu2 }
0x14a2   :  { %5702 = vmatmul.msk.f32.gmra.mxu0 %vm253_vm14, %v3451_v22  ;;  %v1907_v22 = vld [vmem:[#allocation5 + $0xc8] sm:$0xff] }
0x14a3   :  { %3651 = vmatpush.msrb.mxu2 %v1907_v22 }
0x14aa   :  { %5703 = vmatmul.msk.f32.gmra.mxu0 %vm253_vm14, %v3477_v48 }
0x14fc   :  { %v3509_v39 = vpop.f32.mrf.mxu0  ;;  %v3147_v60 = vpop.f32.mrf.mxu1 }
0x14fd   :  { %v7132_v0 = vadd.f32 %v3509_v39, %v3156_v55  ;;  %v3157_v61 = vadd.f32 %v3147_v60, %v2792_v31  ;;  %v7183_v60 = vperm.slane %v7126_v49, 3 }
0x14ff   :  { %v3525_v59 = vsel %vm97_vm0, %v7132_v0, 0.0 }
0x1500   :  { %3526 = vadd.xlane.f32.xlu0 %v3525_v59 }
0x1504   :  { %v3150_v9 = vpop.f32.mrf.mxu1 }
0x1505   :  { %v3158_v8 = vadd.f32 %v3150_v9, %v2793_v10 }
0x150c   :  { %v3153_v18 = vpop.f32.mrf.mxu1 }
0x150d   :  { %v3159_v20 = vadd.f32 %v3153_v18, %v2794_v40  ;;  %v1920_v40 = vld [vmem:[#allocation5 + $0x130] sm:$0xff] }
0x1517   :  { %v3512_v45 = vpop.f32.mrf.mxu0 }
0x1518   :  { %v7140_v63 = vadd.f32 %v3512_v45, %v3157_v61 }
0x151a   :  { %v3528_v44 = vsel %vm97_vm0, %v7140_v63, 0.0 }
0x151b   :  { %3529 = vadd.xlane.f32.xlu2 %v3528_v44 }
0x151f   :  { %v3515_v34 = vpop.f32.mrf.mxu0 }
0x1520   :  { %v7147_v50 = vadd.f32 %v3515_v34, %v3158_v8 }
0x1522   :  { %v3531_v30 = vsel %vm97_vm0, %v7147_v50, 0.0 }
0x1523   :  { %3532 = vadd.xlane.f32.xlu1 %v3531_v30  ;;  %v1921_v30 = vld [vmem:[#allocation5 + $0x138] sm:$0xff] }
0x1524   :  { %3690 = vmatpush.msrb.mxu1 %v1921_v30 }
0x1526   :  { %3691 = vmatpush.msrb.mxu1 %v1920_v40 }
0x1527   :  { %v3518_v27 = vpop.f32.mrf.mxu0 }
0x1528   :  { %v7153_v28 = vadd.f32 %v3518_v27, %v3159_v20 }
0x152a   :  { %v3534_v51 = vsel %vm97_vm0, %v7153_v28, 0.0 }
0x152b   :  { %3535 = vadd.xlane.f32.xlu0 %v3534_v51 }
0x1573   :  { %v3527_v38 = vpop.xlane.xlu0 %3526 }
0x1574   :  { %v3537_v21 = vmul.f32 %v3527_v38, %v6224_v14  ;;  %v1919_v38 = vld [vmem:[#allocation5 + $0x128] sm:$0xff] }
0x1575   :  { %3692 = vmatpush.msrb.mxu1 %v1919_v38 }
0x1576   :  { %v3541_v19 = vsub.f32 %v7132_v0, %v3537_v21 }
0x1578   :  { %v3545_v36 = vmul.f32 %v3541_v19, %v3541_v19 }
0x157a   :  { %v3549_v13 = vsel %vm97_vm0, %v3545_v36, 0.0 }
0x157b   :  { %3550 = vadd.xlane.f32.xlu2 %v3549_v13  ;;  %v1918_v13 = vld [vmem:[#allocation5 + $0x120] sm:$0xff] }
0x157c   :  { %3693 = vmatpush.msrb.mxu1 %v1918_v13 }
0x158e   :  { %v3530_v2 = vpop.xlane.xlu2 %3529 }
0x158f   :  { %v3538_v15 = vmul.f32 %v3530_v2, %v6224_v14 }
0x1591   :  { %v7162_v25 = vsub.f32 %v7140_v63, %v3538_v15 }
0x1593   :  { %v3546_v3 = vmul.f32 %v7162_v25, %v7162_v25 }
0x1595   :  { %v3552_v54 = vsel %vm97_vm0, %v3546_v3, 0.0 }
0x1596   :  { %3553 = vadd.xlane.f32.xlu1 %v3552_v54  ;;  %v3533_v12 = vpop.xlane.xlu1 %3532 }
0x1597   :  { %v3539_v53 = vmul.f32 %v3533_v12, %v6224_v14 }
0x1599   :  { %v7169_v32 = vsub.f32 %v7147_v50, %v3539_v53 }
0x159b   :  { %v3547_v29 = vmul.f32 %v7169_v32, %v7169_v32 }
0x159d   :  { %v3555_v5 = vsel %vm97_vm0, %v3547_v29, 0.0 }
0x159e   :  { %3556 = vadd.xlane.f32.xlu0 %v3555_v5  ;;  %v3536_v23 = vpop.xlane.xlu0 %3535 }
0x159f   :  { %v3540_v47 = vmul.f32 %v3536_v23, %v6224_v14 }
0x15a1   :  { %v7176_v16 = vsub.f32 %v7153_v28, %v3540_v47 }
0x15a3   :  { %v3548_v57 = vmul.f32 %v7176_v16, %v7176_v16 }
0x15a5   :  { %v3558_v17 = vsel %vm97_vm0, %v3548_v57, 0.0 }
0x15a6   :  { %3559 = vadd.xlane.f32.xlu2 %v3558_v17 }
0x15ee   :  { %v3551_v48 = vpop.xlane.xlu2 %3550 }
0x15ef   :  { %v3561_v33 = vmul.f32 %v3551_v48, %v6224_v14 }
0x15f1   :  { %v3565_v56 = vadd.f32 1e-05, %v3561_v33 }
0x15f3   :  { %5997 = vrsqrt.f32 %v3565_v56  ;;  %vm3575_vm8 = vweird.f32 %v3565_v56 }
0x15f9   :  { %v5998_v35 = vpop.eup %5997 }
0x15fa   :  { %v3570_v6 = vmul.f32 %v5998_v35, %v3565_v56  ;;  %vm3576_vm10 = vweird.f32 %v5998_v35 }
0x15fb   :  { %vm3577_vm11 = vmor %vm3575_vm8, %vm3576_vm10 }
0x15fc   :  { %v3571_v11 = vmul.f32 %v5998_v35, %v3570_v6 }
0x15fe   :  { %v3572_v55 = vmul.f32 0.5, %v3571_v11 }
0x1600   :  { %v3573_v39 = vsub.f32 1.5, %v3572_v55 }
0x1602   :  { %v3574_v59 = vmul.f32 %v5998_v35, %v3573_v39  ;;  %v1916_v39 = vld [vmem:[#allocation5 + $0x110] sm:$0xff] }
0x1604   :  { %v3578_v26 = vsel %vm3577_vm11, %v5998_v35, %v3574_v59  ;;  %v1915_v59 = vld [vmem:[#allocation5 + $0x108] sm:$0xff] }
0x1605   :  { %v3609_v31 = vmul.f32 %v3578_v26, %v3541_v19  ;;  %v3623_v26 = vperm.slane %v7126_v49, 6 }
0x1607   :  { %v3614_v61 = vmul.f32 %v7183_v60, %v3609_v31 }
0x1609   :  { %v3619_v45 = vadd.f32 %v7186_v24, %v3614_v61  ;;  %v3554_v4 = vpop.xlane.xlu1 %3553 }
0x160a   :  { %v3562_v9 = vmul.f32 %v3554_v4, %v6224_v14 }
0x160b   :  { %5704 = vmatmul.msk.f32.vlgmr.msrb.gmra.mxu2 %vm97_vm0, %v3619_v45 }
0x160c   :  { %v3566_v58 = vadd.f32 1e-05, %v3562_v9 }
0x160e   :  { %5999 = vrsqrt.f32 %v3566_v58  ;;  %vm3585_vm13 = vweird.f32 %v3566_v58 }
0x1611   :  { %v3557_v44 = vpop.xlane.xlu0 %3556 }
0x1612   :  { %v3563_v10 = vmul.f32 %v3557_v44, %v6224_v14 }
0x1614   :  { %v6000_v8 = vpop.eup %5999  ;;  %v3567_v34 = vadd.f32 1e-05, %v3563_v10 }
0x1615   :  { %v3580_v46 = vmul.f32 %v6000_v8, %v3566_v58  ;;  %vm3586_vm12 = vweird.f32 %v6000_v8 }
0x1616   :  { %6001 = vrsqrt.f32 %v3567_v34  ;;  %vm3587_vm2 = vmor %vm3585_vm13, %vm3586_vm12  ;;  %vm3595_vm6 = vweird.f32 %v3567_v34 }
0x1617   :  { %v3581_v18 = vmul.f32 %v6000_v8, %v3580_v46 }
0x1619   :  { %v3582_v20 = vmul.f32 0.5, %v3581_v18  ;;  %v3560_v27 = vpop.xlane.xlu2 %3559 }
0x161a   :  { %v3564_v51 = vmul.f32 %v3560_v27, %v6224_v14 }
0x161b   :  { %v3583_v21 = vsub.f32 1.5, %v3582_v20 }
0x161c   :  { %v6002_v19 = vpop.eup %6001  ;;  %v3568_v36 = vadd.f32 1e-05, %v3564_v51 }
0x161d   :  { %v3584_v2 = vmul.f32 %v6000_v8, %v3583_v21  ;;  %v3590_v15 = vmul.f32 %v6002_v19, %v3567_v34  ;;  %vm3596_vm3 = vweird.f32 %v6002_v19  ;;  %v3714_v34 = vperm.slane %v7126_v49, 7 }
0x161e   :  { %6003 = vrsqrt.f32 %v3568_v36  ;;  %vm3597_vm9 = vmor %vm3595_vm6, %vm3596_vm3  ;;  %vm3605_vm8 = vweird.f32 %v3568_v36 }
0x161f   :  { %v3588_v3 = vsel %vm3587_vm2, %v6000_v8, %v3584_v2  ;;  %v3591_v54 = vmul.f32 %v6002_v19, %v3590_v15 }
0x1620   :  { %v3610_v12 = vmul.f32 %v3588_v3, %v7162_v25 }
0x1621   :  { %v3592_v53 = vmul.f32 0.5, %v3591_v54 }
0x1622   :  { %v3615_v29 = vmul.f32 %v7183_v60, %v3610_v12 }
0x1623   :  { %v3593_v5 = vsub.f32 1.5, %v3592_v53 }
0x1624   :  { %v6004_v23 = vpop.eup %6003  ;;  %v3620_v47 = vadd.f32 %v7186_v24, %v3615_v29 }
0x1625   :  { %v3594_v57 = vmul.f32 %v6002_v19, %v3593_v5  ;;  %v3600_v17 = vmul.f32 %v6004_v23, %v3568_v36  ;;  %vm3606_vm10 = vweird.f32 %v6004_v23 }
0x1626   :  { %5705 = vmatmul.msk.f32.gmra.mxu2 %vm97_vm0, %v3620_v47  ;;  %vm3607_vm11 = vmor %vm3605_vm8, %vm3606_vm10 }
0x1627   :  { %v3598_v43 = vsel %vm3597_vm9, %v6002_v19, %v3594_v57  ;;  %v3601_v41 = vmul.f32 %v6004_v23, %v3600_v17 }
0x1628   :  { %v3611_v37 = vmul.f32 %v3598_v43, %v7169_v32  ;;  %v1917_v32 = vld [vmem:[#allocation5 + $0x118] sm:$0xff] }
0x1629   :  { %v3602_v22 = vmul.f32 0.5, %v3601_v41  ;;  %3694 = vmatpush.msrb.mxu1 %v1917_v32 }
0x162a   :  { %v3616_v25 = vmul.f32 %v7183_v60, %v3611_v37 }
0x162b   :  { %v3603_v48 = vsub.f32 1.5, %v3602_v22  ;;  %3695 = vmatpush.msrb.mxu1 %v1916_v39 }
0x162c   :  { %v3621_v33 = vadd.f32 %v7186_v24, %v3616_v25 }
0x162d   :  { %v3604_v56 = vmul.f32 %v6004_v23, %v3603_v48  ;;  %3696 = vmatpush.msrb.mxu1 %v1915_v59 }
0x162e   :  { %5706 = vmatmul.msk.f32.gmra.mxu2 %vm97_vm0, %v3621_v33  ;;  %v3723_v33 = vld [vmem:[#allocation5 + $0x168] sm:$0xff] }
0x162f   :  { %v3608_v35 = vsel %vm3607_vm11, %v6004_v23, %v3604_v56  ;;  %3864 = vmatpush.msra.mxu3 %v3723_v33  ;;  %v3722_v56 = vld [vmem:[#allocation5 + $0x160] sm:$0xff] }
0x1630   :  { %v3612_v6 = vmul.f32 %v3608_v35, %v7176_v16  ;;  %v3721_v35 = vld [vmem:[#allocation5 + $0x158] sm:$0xff] }
0x1631   :  { %3865 = vmatpush.msra.mxu3 %v3722_v56 }
0x1632   :  { %v3617_v11 = vmul.f32 %v7183_v60, %v3612_v6  ;;  %v3720_v6 = vld [vmem:[#allocation5 + $0x150] sm:$0xff] }
0x1633   :  { %3866 = vmatpush.msra.mxu3 %v3721_v35 }
0x1634   :  { %v3622_v55 = vadd.f32 %v7186_v24, %v3617_v11 }
0x1635   :  { %3867 = vmatpush.msra.mxu3 %v3720_v6 }
0x1636   :  { %5707 = vmatmul.msk.f32.gmra.mxu2 %vm97_vm0, %v3622_v55 }
0x168e   :  { %v3653_v31 = vpop.f32.mrf.mxu2 }
0x168f   :  { %v3654_v61 = vadd.f32 %v3653_v31, %v3623_v26 }
0x1691   :  { %v3665_v45 = vmax.f32 %v3654_v61, 0.0 }
0x1693   :  { %5708 = vmatmul.msk.f32.vlgmr.msrb.gmra.mxu1 %vm1851_vm15, %v3665_v45  ;;  %v7257_v45 = vld [vmem:[#allocation5 + $0x1f0] sm:$0xff] }
0x16a9   :  { %v3656_v16 = vpop.f32.mrf.mxu2 }
0x16aa   :  { %v3657_v4 = vadd.f32 %v3656_v16, %v3623_v26 }
0x16ac   :  { %v3666_v60 = vmax.f32 %v3657_v4, 0.0  ;;  %v3829_v4 = vperm.slane %v7257_v45, 1 }
0x16ae   :  { %5709 = vmatmul.msk.f32.gmra.mxu1 %vm1851_vm15, %v3666_v60 }
0x16b1   :  { %v3659_v24 = vpop.f32.mrf.mxu2 }
0x16b2   :  { %v3660_v9 = vadd.f32 %v3659_v24, %v3623_v26  ;;  %v3834_v24 = vperm.slane %v7257_v45, 2 }
0x16b4   :  { %v3667_v58 = vmax.f32 %v3660_v9, 0.0 }
0x16b6   :  { %5710 = vmatmul.msk.f32.gmra.mxu1 %vm1851_vm15, %v3667_v58 }
0x16b9   :  { %v3662_v44 = vpop.f32.mrf.mxu2 }
0x16ba   :  { %v3663_v10 = vadd.f32 %v3662_v44, %v3623_v26 }
0x16bc   :  { %v3668_v8 = vmax.f32 %v3663_v10, 0.0 }
0x16be   :  { %5711 = vmatmul.msk.f32.gmra.mxu1 %vm1851_vm15, %v3668_v8 }
0x1710   :  { %v3698_v46 = vpop.f32.mrf.mxu1 }
0x1711   :  { %v3710_v1 = vadd.f32 %v3698_v46, %v7132_v0 }
0x1713   :  { %v7213_v30 = vadd.f32 %v3714_v34, %v3710_v1 }
0x1715   :  { %v3741_v18 = vsel %vm97_vm0, %v7213_v30, 0.0 }
0x1716   :  { %3742 = vadd.xlane.f32.xlu1 %v3741_v18 }
0x172b   :  { %v3701_v40 = vpop.f32.mrf.mxu1 }
0x172c   :  { %v3711_v20 = vadd.f32 %v3701_v40, %v7140_v63 }
0x172e   :  { %v7218_v27 = vadd.f32 %v3714_v34, %v3711_v20 }
0x1730   :  { %v3744_v51 = vsel %vm97_vm0, %v7218_v27, 0.0 }
0x1731   :  { %3745 = vadd.xlane.f32.xlu0 %v3744_v51 }
0x1733   :  { %v3704_v38 = vpop.f32.mrf.mxu1 }
0x1734   :  { %v3712_v49 = vadd.f32 %v3704_v38, %v7147_v50 }
0x1736   :  { %v7223_v21 = vadd.f32 %v3714_v34, %v3712_v49 }
0x1738   :  { %v3747_v0 = vsel %vm97_vm0, %v7223_v21, 0.0 }
0x1739   :  { %3748 = vadd.xlane.f32.xlu2 %v3747_v0 }
0x173b   :  { %v3707_v19 = vpop.f32.mrf.mxu1 }
0x173c   :  { %v3713_v36 = vadd.f32 %v3707_v19, %v7153_v28 }
0x173e   :  { %v7228_v13 = vadd.f32 %v3714_v34, %v3713_v36 }
0x1740   :  { %v3750_v63 = vsel %vm97_vm0, %v7228_v13, 0.0 }
0x1741   :  { %3751 = vadd.xlane.f32.xlu1 %v3750_v63 }
0x1789   :  { %v3743_v2 = vpop.xlane.xlu1 %3742 }
0x178a   :  { %v3753_v15 = vmul.f32 %v3743_v2, %v6224_v14 }
0x178c   :  { %v3757_v50 = vsub.f32 %v7213_v30, %v3753_v15 }
0x178e   :  { %v3761_v3 = vmul.f32 %v3757_v50, %v3757_v50 }
0x1790   :  { %v3765_v54 = vsel %vm97_vm0, %v3761_v3, 0.0 }
0x1791   :  { %3766 = vadd.xlane.f32.xlu0 %v3765_v54 }
0x17a4   :  { %v3746_v12 = vpop.xlane.xlu0 %3745 }
0x17a5   :  { %v3754_v53 = vmul.f32 %v3746_v12, %v6224_v14 }
0x17a7   :  { %v7237_v28 = vsub.f32 %v7218_v27, %v3754_v53 }
0x17a9   :  { %v3762_v29 = vmul.f32 %v7237_v28, %v7237_v28 }
0x17ab   :  { %v3768_v5 = vsel %vm97_vm0, %v3762_v29, 0.0 }
0x17ac   :  { %v3749_v23 = vpop.xlane.xlu2 %3748  ;;  %3769 = vadd.xlane.f32.xlu2 %v3768_v5 }
0x17ad   :  { %v3755_v47 = vmul.f32 %v3749_v23, %v6224_v14 }
0x17af   :  { %v7244_v57 = vsub.f32 %v7223_v21, %v3755_v47 }
0x17b1   :  { %v3763_v17 = vmul.f32 %v7244_v57, %v7244_v57 }
0x17b3   :  { %v3771_v43 = vsel %vm97_vm0, %v3763_v17, 0.0 }
0x17b4   :  { %3772 = vadd.xlane.f32.xlu1 %v3771_v43  ;;  %v3752_v41 = vpop.xlane.xlu1 %3751 }
0x17b5   :  { %v3756_v37 = vmul.f32 %v3752_v41, %v6224_v14 }
0x17b7   :  { %v7251_v22 = vsub.f32 %v7228_v13, %v3756_v37 }
0x17b9   :  { %v3764_v25 = vmul.f32 %v7251_v22, %v7251_v22 }
0x17bb   :  { %v3774_v48 = vsel %vm97_vm0, %v3764_v25, 0.0 }
0x17bc   :  { %3775 = vadd.xlane.f32.xlu0 %v3774_v48 }
0x1804   :  { %v3767_v11 = vpop.xlane.xlu0 %3766 }
0x1805   :  { %v3777_v55 = vmul.f32 %v3767_v11, %v6224_v14 }
0x1807   :  { %v3781_v32 = vadd.f32 1e-05, %v3777_v55 }
0x1809   :  { %6005 = vrsqrt.f32 %v3781_v32  ;;  %vm3791_vm13 = vweird.f32 %v3781_v32 }
0x180f   :  { %v6006_v39 = vpop.eup %6005 }
0x1810   :  { %v3786_v59 = vmul.f32 %v6006_v39, %v3781_v32  ;;  %vm3792_vm12 = vweird.f32 %v6006_v39  ;;  %v3839_v32 = vperm.slane %v7257_v45, 0 }
0x1811   :  { %vm3793_vm2 = vmor %vm3791_vm13, %vm3792_vm12 }
0x1812   :  { %v3787_v26 = vmul.f32 %v6006_v39, %v3786_v59 }
0x1814   :  { %v3788_v31 = vmul.f32 0.5, %v3787_v26 }
0x1816   :  { %v3789_v61 = vsub.f32 1.5, %v3788_v31 }
0x1818   :  { %v3790_v16 = vmul.f32 %v6006_v39, %v3789_v61 }
0x181a   :  { %v3794_v60 = vsel %vm3793_vm2, %v6006_v39, %v3790_v16 }
0x181b   :  { %v3825_v9 = vmul.f32 %v3794_v60, %v3757_v50 }
0x181d   :  { %v3830_v58 = vmul.f32 %v3829_v4, %v3825_v9 }
0x181f   :  { %v3835_v44 = vadd.f32 %v3834_v24, %v3830_v58  ;;  %v3770_v10 = vpop.xlane.xlu2 %3769 }
0x1820   :  { %v3778_v8 = vmul.f32 %v3770_v10, %v6224_v14 }
0x1821   :  { %5712 = vmatmul.msk.f32.vlgmr.msra.gmra.mxu3 %vm97_vm0, %v3835_v44 }
0x1822   :  { %v3782_v34 = vadd.f32 1e-05, %v3778_v8 }
0x1824   :  { %6007 = vrsqrt.f32 %v3782_v34  ;;  %vm3801_vm6 = vweird.f32 %v3782_v34 }
0x1827   :  { %v3773_v46 = vpop.xlane.xlu1 %3772 }
0x1828   :  { %v3779_v1 = vmul.f32 %v3773_v46, %v6224_v14 }
0x182a   :  { %v6008_v18 = vpop.eup %6007  ;;  %v3783_v40 = vadd.f32 1e-05, %v3779_v1 }
0x182b   :  { %v3796_v20 = vmul.f32 %v6008_v18, %v3782_v34  ;;  %vm3802_vm3 = vweird.f32 %v6008_v18 }
0x182c   :  { %6009 = vrsqrt.f32 %v3783_v40  ;;  %vm3803_vm9 = vmor %vm3801_vm6, %vm3802_vm3  ;;  %vm3811_vm8 = vweird.f32 %v3783_v40 }
0x182d   :  { %v3797_v51 = vmul.f32 %v6008_v18, %v3796_v20 }
0x182f   :  { %v3798_v38 = vmul.f32 0.5, %v3797_v51  ;;  %v3776_v49 = vpop.xlane.xlu0 %3775 }
0x1830   :  { %v3780_v0 = vmul.f32 %v3776_v49, %v6224_v14 }
0x1831   :  { %v3799_v19 = vsub.f32 1.5, %v3798_v38 }
0x1832   :  { %v6010_v36 = vpop.eup %6009  ;;  %v3784_v63 = vadd.f32 1e-05, %v3780_v0 }
0x1833   :  { %v3800_v2 = vmul.f32 %v6008_v18, %v3799_v19  ;;  %v3806_v15 = vmul.f32 %v6010_v36, %v3783_v40  ;;  %vm3812_vm10 = vweird.f32 %v6010_v36 }
0x1834   :  { %6011 = vrsqrt.f32 %v3784_v63  ;;  %vm3813_vm11 = vmor %vm3811_vm8, %vm3812_vm10  ;;  %vm3821_vm13 = vweird.f32 %v3784_v63 }
0x1835   :  { %v3804_v50 = vsel %vm3803_vm9, %v6008_v18, %v3800_v2  ;;  %v3807_v3 = vmul.f32 %v6010_v36, %v3806_v15 }
0x1836   :  { %v3826_v54 = vmul.f32 %v3804_v50, %v7237_v28 }
0x1837   :  { %v3808_v12 = vmul.f32 0.5, %v3807_v3 }
0x1838   :  { %v3831_v53 = vmul.f32 %v3829_v4, %v3826_v54 }
0x1839   :  { %v3809_v29 = vsub.f32 1.5, %v3808_v12 }
0x183a   :  { %v6012_v5 = vpop.eup %6011  ;;  %v3836_v23 = vadd.f32 %v3834_v24, %v3831_v53 }
0x183b   :  { %v3810_v47 = vmul.f32 %v6010_v36, %v3809_v29  ;;  %v3816_v17 = vmul.f32 %v6012_v5, %v3784_v63  ;;  %vm3822_vm12 = vweird.f32 %v6012_v5 }
0x183c   :  { %5713 = vmatmul.msk.f32.gmra.mxu3 %vm97_vm0, %v3836_v23  ;;  %vm3823_vm2 = vmor %vm3821_vm13, %vm3822_vm12 }
0x183d   :  { %v3814_v43 = vsel %vm3813_vm11, %v6010_v36, %v3810_v47  ;;  %v3817_v41 = vmul.f32 %v6012_v5, %v3816_v17 }
0x183e   :  { %v3827_v37 = vmul.f32 %v3814_v43, %v7244_v57 }
0x183f   :  { %v3818_v25 = vmul.f32 0.5, %v3817_v41 }
0x1840   :  { %v3832_v48 = vmul.f32 %v3829_v4, %v3827_v37 }
0x1841   :  { %v3819_v33 = vsub.f32 1.5, %v3818_v25 }
0x1842   :  { %v3837_v28 = vadd.f32 %v3834_v24, %v3832_v48 }
0x1843   :  { %v3820_v56 = vmul.f32 %v6012_v5, %v3819_v33 }
0x1844   :  { %5714 = vmatmul.msk.f32.gmra.mxu3 %vm97_vm0, %v3837_v28 }
0x1845   :  { %v3824_v35 = vsel %vm3823_vm2, %v6012_v5, %v3820_v56 }
0x1846   :  { %v3828_v6 = vmul.f32 %v3824_v35, %v7251_v22 }
0x1848   :  { %v3833_v11 = vmul.f32 %v3829_v4, %v3828_v6 }
0x184a   :  { %v3838_v55 = vadd.f32 %v3834_v24, %v3833_v11 }
0x184c   :  { %5715 = vmatmul.msk.f32.gmra.mxu3 %vm97_vm0, %v3838_v55 }
0x18a4   :  { %v3869_v57 = vpop.f32.mrf.mxu3 }
0x18a5   :  { %v7272_v39 = vadd.f32 %v3869_v57, %v3839_v32 }
0x18a7   :  { %3887 = vrot.lane.b32.xlu2 %v7272_v39, %s6175_s0 }
0x18bf   :  { %v3872_v59 = vpop.f32.mrf.mxu3 }
0x18c0   :  { %v7276_v26 = vadd.f32 %v3872_v59, %v3839_v32 }
0x18c2   :  { %3914 = vrot.lane.b32.xlu0 %v7276_v26, %s6175_s0  ;;  %v5833_v33 = vpack.i.bf16 %v7276_v26, %v7272_v39 }
0x18c7   :  { %v3875_v31 = vpop.f32.mrf.mxu3 }
0x18c8   :  { %v7280_v22 = vadd.f32 %v3875_v31, %v3839_v32 }
0x18ca   :  { %3941 = vrot.lane.b32.xlu2 %v7280_v22, %s6175_s0 }
0x18cf   :  { %v3878_v61 = vpop.f32.mrf.mxu3 }
0x18d0   :  { %v7284_v16 = vadd.f32 %v3878_v61, %v3839_v32 }
0x18d2   :  { %4176 = vrot.lane.b32.xlu2 %v7284_v16, %s6176_s2  ;;  %3968 = vrot.lane.b32.xlu1 %v7284_v16, %s6175_s0 }
0x18da   :  { %4305 = vrot.lane.b32.xlu2 %v7280_v22, %s6178_s1 }
0x18e2   :  { %4303 = vrot.lane.b32.xlu2 %v7280_v22, %s6179_s26 }
0x1901   :  { %v3888_v4 = vpop.permute.xlu2 %3887 }
0x1902   :  { %5716 = vmatpush.xpose.msk.msrb.mxu0 %vm253_vm14, %v3888_v4 }
0x1905   :  { %5717 = vmatmul.msk.f32.vlgmr.msrb.gmra.mxu0 %vm253_vm14, %v7272_v39 }
0x1924   :  { %v3942_v60 = vpop.permute.xlu2 %3941 }
0x1925   :  { %5720 = vmatpush.xpose.msk.msrb.mxu3 %vm253_vm14, %v3942_v60 }
0x1928   :  { %5721 = vmatmul.msk.f32.vlgmr.msrb.gmra.mxu3 %vm253_vm14, %v7280_v22 }
0x192c   :  { %v4177_v9 = vpop.permute.xlu2 %4176 }
0x1934   :  { %v3915_v24 = vpop.permute.xlu0 %3914  ;;  %v4306_v44 = vpop.permute.xlu2 %4305 }
0x1935   :  { %5718 = vmatpush.xpose.msk.msra.mxu2 %vm253_vm14, %v3915_v24 }
0x1938   :  { %5719 = vmatmul.msk.f32.vlgmr.msra.gmra.mxu2 %vm253_vm14, %v7276_v26 }
0x193c   :  { %v7332_v19 = vpop.permute.xlu2 %4303 }
0x1944   :  { %v3969_v58 = vpop.permute.xlu1 %3968 }
0x1945   :  { %5722 = vmatpush.xpose.msk.msra.mxu0 %vm253_vm14, %v3969_v58 }
0x1948   :  { %5723 = vmatmul.msk.f32.vlgmr.msra.gmra.mxu0 %vm253_vm14, %v7284_v16 }
0x1949   :  { %4197 = vmatpush.msrb.mxu0 %v4177_v9 }
0x194b   :  { %5736 = vmatpush.xpose.msk.msra.mxu0 %vm253_vm14, %v4306_v44 }
0x1982   :  { %v3910_v10 = vpop.f32.mrf.mxu0 }
0x1983   :  { %v3994_v8 = vmul.f32 0.35355338, %v3910_v10 }
0x1985   :  { %v3998_v34 = vsel %vm6300_vm1, -1e+30, %v3994_v8 }
0x1986   :  { %v4002_v46 = vsel %vm253_vm14, %v3998_v34, -inf }
0x1987   :  { %4003 = vmax.xlane.f32.xlu2 %v4002_v46 }
0x199f   :  { %4249 = vrot.lane.b32.xlu2 %v7272_v39, %s6178_s1 }
0x19a7   :  { %4331 = vrot.lane.b32.xlu2 %v7284_v16, %s6179_s26 }
0x19ab   :  { %v3964_v29 = vpop.f32.mrf.mxu3 }
0x19ac   :  { %v3996_v17 = vmul.f32 0.35355338, %v3964_v29 }
0x19ae   :  { %v4000_v41 = vsel %vm6324_vm5, -1e+30, %v3996_v17 }
0x19af   :  { %4515 = vrot.lane.b32.xlu2 %v7280_v22, %s6180_s27  ;;  %v4008_v37 = vsel %vm253_vm14, %v4000_v41, -inf }
0x19b7   :  { %4614 = vrot.lane.b32.xlu2 %v7272_v39, %s6181_s28 }
0x19bb   :  { %v3937_v40 = vpop.f32.mrf.mxu2 }
0x19bc   :  { %v3995_v38 = vmul.f32 0.35355338, %v3937_v40 }
0x19be   :  { %v3999_v49 = vsel %vm6364_vm7, -1e+30, %v3995_v38 }
0x19bf   :  { %4670 = vrot.lane.b32.xlu2 %v7280_v22, %s6181_s28  ;;  %v4005_v0 = vsel %vm253_vm14, %v3999_v49, -inf }
0x19c5   :  { %v3991_v1 = vpop.f32.mrf.mxu0 }
0x19c6   :  { %v3997_v18 = vmul.f32 0.35355338, %v3991_v1 }
0x19c7   :  { %4612 = vrot.lane.b32.xlu2 %v7272_v39, %s6182_s29 }
0x19c8   :  { %v4001_v20 = vsel %vm6316_vm4, -1e+30, %v3997_v18 }
0x19c9   :  { %v4011_v51 = vsel %vm253_vm14, %v4001_v20, -inf }
0x19ca   :  { %4012 = vmax.xlane.f32.xlu0 %v4011_v51 }
0x19cf   :  { %4668 = vrot.lane.b32.xlu2 %v7280_v22, %s6182_s29 }
0x19d2   :  { %4006 = vmax.xlane.f32.xlu0 %v4005_v0 }
0x19d7   :  { %4696 = vrot.lane.b32.xlu2 %v7284_v16, %s6182_s29 }
0x19fa   :  { %v4004_v36 = vpop.xlane.xlu2 %4003 }
0x19fb   :  { %v4014_v63 = vsub.f32 %v3998_v34, %v4004_v36 }
0x19fd   :  { %v4018_v2 = vmul.f32 1.442695, %v4014_v63 }
0x19ff   :  { %6013 = vpow2.f32 %v4018_v2 }
0x1a02   :  { %v7353_v56 = vpop.permute.xlu2 %4249 }
0x1a05   :  { %v7334_v15 = vpop.eup %6013 }
0x1a06   :  { %v4026_v50 = vsel %vm253_vm14, %v7334_v15, 0.0 }
0x1a07   :  { %4027 = vadd.xlane.f32.xlu0 %v4026_v50 }
0x1a0a   :  { %v7355_v24 = vpop.permute.xlu2 %4331 }
0x1a12   :  { %v7362_v38 = vpop.permute.xlu2 %4515 }
0x1a3d   :  { %v4013_v3 = vpop.xlane.xlu0 %4012 }
0x1a3e   :  { %v4017_v54 = vsub.f32 %v4001_v20, %v4013_v3 }
0x1a40   :  { %v4024_v12 = vmul.f32 1.442695, %v4017_v54 }
0x1a42   :  { %6015 = vpow2.f32 %v4024_v12 }
0x1a45   :  { %v4007_v53 = vpop.xlane.xlu0 %4006 }
0x1a46   :  { %v4015_v23 = vsub.f32 %v3999_v49, %v4007_v53  ;;  %v7366_v53 = vpop.permute.xlu2 %4614 }
0x1a48   :  { %v6016_v5 = vpop.eup %6015  ;;  %v4020_v43 = vmul.f32 1.442695, %v4015_v23 }
0x1a49   :  { %v4035_v47 = vsel %vm253_vm14, %v6016_v5, 0.0 }
0x1a4a   :  { %4036 = vadd.xlane.f32.xlu1 %v4035_v47  ;;  %6017 = vpow2.f32 %v4020_v43 }
0x1a50   :  { %v7342_v25 = vpop.eup %6017 }
0x1a51   :  { %v4029_v48 = vsel %vm253_vm14, %v7342_v25, 0.0 }
0x1a52   :  { %4009 = vmax.xlane.f32.xlu1 %v4008_v37 }
0x1a5a   :  { %4030 = vadd.xlane.f32.xlu1 %v4029_v48 }
0x1a73   :  { %5834 = vrot.lane.b32.xlu1 %v5833_v33, %s6176_s2 }
0x1a7a   :  { %v4028_v6 = vpop.xlane.xlu0 %4027 }
0x1a7b   :  { %4247 = vrot.lane.b32.xlu1 %v7272_v39, %s6179_s26  ;;  %vm4043_vm12 = vweird.f32 %v4028_v6  ;;  %v4049_v50 = vand.u32 2147483648, %v4028_v6  ;;  %v4047_v54 = vand.u32 2147483647, %v4028_v6 }
0x1a7d   :  { %v4050_v23 = vor.u32 1.1754944e-38, %v4049_v50 }
0x1a83   :  { %4275 = vrot.lane.b32.xlu1 %v7276_v26, %s6179_s26 }
0x1abd   :  { %v4037_v28 = vpop.xlane.xlu1 %4036 }
0x1abe   :  { %6019 = vrcp.f32 %v4037_v28  ;;  %v4091_v59 = vand.u32 2147483648, %v4037_v28  ;;  %v4089_v4 = vand.u32 2147483647, %v4037_v28  ;;  %vm4085_vm6 = vweird.f32 %v4037_v28 }
0x1abf   :  { %6021 = vrcp.f32 %v4028_v6 }
0x1ac0   :  { %v4092_v9 = vor.u32 1.1754944e-38, %v4091_v59  ;;  %vm4090_vm10 = vcmp.eq.f32.partialorder %v4089_v4, 8.507059e+37 }
0x1ac4   :  { %v6020_v35 = vpop.eup %6019 }
0x1ac5   :  { %v4081_v11 = vmul.f32 %v6020_v35, %v4037_v28  ;;  %v4010_v55 = vpop.xlane.xlu1 %4009  ;;  %vm4086_vm3 = vweird.f32 %v6020_v35  ;;  %v6022_v10 = vpop.eup %6021  ;;  %v3728_v28 = vld [vmem:[#allocation5 + $0x190] sm:$0xff] }
0x1ac6   :  { %v4016_v32 = vsub.f32 %v4000_v41, %v4010_v55  ;;  %vm4087_vm9 = vmor %vm4085_vm6, %vm4086_vm3  ;;  %v4039_v1 = vmul.f32 %v6022_v10, %v4028_v6  ;;  %vm4044_vm8 = vweird.f32 %v6022_v10  ;;  %vm4048_vm6 = vcmp.eq.f32.partialorder %v4047_v54, 8.507059e+37 }
0x1ac7   :  { %v4082_v57 = vsub.f32 1.0, %v4081_v11  ;;  %vm4045_vm13 = vmor %vm4043_vm12, %vm4044_vm8 }
0x1ac8   :  { %v4022_v31 = vmul.f32 1.442695, %v4016_v32  ;;  %v4040_v20 = vsub.f32 1.0, %v4039_v1 }
0x1ac9   :  { %v4083_v61 = vmul.f32 %v6020_v35, %v4082_v57 }
0x1aca   :  { %6023 = vpow2.f32 %v4022_v31  ;;  %v4041_v0 = vmul.f32 %v6022_v10, %v4040_v20 }
0x1acb   :  { %v4084_v60 = vadd.f32 %v6020_v35, %v4083_v61 }
0x1acc   :  { %v4042_v63 = vadd.f32 %v6022_v10, %v4041_v0 }
0x1acd   :  { %v4088_v58 = vsel %vm4087_vm9, %v6020_v35, %v4084_v60  ;;  %v4031_v44 = vpop.xlane.xlu1 %4030  ;;  %v4671_v35 = vpop.permute.xlu2 %4670 }
0x1ace   :  { %v4093_v8 = vsel %vm4090_vm10, %v4092_v9, %v4088_v58  ;;  %6025 = vrcp.f32 %v4031_v44  ;;  %v4063_v3 = vand.u32 2147483648, %v4031_v44  ;;  %vm4057_vm2 = vweird.f32 %v4031_v44 }
0x1acf   :  { %v4097_v34 = vmul.f32 %v6016_v5, %v4093_v8  ;;  %v4061_v12 = vand.u32 2147483647, %v4031_v44  ;;  %v4046_v29 = vsel %vm4045_vm13, %v6022_v10, %v4042_v63 }
0x1ad0   :  { %v7357_v46 = vpop.eup %6023  ;;  %v4064_v47 = vor.u32 1.1754944e-38, %v4063_v3 }
0x1ad1   :  { %5727 = vmatmul.msk.f32.vlgmr.msrb.gmra.mxu0 %vm253_vm14, %v4097_v34  ;;  %v4032_v18 = vsel %vm253_vm14, %v7357_v46, 0.0  ;;  %vm4062_vm9 = vcmp.eq.f32.partialorder %v4061_v12, 8.507059e+37 }
0x1ad2   :  { %4033 = vadd.xlane.f32.xlu0 %v4032_v18 }
0x1ad4   :  { %v6026_v40 = vpop.eup %6025 }
0x1ad5   :  { %v4053_v51 = vmul.f32 %v6026_v40, %v4031_v44  ;;  %vm4058_vm11 = vweird.f32 %v6026_v40  ;;  %v4613_v54 = vpop.permute.xlu2 %4612 }
0x1ad6   :  { %vm4059_vm3 = vmor %vm4057_vm2, %vm4058_vm11 }
0x1ad7   :  { %v4054_v49 = vsub.f32 1.0, %v4053_v51 }
0x1ad9   :  { %v4055_v36 = vmul.f32 %v6026_v40, %v4054_v49  ;;  %5737 = vmatmul.msk.f32.vlgmr.msra.gmra.mxu0 %vm253_vm14, %v7332_v19  ;;  %v4051_v19 = vsel %vm4048_vm6, %v4050_v23, %v4046_v29 }
0x1ada   :  { %v4094_v48 = vmul.f32 %v7334_v15, %v4051_v19 }
0x1adb   :  { %v4056_v2 = vadd.f32 %v6026_v40, %v4055_v36 }
0x1add   :  { %v4060_v5 = vsel %vm4059_vm3, %v6026_v40, %v4056_v2  ;;  %v4669_v23 = vpop.permute.xlu2 %4668 }
0x1ade   :  { %v4065_v17 = vsel %vm4062_vm9, %v4064_v47, %v4060_v5 }
0x1adf   :  { %v4095_v33 = vmul.f32 %v7342_v25, %v4065_v17 }
0x1ae5   :  { %v5835_v43 = vpop.permute.xlu1 %5834 }
0x1ae6   :  { %v5837_v41 = vunpack.i.h.bf16 %v5835_v43  ;;  %v5836_v37 = vunpack.i.l.bf16 %v5835_v43  ;;  %4150 = vrot.lane.b32.xlu0 %v7280_v22, %s6176_s2 }
0x1ae8   :  { %4119 = vmatpush.msra.mxu1 %v5836_v37  ;;  %4145 = vmatpush.msrb.mxu2 %v5837_v41 }
0x1ae9   :  { %5724 = vmatmul.msk.f32.vlgmr.msra.gmra.mxu1 %vm253_vm14, %v4094_v48  ;;  %5725 = vmatmul.msk.f32.vlgmr.msrb.gmra.mxu2 %vm253_vm14, %v4095_v33 }
0x1aea   :  { %4229 = vmatpush.msrb.mxu1 %v3728_v28  ;;  %5732 = vmatpush.xpose.msk.msra.mxu2 %vm253_vm14, %v7353_v56 }
0x1aec   :  { %5752 = vmatpush.xpose.msk.msra.mxu1 %vm253_vm14, %v4671_v35 }
0x1aed   :  { %v4248_v15 = vpop.permute.xlu1 %4247 }
0x1aee   :  { %4277 = vrot.lane.b32.xlu0 %v7276_v26, %s6178_s1 }
0x1af1   :  { %5733 = vmatmul.msk.f32.vlgmr.msra.gmra.mxu2 %vm253_vm14, %v4248_v15  ;;  %v4697_v15 = vpop.permute.xlu2 %4696 }
0x1af5   :  { %v4276_v18 = vpop.permute.xlu1 %4275 }
0x1af6   :  { %4333 = vrot.lane.b32.xlu0 %v7284_v16, %s6178_s1 }
0x1b45   :  { %v4034_v25 = vpop.xlane.xlu0 %4033 }
0x1b46   :  { %6027 = vrcp.f32 %v4034_v25  ;;  %v4077_v57 = vand.u32 2147483648, %v4034_v25  ;;  %v4075_v56 = vand.u32 2147483647, %v4034_v25  ;;  %vm4071_vm8 = vweird.f32 %v4034_v25 }
0x1b48   :  { %v4078_v61 = vor.u32 1.1754944e-38, %v4077_v57  ;;  %vm4076_vm12 = vcmp.eq.f32.partialorder %v4075_v56, 8.507059e+37 }
0x1b4c   :  { %v6028_v6 = vpop.eup %6027 }
0x1b4d   :  { %v4067_v11 = vmul.f32 %v6028_v6, %v4034_v25  ;;  %vm4072_vm10 = vweird.f32 %v6028_v6 }
0x1b4e   :  { %v4199_v55 = vpop.f32.mrf.mxu0  ;;  %vm4073_vm11 = vmor %vm4071_vm8, %vm4072_vm10 }
0x1b4f   :  { %v4068_v32 = vsub.f32 1.0, %v4067_v11 }
0x1b51   :  { %v4069_v59 = vmul.f32 %v6028_v6, %v4068_v32 }
0x1b53   :  { %v4070_v31 = vadd.f32 %v6028_v6, %v4069_v59 }
0x1b55   :  { %v4074_v4 = vsel %vm4073_vm11, %v6028_v6, %v4070_v31  ;;  %v7422_v6 = vperm.slane %v7257_v45, 5 }
0x1b56   :  { %v4079_v60 = vsel %vm4076_vm12, %v4078_v61, %v4074_v4  ;;  %v4328_v9 = vpop.f32.mrf.mxu0 }
0x1b57   :  { %v4096_v58 = vmul.f32 %v7357_v46, %v4079_v60  ;;  %v4361_v44 = vmul.f32 0.35355338, %v4328_v9  ;;  %v3884_v56 = vadd.f32 %v7422_v6, %v7223_v21  ;;  %v3885_v21 = vadd.f32 %v7422_v6, %v7228_v13 }
0x1b58   :  { %v4151_v10 = vpop.permute.xlu0 %4150 }
0x1b59   :  { %v4365_v8 = vsel %vm6324_vm5, -1e+30, %v4361_v44  ;;  %4171 = vmatpush.msra.mxu3 %v4151_v10 }
0x1b5a   :  { %5726 = vmatmul.msk.f32.vlgmr.msra.gmra.mxu3 %vm253_vm14, %v4096_v58  ;;  %v4373_v34 = vsel %vm253_vm14, %v4365_v8, -inf }
0x1b5b   :  { %4374 = vmax.xlane.f32.xlu1 %v4373_v34 }
0x1b60   :  { %v4278_v1 = vpop.permute.xlu0 %4277 }
0x1b61   :  { %5734 = vmatpush.xpose.msk.msrb.mxu3 %vm253_vm14, %v4278_v1 }
0x1b64   :  { %5735 = vmatmul.msk.f32.vlgmr.msrb.gmra.mxu3 %vm253_vm14, %v4276_v18 }
0x1b66   :  { %v4121_v40 = vpop.f32.mrf.mxu1 }
0x1b67   :  { %5728 = vmatmul.msk.f32.vlgmr.msrb.gmra.mxu1 %vm253_vm14, %v4121_v40 }
0x1b68   :  { %v4334_v46 = vpop.permute.xlu0 %4333 }
0x1b69   :  { %5738 = vmatpush.xpose.msk.msrb.mxu2 %vm253_vm14, %v4334_v46 }
0x1b6c   :  { %5739 = vmatmul.msk.f32.vlgmr.msrb.gmra.mxu2 %vm253_vm14, %v7355_v24  ;;  %v4147_v20 = vpop.f32.mrf.mxu2 }
0x1b6d   :  { %4536 = vmatpush.msra.mxu2 %v7362_v38 }
0x1b6f   :  { %5748 = vmatpush.xpose.msk.msrb.mxu2 %vm253_vm14, %v7366_v53  ;;  %5729 = vmatmul.msk.f32.gmra.mxu1 %vm253_vm14, %v4147_v20 }
0x1b74   :  { %4698 = vrot.lane.b32.xlu1 %v7284_v16, %s6181_s28  ;;  %v4272_v36 = vpop.f32.mrf.mxu2 }
0x1b75   :  { %v4359_v2 = vmul.f32 0.35355338, %v4272_v36 }
0x1b77   :  { %v4363_v50 = vsel %vm6300_vm1, -1e+30, %v4359_v2 }
0x1b78   :  { %v4367_v3 = vsel %vm253_vm14, %v4363_v50, -inf }
0x1bce   :  { %v4375_v51 = vpop.xlane.xlu1 %4374 }
0x1bcf   :  { %v4381_v49 = vsub.f32 %v4365_v8, %v4375_v51 }
0x1bd1   :  { %v4387_v0 = vmul.f32 1.442695, %v4381_v49 }
0x1bd3   :  { %6029 = vpow2.f32 %v4387_v0 }
0x1bd9   :  { %v6030_v63 = vpop.eup %6029 }
0x1bda   :  { %v4397_v38 = vsel %vm253_vm14, %v6030_v63, 0.0 }
0x1bdb   :  { %4398 = vadd.xlane.f32.xlu0 %v4397_v38 }
0x1bdd   :  { %v4173_v24 = vpop.f32.mrf.mxu3 }
0x1bde   :  { %5730 = vmatmul.msk.f32.gmra.mxu1 %vm253_vm14, %v4173_v24 }
0x1be3   :  { %4368 = vmax.xlane.f32.xlu0 %v4367_v3 }
0x1be4   :  { %v7417_v41 = vpop.f32.mrf.mxu1 }
0x1be6   :  { %5731 = vmatmul.msk.f32.gmra.mxu1 %vm253_vm14, %v4199_v55  ;;  %v4699_v34 = vpop.permute.xlu1 %4698 }
0x1be7   :  { %v4300_v12 = vpop.f32.mrf.mxu3 }
0x1be8   :  { %v4360_v53 = vmul.f32 0.35355338, %v4300_v12 }
0x1bea   :  { %v4364_v29 = vsel %vm6364_vm7, -1e+30, %v4360_v53 }
0x1beb   :  { %v4370_v5 = vsel %vm253_vm14, %v4364_v29, -inf }
0x1bec   :  { %4371 = vmax.xlane.f32.xlu2 %v4370_v5  ;;  %v7419_v48 = vpop.f32.mrf.mxu1 }
0x1bee   :  { %5753 = vmatmul.msk.f32.vlgmr.msra.gmra.mxu1 %vm253_vm14, %v4669_v23 }
0x1bef   :  { %v4356_v47 = vpop.f32.mrf.mxu2 }
0x1bf0   :  { %v4362_v19 = vmul.f32 0.35355338, %v4356_v47 }
0x1bf2   :  { %v7411_v17 = vsel %vm6316_vm4, -1e+30, %v4362_v19 }
0x1bf3   :  { %v4376_v43 = vsel %vm253_vm14, %v7411_v17, -inf }
0x1bf4   :  { %4377 = vmax.xlane.f32.xlu0 %v4376_v43 }
0x1c04   :  { %4489 = vrot.lane.b32.xlu2 %v7276_v26, %s6180_s27 }
0x1c4e   :  { %v4399_v37 = vpop.xlane.xlu0 %4398 }
0x1c4f   :  { %6031 = vrcp.f32 %v4399_v37  ;;  %v4442_v55 = vand.u32 2147483648, %v4399_v37  ;;  %v4440_v59 = vand.u32 2147483647, %v4399_v37  ;;  %vm4436_vm2 = vweird.f32 %v4399_v37 }
0x1c51   :  { %v4443_v60 = vor.u32 1.1754944e-38, %v4442_v55  ;;  %vm4441_vm6 = vcmp.eq.f32.partialorder %v4440_v59, 8.507059e+37 }
0x1c55   :  { %v6032_v33 = vpop.eup %6031 }
0x1c56   :  { %v4432_v28 = vmul.f32 %v6032_v33, %v4399_v37  ;;  %v4369_v35 = vpop.xlane.xlu0 %4368  ;;  %vm4437_vm13 = vweird.f32 %v6032_v33 }
0x1c57   :  { %v4379_v25 = vsub.f32 %v4363_v50, %v4369_v35  ;;  %vm4438_vm3 = vmor %vm4436_vm2, %vm4437_vm13 }
0x1c58   :  { %v4433_v11 = vsub.f32 1.0, %v4432_v28 }
0x1c59   :  { %v4383_v32 = vmul.f32 1.442695, %v4379_v25 }
0x1c5a   :  { %v4434_v57 = vmul.f32 %v6032_v33, %v4433_v11 }
0x1c5b   :  { %6033 = vpow2.f32 %v4383_v32  ;;  %v4237_v31 = vpop.f32.mrf.mxu1 }
0x1c5c   :  { %v4435_v61 = vadd.f32 %v6032_v33, %v4434_v57  ;;  %v7426_v4 = vadd.f32 %v4237_v31, %v3884_v56 }
0x1c5e   :  { %v4439_v9 = vsel %vm4438_vm3, %v6032_v33, %v4435_v61 }
0x1c5f   :  { %v4444_v45 = vsel %vm4441_vm6, %v4443_v60, %v4439_v9  ;;  %v4372_v58 = vpop.xlane.xlu2 %4371 }
0x1c60   :  { %v4461_v44 = vmul.f32 %v6030_v63, %v4444_v45  ;;  %v4380_v10 = vsub.f32 %v4364_v29, %v4372_v58 }
0x1c61   :  { %v6034_v8 = vpop.eup %6033 }
0x1c62   :  { %v4385_v1 = vmul.f32 1.442695, %v4380_v10  ;;  %5742 = vmatmul.msk.f32.vlgmr.msra.gmra.mxu2 %vm253_vm14, %v4461_v44  ;;  %v4391_v18 = vsel %vm253_vm14, %v6034_v8, 0.0 }
0x1c63   :  { %5754 = vmatpush.xpose.msk.msra.mxu2 %vm253_vm14, %v4699_v34  ;;  %v4240_v40 = vpop.f32.mrf.mxu1  ;;  %4392 = vadd.xlane.f32.xlu0 %v4391_v18 }
0x1c64   :  { %6035 = vpow2.f32 %v4385_v1  ;;  %v7433_v46 = vadd.f32 %v4240_v40, %v3885_v21 }
0x1c67   :  { %v4490_v20 = vpop.permute.xlu2 %4489  ;;  %v4378_v38 = vpop.xlane.xlu0 %4377 }
0x1c68   :  { %4510 = vmatpush.msrb.mxu0 %v4490_v20  ;;  %v4382_v2 = vsub.f32 %v7411_v17, %v4378_v38 }
0x1c6a   :  { %v7435_v51 = vpop.eup %6035  ;;  %5749 = vmatmul.msk.f32.vlgmr.msrb.gmra.mxu2 %vm253_vm14, %v4613_v54  ;;  %v4389_v24 = vmul.f32 1.442695, %v4382_v2 }
0x1c6b   :  { %v4693_v49 = vpop.f32.mrf.mxu1  ;;  %v4394_v0 = vsel %vm253_vm14, %v7435_v51, 0.0 }
0x1c6c   :  { %v4726_v13 = vmul.f32 0.35355338, %v4693_v49  ;;  %4395 = vadd.xlane.f32.xlu1 %v4394_v0  ;;  %6037 = vpow2.f32 %v4389_v24 }
0x1c6e   :  { %v4730_v36 = vsel %vm6324_vm5, -1e+30, %v4726_v13 }
0x1c6f   :  { %v4738_v63 = vsel %vm253_vm14, %v4730_v36, -inf }
0x1c70   :  { %4739 = vmax.xlane.f32.xlu2 %v4738_v63 }
0x1c72   :  { %5755 = vmatmul.msk.f32.vlgmr.msra.gmra.mxu2 %vm253_vm14, %v4697_v15  ;;  %v7455_v50 = vpop.eup %6037 }
0x1c73   :  { %v4400_v3 = vsel %vm253_vm14, %v7455_v50, 0.0 }
0x1c77   :  { %4463 = vrot.lane.b32.xlu0 %v7272_v39, %s6180_s27 }
0x1c85   :  { %4541 = vrot.lane.b32.xlu1 %v7284_v16, %s6180_s27 }
0x1c88   :  { %4642 = vrot.lane.b32.xlu2 %v7276_v26, %s6181_s28 }
0x1c90   :  { %4828 = vrot.lane.b32.xlu2 %v7272_v39, %s6183_s30 }
0x1c98   :  { %4977 = vrot.lane.b32.xlu2 %v7272_v39, %s6185_s5 }
0x1ca0   :  { %5007 = vrot.lane.b32.xlu2 %v7276_v26, %s6184_s4 }
0x1ca1   :  { %4401 = vadd.xlane.f32.xlu0 %v4400_v3 }
0x1ca8   :  { %5063 = vrot.lane.b32.xlu2 %v7284_v16, %s6184_s4 }
0x1cd6   :  { %v4393_v54 = vpop.xlane.xlu0 %4392 }
0x1cd7   :  { %6039 = vrcp.f32 %v4393_v54  ;;  %v4414_v23 = vand.u32 2147483648, %v4393_v54  ;;  %v4412_v19 = vand.u32 2147483647, %v4393_v54  ;;  %vm4408_vm10 = vweird.f32 %v4393_v54 }
0x1cd9   :  { %v4415_v43 = vor.u32 1.1754944e-38, %v4414_v23  ;;  %vm4413_vm11 = vcmp.eq.f32.partialorder %v4412_v19, 8.507059e+37  ;;  %v3729_v19 = vld [vmem:[#allocation5 + $0x198] sm:$0xff] }
0x1cda   :  { %4594 = vmatpush.msra.mxu0 %v3729_v19 }
0x1cdd   :  { %v6040_v12 = vpop.eup %6039 }
0x1cde   :  { %v4404_v53 = vmul.f32 %v6040_v12, %v4393_v54  ;;  %vm4409_vm9 = vweird.f32 %v6040_v12 }
0x1cdf   :  { %v4396_v29 = vpop.xlane.xlu1 %4395  ;;  %vm4410_vm8 = vmor %vm4408_vm10, %vm4409_vm9 }
0x1ce0   :  { %v4405_v5 = vsub.f32 1.0, %v4404_v53  ;;  %6041 = vrcp.f32 %v4396_v29  ;;  %v4428_v59 = vand.u32 2147483648, %v4396_v29  ;;  %v4426_v31 = vand.u32 2147483647, %v4396_v29 }
0x1ce1   :  { %vm4422_vm13 = vweird.f32 %v4396_v29 }
0x1ce2   :  { %v4406_v47 = vmul.f32 %v6040_v12, %v4405_v5  ;;  %v4429_v45 = vor.u32 1.1754944e-38, %v4428_v59  ;;  %vm4427_vm3 = vcmp.eq.f32.partialorder %v4426_v31, 8.507059e+37 }
0x1ce3   :  { %v4740_v37 = vpop.xlane.xlu2 %4739 }
0x1ce4   :  { %v4407_v17 = vadd.f32 %v6040_v12, %v4406_v47  ;;  %v4746_v55 = vsub.f32 %v4730_v36, %v4740_v37 }
0x1ce5   :  { %v7463_v33 = vpop.f32.mrf.mxu2 }
0x1ce6   :  { %v6042_v28 = vpop.eup %6041  ;;  %v4411_v35 = vsel %vm4410_vm8, %v6040_v12, %v4407_v17  ;;  %v4752_v61 = vmul.f32 1.442695, %v4746_v55 }
0x1ce7   :  { %v4416_v15 = vsel %vm4413_vm11, %v4415_v43, %v4411_v35  ;;  %v4418_v25 = vmul.f32 %v6042_v28, %v4396_v29  ;;  %vm4423_vm12 = vweird.f32 %v6042_v28 }
0x1ce8   :  { %v4459_v11 = vmul.f32 %v6034_v8, %v4416_v15  ;;  %vm4424_vm2 = vmor %vm4422_vm13, %vm4423_vm12  ;;  %6043 = vpow2.f32 %v4752_v61 }
0x1ce9   :  { %v4419_v32 = vsub.f32 1.0, %v4418_v25  ;;  %v4464_v57 = vpop.permute.xlu0 %4463 }
0x1cea   :  { %4484 = vmatpush.msra.mxu3 %v4464_v57 }
0x1ceb   :  { %v4420_v56 = vmul.f32 %v6042_v28, %v4419_v32  ;;  %5740 = vmatmul.msk.f32.vlgmr.msra.gmra.mxu3 %vm253_vm14, %v4459_v11  ;;  %v4643_v49 = vpop.permute.xlu2 %4642 }
0x1ced   :  { %v4421_v60 = vadd.f32 %v6042_v28, %v4420_v56  ;;  %v4637_v9 = vpop.f32.mrf.mxu2 }
0x1cee   :  { %v4724_v58 = vmul.f32 0.35355338, %v4637_v9  ;;  %v7471_v18 = vpop.eup %6043 }
0x1cef   :  { %v4425_v44 = vsel %vm4424_vm2, %v6042_v28, %v4421_v60 }
0x1cf0   :  { %v4430_v10 = vsel %vm4427_vm3, %v4429_v45, %v4425_v44  ;;  %v4728_v8 = vsel %vm6300_vm1, -1e+30, %v4724_v58 }
0x1cf1   :  { %v4460_v34 = vmul.f32 %v7435_v51, %v4430_v10  ;;  %v4732_v1 = vsel %vm253_vm14, %v4728_v8, -inf  ;;  %v4762_v51 = vsel %vm253_vm14, %v7471_v18, 0.0 }
0x1cf2   :  { %4733 = vmax.xlane.f32.xlu0 %v4732_v1 }
0x1cf3   :  { %5741 = vmatmul.msk.f32.vlgmr.msrb.gmra.mxu0 %vm253_vm14, %v4460_v34  ;;  %v4829_v47 = vpop.permute.xlu2 %4828 }
0x1cf5   :  { %v4721_v21 = vpop.f32.mrf.mxu2 }
0x1cf6   :  { %v4727_v40 = vmul.f32 0.35355338, %v4721_v21 }
0x1cf7   :  { %v4542_v20 = vpop.permute.xlu1 %4541 }
0x1cf8   :  { %v4731_v0 = vsel %vm6316_vm4, -1e+30, %v4727_v40  ;;  %4562 = vmatpush.msrb.mxu3 %v4542_v20 }
0x1cf9   :  { %v4741_v13 = vsel %vm253_vm14, %v4731_v0, -inf }
0x1cfa   :  { %5750 = vmatpush.xpose.msk.msra.mxu3 %vm253_vm14, %v4643_v49  ;;  %4742 = vmax.xlane.f32.xlu1 %v4741_v13 }
0x1cfb   :  { %4763 = vadd.xlane.f32.xlu0 %v4762_v51  ;;  %v4978_v57 = vpop.permute.xlu2 %4977 }
0x1d03   :  { %v5008_v10 = vpop.permute.xlu2 %5007 }
0x1d0f   :  { %4640 = vrot.lane.b32.xlu0 %v7276_v26, %s6182_s29 }
0x1d13   :  { %4880 = vrot.lane.b32.xlu1 %v7280_v22, %s6183_s30 }
0x1d14   :  { %v4402_v36 = vpop.xlane.xlu0 %4401 }
0x1d15   :  { %6045 = vrcp.f32 %v4402_v36  ;;  %v4456_v24 = vand.u32 2147483648, %v4402_v36  ;;  %v4454_v54 = vand.u32 2147483647, %v4402_v36  ;;  %vm4450_vm9 = vweird.f32 %v4402_v36 }
0x1d17   :  { %4979 = vrot.lane.b32.xlu0 %v7272_v39, %s6184_s4  ;;  %v4457_v53 = vor.u32 1.1754944e-38, %v4456_v24  ;;  %vm4455_vm8 = vcmp.eq.f32.partialorder %v4454_v54, 8.507059e+37 }
0x1d1b   :  { %v6046_v63 = vpop.eup %6045  ;;  %5035 = vrot.lane.b32.xlu1 %v7280_v22, %s6184_s4 }
0x1d1c   :  { %v4446_v38 = vmul.f32 %v6046_v63, %v4402_v36  ;;  %vm4451_vm6 = vweird.f32 %v6046_v63 }
0x1d1d   :  { %vm4452_vm10 = vmor %vm4450_vm9, %vm4451_vm6 }
0x1d1e   :  { %v4447_v2 = vsub.f32 1.0, %v4446_v38  ;;  %v3882_v38 = vadd.f32 %v7422_v6, %v7213_v30 }
0x1d1f   :  { %4906 = vrot.lane.b32.xlu0 %v7284_v16, %s6183_s30 }
0x1d20   :  { %v4448_v3 = vmul.f32 %v6046_v63, %v4447_v2  ;;  %v4243_v2 = vadd.f32 %v7417_v41, %v3882_v38 }
0x1d22   :  { %v4449_v12 = vadd.f32 %v6046_v63, %v4448_v3 }
0x1d23   :  { %5061 = vrot.lane.b32.xlu1 %v7284_v16, %s6185_s5 }
0x1d24   :  { %v4453_v29 = vsel %vm4452_vm10, %v6046_v63, %v4449_v12 }
0x1d25   :  { %v4458_v5 = vsel %vm4455_vm8, %v4457_v53, %v4453_v29 }
0x1d26   :  { %v4462_v23 = vmul.f32 %v7455_v50, %v4458_v5 }
0x1d27   :  { %5005 = vrot.lane.b32.xlu0 %v7276_v26, %s6185_s5 }
0x1d28   :  { %5743 = vmatmul.msk.f32.vlgmr.msrb.gmra.mxu3 %vm253_vm14, %v4462_v23  ;;  %v3883_v23 = vadd.f32 %v7422_v6, %v7218_v27 }
0x1d29   :  { %4849 = vmatpush.msrb.mxu3 %v4829_v47 }
0x1d65   :  { %v4734_v17 = vpop.xlane.xlu0 %4733 }
0x1d66   :  { %v4744_v43 = vsub.f32 %v4728_v8, %v4734_v17  ;;  %v4244_v17 = vadd.f32 %v7419_v48, %v3883_v23 }
0x1d68   :  { %v4748_v37 = vmul.f32 1.442695, %v4744_v43 }
0x1d6a   :  { %6047 = vpow2.f32 %v4748_v37 }
0x1d6d   :  { %v4743_v28 = vpop.xlane.xlu1 %4742 }
0x1d6e   :  { %v4764_v35 = vpop.xlane.xlu0 %4763  ;;  %v4747_v15 = vsub.f32 %v4731_v0, %v4743_v28  ;;  %v4486_v25 = vpop.f32.mrf.mxu3 }
0x1d6f   :  { %6049 = vrcp.f32 %v4764_v35  ;;  %5744 = vmatmul.msk.f32.vlgmr.msra.gmra.mxu0 %vm253_vm14, %v4486_v25  ;;  %v4807_v58 = vand.u32 2147483648, %v4764_v35  ;;  %vm4801_vm12 = vweird.f32 %v4764_v35  ;;  %v4805_v44 = vand.u32 2147483647, %v4764_v35  ;;  %v5064_v0 = vpop.permute.xlu2 %5063 }
0x1d70   :  { %v7496_v50 = vpop.eup %6047  ;;  %v4754_v11 = vmul.f32 1.442695, %v4747_v15  ;;  %v4512_v56 = vpop.f32.mrf.mxu0 }
0x1d71   :  { %v4756_v55 = vsel %vm253_vm14, %v7496_v50, 0.0  ;;  %v4808_v34 = vor.u32 1.1754944e-38, %v4807_v58  ;;  %vm4806_vm2 = vcmp.eq.f32.partialorder %v4805_v44, 8.507059e+37 }
0x1d72   :  { %6051 = vpow2.f32 %v4754_v11  ;;  %4757 = vadd.xlane.f32.xlu0 %v4756_v55 }
0x1d75   :  { %v6050_v32 = vpop.eup %6049 }
0x1d76   :  { %v4797_v59 = vmul.f32 %v6050_v32, %v4764_v35  ;;  %vm4802_vm11 = vweird.f32 %v6050_v32 }
0x1d77   :  { %5745 = vmatmul.msk.f32.gmra.mxu0 %vm253_vm14, %v4512_v56  ;;  %vm4803_vm13 = vmor %vm4801_vm12, %vm4802_vm11 }
0x1d78   :  { %v4798_v31 = vsub.f32 1.0, %v4797_v59  ;;  %v7501_v61 = vpop.eup %6051 }
0x1d79   :  { %v4765_v9 = vsel %vm253_vm14, %v7501_v61, 0.0 }
0x1d7a   :  { %v4799_v60 = vmul.f32 %v6050_v32, %v4798_v31  ;;  %4766 = vadd.xlane.f32.xlu0 %v4765_v9 }
0x1d7c   :  { %v4800_v45 = vadd.f32 %v6050_v32, %v4799_v60 }
0x1d7e   :  { %v4804_v8 = vsel %vm4803_vm13, %v6050_v32, %v4800_v45 }
0x1d7f   :  { %5746 = vmatmul.msk.f32.gmra.mxu0 %vm253_vm14, %v7463_v33  ;;  %v4809_v21 = vsel %vm4806_vm2, %v4808_v34, %v4804_v8 }
0x1d80   :  { %v4826_v40 = vmul.f32 %v7471_v18, %v4809_v21 }
0x1d81   :  { %v4641_v1 = vpop.permute.xlu0 %4640 }
0x1d82   :  { %5751 = vmatmul.msk.f32.vlgmr.msra.gmra.mxu3 %vm253_vm14, %v4641_v1 }
0x1d85   :  { %v4881_v20 = vpop.permute.xlu1 %4880 }
0x1d86   :  { %4901 = vmatpush.msrb.mxu2 %v4881_v20 }
0x1d87   :  { %5758 = vmatmul.msk.f32.vlgmr.msrb.gmra.mxu2 %vm253_vm14, %v4826_v40 }
0x1d89   :  { %v4980_v49 = vpop.permute.xlu0 %4979 }
0x1d8a   :  { %5764 = vmatpush.xpose.msk.msra.mxu2 %vm253_vm14, %v4980_v49 }
0x1d8d   :  { %v5036_v13 = vpop.permute.xlu1 %5035 }
0x1d8e   :  { %5770 = vmatpush.xpose.msk.msrb.mxu2 %vm253_vm14, %v5064_v0  ;;  %5768 = vmatpush.xpose.msk.msrb.mxu0 %vm253_vm14, %v5036_v13 }
0x1d8f   :  { %5033 = vrot.lane.b32.xlu0 %v7280_v22, %s6185_s5  ;;  %5765 = vmatmul.msk.f32.vlgmr.msra.gmra.mxu2 %vm253_vm14, %v4978_v57 }
0x1d91   :  { %v4907_v33 = vpop.permute.xlu0 %4906 }
0x1d92   :  { %4927 = vmatpush.msra.mxu3 %v4907_v33 }
0x1d95   :  { %v5062_v18 = vpop.permute.xlu1 %5061 }
0x1d97   :  { %5771 = vmatmul.msk.f32.vlgmr.msrb.gmra.mxu2 %vm253_vm14, %v5062_v18 }
0x1d99   :  { %v5006_v36 = vpop.permute.xlu0 %5005 }
0x1dab   :  { %v4564_v51 = vpop.f32.mrf.mxu3 }
0x1dac   :  { %5747 = vmatmul.msk.f32.gmra.mxu0 %vm253_vm14, %v4564_v51 }
0x1de5   :  { %v4758_v63 = vpop.xlane.xlu0 %4757 }
0x1de6   :  { %6053 = vrcp.f32 %v4758_v63  ;;  %v4779_v5 = vand.u32 2147483648, %v4758_v63  ;;  %v4777_v19 = vand.u32 2147483647, %v4758_v63  ;;  %vm4773_vm6 = vweird.f32 %v4758_v63 }
0x1de8   :  { %v4780_v43 = vor.u32 1.1754944e-38, %v4779_v5  ;;  %vm4778_vm10 = vcmp.eq.f32.partialorder %v4777_v19, 8.507059e+37 }
0x1dec   :  { %v6054_v24 = vpop.eup %6053  ;;  %v4596_v3 = vpop.f32.mrf.mxu0 }
0x1ded   :  { %v4769_v54 = vmul.f32 %v6054_v24, %v4758_v63  ;;  %v7521_v12 = vadd.f32 %v4596_v3, %v4243_v2  ;;  %v4767_v53 = vpop.xlane.xlu0 %4766  ;;  %vm4774_vm3 = vweird.f32 %v6054_v24 }
0x1dee   :  { %6055 = vrcp.f32 %v4767_v53  ;;  %vm4775_vm9 = vmor %vm4773_vm6, %vm4774_vm3  ;;  %v4821_v6 = vand.u32 2147483648, %v4767_v53  ;;  %v4819_v32 = vand.u32 2147483647, %v4767_v53  ;;  %vm4815_vm11 = vweird.f32 %v4767_v53 }
0x1def   :  { %v4770_v29 = vsub.f32 1.0, %v4769_v54 }
0x1df0   :  { %v4822_v57 = vor.u32 1.1754944e-38, %v4821_v6  ;;  %vm4820_vm13 = vcmp.eq.f32.partialorder %v4819_v32, 8.507059e+37 }
0x1df1   :  { %v4771_v47 = vmul.f32 %v6054_v24, %v4770_v29 }
0x1df3   :  { %v4772_v30 = vadd.f32 %v6054_v24, %v4771_v47 }
0x1df4   :  { %v6056_v41 = vpop.eup %6055  ;;  %v4599_v37 = vpop.f32.mrf.mxu0 }
0x1df5   :  { %v4776_v28 = vsel %vm4775_vm9, %v6054_v24, %v4772_v30  ;;  %v4811_v35 = vmul.f32 %v6056_v41, %v4767_v53  ;;  %v7526_v15 = vadd.f32 %v4599_v37, %v4244_v17  ;;  %vm4816_vm8 = vweird.f32 %v6056_v41 }
0x1df6   :  { %v4781_v25 = vsel %vm4778_vm10, %v4780_v43, %v4776_v28  ;;  %vm4817_vm12 = vmor %vm4815_vm11, %vm4816_vm8 }
0x1df7   :  { %v4824_v11 = vmul.f32 %v7496_v50, %v4781_v25  ;;  %v4812_v27 = vsub.f32 1.0, %v4811_v35 }
0x1df9   :  { %v4813_v55 = vmul.f32 %v6056_v41, %v4812_v27  ;;  %5756 = vmatmul.msk.f32.vlgmr.msrb.gmra.mxu3 %vm253_vm14, %v4824_v11 }
0x1dfa   :  { %5766 = vmatpush.xpose.msk.msrb.mxu3 %vm253_vm14, %v5008_v10 }
0x1dfb   :  { %v4814_v48 = vadd.f32 %v6056_v41, %v4813_v55 }
0x1dfc   :  { %v4602_v59 = vpop.f32.mrf.mxu0 }
0x1dfd   :  { %v4818_v56 = vsel %vm4817_vm12, %v6056_v41, %v4814_v48  ;;  %v7532_v31 = vadd.f32 %v4602_v59, %v7426_v4 }
0x1dfe   :  { %v4823_v50 = vsel %vm4820_vm13, %v4822_v57, %v4818_v56 }
0x1dff   :  { %v4827_v60 = vmul.f32 %v7501_v61, %v4823_v50 }
0x1e01   :  { %v5034_v9 = vpop.permute.xlu0 %5033  ;;  %5759 = vmatmul.msk.f32.vlgmr.msra.gmra.mxu3 %vm253_vm14, %v4827_v60 }
0x1e02   :  { %5769 = vmatmul.msk.f32.vlgmr.msrb.gmra.mxu0 %vm253_vm14, %v5034_v9 }
0x1e05   :  { %v4665_v45 = vpop.f32.mrf.mxu3 }
0x1e06   :  { %v4725_v58 = vmul.f32 0.35355338, %v4665_v45 }
0x1e08   :  { %v4729_v44 = vsel %vm6364_vm7, -1e+30, %v4725_v58 }
0x1e09   :  { %v4735_v10 = vsel %vm253_vm14, %v4729_v44, -inf  ;;  %5767 = vmatmul.msk.f32.vlgmr.msrb.gmra.mxu3 %vm253_vm14, %v5006_v36 }
0x1e0a   :  { %4736 = vmax.xlane.f32.xlu0 %v4735_v10  ;;  %v7541_v4 = vpop.f32.mrf.mxu2 }
0x1e12   :  { %v5002_v8 = vpop.f32.mrf.mxu2 }
0x1e13   :  { %v5089_v34 = vmul.f32 0.35355338, %v5002_v8 }
0x1e15   :  { %v5093_v61 = vsel %vm6300_vm1, -1e+30, %v5089_v34 }
0x1e16   :  { %v5097_v1 = vsel %vm253_vm14, %v5093_v61, -inf }
0x1e17   :  { %5098 = vmax.xlane.f32.xlu2 %v5097_v1 }
0x1e1a   :  { %v5086_v21 = vpop.f32.mrf.mxu2 }
0x1e1b   :  { %v5092_v40 = vmul.f32 0.35355338, %v5086_v21 }
0x1e1d   :  { %v5096_v20 = vsel %vm6316_vm4, -1e+30, %v5092_v40 }
0x1e1e   :  { %v5106_v49 = vsel %vm253_vm14, %v5096_v20, -inf }
0x1e1f   :  { %5107 = vmax.xlane.f32.xlu0 %v5106_v49 }
0x1e29   :  { %v7549_v0 = vpop.f32.mrf.mxu0 }
0x1e7c   :  { %v7551_v13 = vpop.f32.mrf.mxu3 }
0x1e7d   :  { %v4737_v33 = vpop.xlane.xlu0 %4736 }
0x1e7e   :  { %v4745_v18 = vsub.f32 %v4729_v44, %v4737_v33 }
0x1e7f   :  { %v5058_v51 = vpop.f32.mrf.mxu0 }
0x1e80   :  { %v4750_v52 = vmul.f32 1.442695, %v4745_v18  ;;  %v5091_v36 = vmul.f32 0.35355338, %v5058_v51 }
0x1e82   :  { %6057 = vpow2.f32 %v4750_v52  ;;  %v5095_v63 = vsel %vm6324_vm5, -1e+30, %v5091_v36 }
0x1e83   :  { %v5103_v38 = vsel %vm253_vm14, %v5095_v63, -inf }
0x1e84   :  { %5104 = vmax.xlane.f32.xlu2 %v5103_v38  ;;  %v7556_v62 = vpop.f32.mrf.mxu3  ;;  %v5838_v38 = vpack.i.bf16 %v7280_v22, %v7276_v26 }
0x1e88   :  { %v7558_v2 = vpop.eup %6057 }
0x1e89   :  { %v4759_v3 = vsel %vm253_vm14, %v7558_v2, 0.0 }
0x1e8a   :  { %v5099_v24 = vpop.xlane.xlu2 %5098 }
0x1e8b   :  { %v5109_v54 = vsub.f32 %v5093_v61, %v5099_v24 }
0x1e8c   :  { %4760 = vadd.xlane.f32.xlu2 %v4759_v3  ;;  %v5030_v53 = vpop.f32.mrf.mxu3 }
0x1e8d   :  { %v5113_v29 = vmul.f32 1.442695, %v5109_v54  ;;  %v5090_v5 = vmul.f32 0.35355338, %v5030_v53 }
0x1e8f   :  { %6059 = vpow2.f32 %v5113_v29  ;;  %v5094_v7 = vsel %vm6364_vm7, -1e+30, %v5090_v5 }
0x1e90   :  { %v5100_v23 = vsel %vm253_vm14, %v5094_v7, -inf }
0x1e91   :  { %5101 = vmax.xlane.f32.xlu1 %v5100_v23 }
0x1e92   :  { %v5108_v47 = vpop.xlane.xlu0 %5107 }
0x1e93   :  { %v5112_v19 = vsub.f32 %v5096_v20, %v5108_v47 }
0x1e95   :  { %v6060_v17 = vpop.eup %6059  ;;  %v5119_v30 = vmul.f32 1.442695, %v5112_v19 }
0x1e96   :  { %v5121_v41 = vsel %vm253_vm14, %v6060_v17, 0.0 }
0x1e97   :  { %6061 = vpow2.f32 %v5119_v30 }
0x1e99   :  { %5122 = vadd.xlane.f32.xlu1 %v5121_v41 }
0x1e9d   :  { %v6062_v43 = vpop.eup %6061 }
0x1e9e   :  { %v5130_v37 = vsel %vm253_vm14, %v6062_v43, 0.0 }
0x1e9f   :  { %5131 = vadd.xlane.f32.xlu0 %v5130_v37 }
0x1ea4   :  { %5193 = vrot.lane.b32.xlu2 %v7272_v39, %s6186_s6 }
0x1eac   :  { %5271 = vrot.lane.b32.xlu2 %v7284_v16, %s6186_s6 }
0x1ef7   :  { %v5105_v42 = vpop.xlane.xlu2 %5104 }
0x1ef8   :  { %v5111_v28 = vsub.f32 %v5095_v63, %v5105_v42 }
0x1efa   :  { %v5117_v35 = vmul.f32 1.442695, %v5111_v28 }
0x1efc   :  { %6063 = vpow2.f32 %v5117_v35 }
0x1eff   :  { %v7571_v25 = vpop.xlane.xlu2 %4760 }
0x1f00   :  { %vm4787_vm8 = vweird.f32 %v7571_v25  ;;  %v4791_v22 = vand.u32 2147483647, %v7571_v25 }
0x1f02   :  { %v7573_v11 = vpop.eup %6063  ;;  %vm4792_vm12 = vcmp.eq.f32.partialorder %v4791_v22, 8.507059e+37 }
0x1f03   :  { %v5127_v27 = vsel %vm253_vm14, %v7573_v11, 0.0 }
0x1f04   :  { %5128 = vadd.xlane.f32.xlu1 %v5127_v27  ;;  %v5102_v6 = vpop.xlane.xlu1 %5101 }
0x1f05   :  { %v5110_v55 = vsub.f32 %v5094_v7, %v5102_v6 }
0x1f07   :  { %v5194_v32 = vpop.permute.xlu2 %5193  ;;  %v5115_v48 = vmul.f32 1.442695, %v5110_v55  ;;  %v3730_v55 = vld [vmem:[#allocation5 + $0x1a0] sm:$0xff] }
0x1f08   :  { %5214 = vmatpush.msra.mxu3 %v5194_v32 }
0x1f09   :  { %6065 = vpow2.f32 %v5115_v48 }
0x1f0c   :  { %v5123_v39 = vpop.xlane.xlu1 %5122 }
0x1f0d   :  { %6067 = vrcp.f32 %v5123_v39  ;;  %v5144_v45 = vand.u32 2147483648, %v5123_v39  ;;  %v5142_v44 = vand.u32 2147483647, %v5123_v39  ;;  %vm5138_vm4 = vweird.f32 %v5123_v39 }
0x1f0f   :  { %v5272_v16 = vpop.permute.xlu2 %5271  ;;  %v7577_v57 = vpop.eup %6065  ;;  %v5145_v61 = vor.u32 1.1754944e-38, %v5144_v45  ;;  %vm5143_vm7 = vcmp.eq.f32.partialorder %v5142_v44, 8.507059e+37 }
0x1f10   :  { %5292 = vmatpush.msrb.mxu3 %v5272_v16  ;;  %v5124_v59 = vsel %vm253_vm14, %v7577_v57, 0.0 }
0x1f11   :  { %5125 = vadd.xlane.f32.xlu0 %v5124_v59 }
0x1f12   :  { %v5132_v56 = vpop.xlane.xlu0 %5131 }
0x1f13   :  { %v6068_v50 = vpop.eup %6067  ;;  %6069 = vrcp.f32 %v5132_v56  ;;  %v5186_v20 = vand.u32 2147483648, %v5132_v56  ;;  %v5184_v18 = vand.u32 2147483647, %v5132_v56  ;;  %vm5180_vm3 = vweird.f32 %v5132_v56 }
0x1f14   :  { %v5134_v60 = vmul.f32 %v6068_v50, %v5123_v39  ;;  %vm5139_vm1 = vweird.f32 %v6068_v50  ;;  %6071 = vrcp.f32 %v7571_v25 }
0x1f15   :  { %vm5140_vm5 = vmor %vm5138_vm4, %vm5139_vm1  ;;  %v5187_v52 = vor.u32 1.1754944e-38, %v5186_v20  ;;  %vm5185_vm9 = vcmp.eq.f32.partialorder %v5184_v18, 8.507059e+37 }
0x1f16   :  { %v5135_v9 = vsub.f32 1.0, %v5134_v60 }
0x1f18   :  { %v5136_v58 = vmul.f32 %v6068_v50, %v5135_v9 }
0x1f19   :  { %v6070_v10 = vpop.eup %6069 }
0x1f1a   :  { %v5137_v8 = vadd.f32 %v6068_v50, %v5136_v58  ;;  %v5176_v34 = vmul.f32 %v6070_v10, %v5132_v56  ;;  %vm5181_vm2 = vweird.f32 %v6070_v10  ;;  %v6072_v3 = vpop.eup %6071 }
0x1f1b   :  { %vm5182_vm6 = vmor %vm5180_vm3, %vm5181_vm2  ;;  %v4783_v53 = vmul.f32 %v6072_v3, %v7571_v25  ;;  %vm4788_vm10 = vweird.f32 %v6072_v3 }
0x1f1c   :  { %v5141_v1 = vsel %vm5140_vm5, %v6068_v50, %v5137_v8  ;;  %v5177_v21 = vsub.f32 1.0, %v5176_v34  ;;  %vm4789_vm11 = vmor %vm4787_vm8, %vm4788_vm10 }
0x1f1d   :  { %4854 = vrot.lane.b32.xlu1 %v7276_v26, %s6183_s30  ;;  %v5146_v40 = vsel %vm5143_vm7, %v5145_v61, %v5141_v1  ;;  %v4784_v29 = vsub.f32 1.0, %v4783_v53  ;;  %v4793_v26 = vand.u32 2147483648, %v7571_v25  ;;  %v3731_v1 = vld [vmem:[#allocation5 + $0x1a8] sm:$0xff] }
0x1f1e   :  { %v5189_v49 = vmul.f32 %v6060_v17, %v5146_v40  ;;  %v5178_v33 = vmul.f32 %v6070_v10, %v5177_v21 }
0x1f1f   :  { %v4785_v7 = vmul.f32 %v6072_v3, %v4784_v29  ;;  %v4794_v41 = vor.u32 1.1754944e-38, %v4793_v26 }
0x1f20   :  { %v5179_v51 = vadd.f32 %v6070_v10, %v5178_v33  ;;  %5772 = vmatmul.msk.f32.vlgmr.msra.gmra.mxu3 %vm253_vm14, %v5189_v49 }
0x1f21   :  { %v4786_v47 = vadd.f32 %v6072_v3, %v4785_v7 }
0x1f22   :  { %v5183_v36 = vsel %vm5182_vm6, %v6070_v10, %v5179_v51 }
0x1f23   :  { %v5188_v63 = vsel %vm5185_vm9, %v5187_v52, %v5183_v36  ;;  %v4790_v30 = vsel %vm4789_vm11, %v6072_v3, %v4786_v47  ;;  %v4611_v47 = vadd.f32 %v7549_v0, %v7433_v46  ;;  %v3724_v46 = vld [vmem:[#allocation5 + $0x170] sm:$0xff] }
0x1f24   :  { %v5192_v24 = vmul.f32 %v6062_v43, %v5188_v63  ;;  %v4795_v37 = vsel %vm4792_vm12, %v4794_v41, %v4790_v30  ;;  %v3726_v41 = vld [vmem:[#allocation5 + $0x180] sm:$0xff] }
0x1f25   :  { %5839 = vrot.lane.b32.xlu0 %v5838_v38, %s6186_s6  ;;  %v4825_v35 = vmul.f32 %v7558_v2, %v4795_v37  ;;  %v3725_v37 = vld [vmem:[#allocation5 + $0x178] sm:$0xff] }
0x1f28   :  { %5775 = vmatmul.msk.f32.vlgmr.msrb.gmra.mxu3 %vm253_vm14, %v5192_v24 }
0x1f77   :  { %v5129_v54 = vpop.xlane.xlu1 %5128 }
0x1f78   :  { %6073 = vrcp.f32 %v5129_v54  ;;  %v5172_v48 = vand.u32 2147483648, %v5129_v54  ;;  %vm5166_vm4 = vweird.f32 %v5129_v54  ;;  %v5170_v16 = vand.u32 2147483647, %v5129_v54 }
0x1f7a   :  { %v5173_v50 = vor.u32 1.1754944e-38, %v5172_v48  ;;  %vm5171_vm3 = vcmp.eq.f32.partialorder %v5170_v16, 8.507059e+37 }
0x1f7e   :  { %v6074_v5 = vpop.eup %6073 }
0x1f7f   :  { %v5162_v23 = vmul.f32 %v6074_v5, %v5129_v54  ;;  %vm5167_vm13 = vweird.f32 %v6074_v5 }
0x1f80   :  { %vm5168_vm5 = vmor %vm5166_vm4, %vm5167_vm13 }
0x1f81   :  { %v5163_v17 = vsub.f32 1.0, %v5162_v23 }
0x1f83   :  { %v5164_v42 = vmul.f32 %v6074_v5, %v5163_v17  ;;  %v3727_v17 = vld [vmem:[#allocation5 + $0x188] sm:$0xff] }
0x1f84   :  { %v5126_v19 = vpop.xlane.xlu0 %5125 }
0x1f85   :  { %6075 = vrcp.f32 %v5126_v19  ;;  %v5165_v32 = vadd.f32 %v6074_v5, %v5164_v42  ;;  %v5158_v25 = vand.u32 2147483648, %v5126_v19  ;;  %v5156_v59 = vand.u32 2147483647, %v5126_v19 }
0x1f86   :  { %vm5152_vm7 = vweird.f32 %v5126_v19 }
0x1f87   :  { %v5169_v2 = vsel %vm5168_vm5, %v6074_v5, %v5165_v32  ;;  %v5159_v9 = vor.u32 1.1754944e-38, %v5158_v25  ;;  %vm5157_vm6 = vcmp.eq.f32.partialorder %v5156_v59, 8.507059e+37 }
0x1f88   :  { %v5174_v45 = vsel %vm5171_vm3, %v5173_v50, %v5169_v2 }
0x1f89   :  { %v5191_v34 = vmul.f32 %v7573_v11, %v5174_v45 }
0x1f8b   :  { %v6076_v43 = vpop.eup %6075 }
0x1f8c   :  { %v5148_v28 = vmul.f32 %v6076_v43, %v5126_v19  ;;  %vm5153_vm1 = vweird.f32 %v6076_v43 }
0x1f8d   :  { %vm5154_vm2 = vmor %vm5152_vm7, %vm5153_vm1 }
0x1f8e   :  { %v5149_v27 = vsub.f32 1.0, %v5148_v28 }
0x1f8f   :  { %v4855_v6 = vpop.permute.xlu1 %4854 }
0x1f90   :  { %4875 = vmatpush.msrb.mxu1 %v4855_v6  ;;  %v5150_v39 = vmul.f32 %v6076_v43, %v5149_v27 }
0x1f91   :  { %5757 = vmatmul.msk.f32.vlgmr.msrb.gmra.mxu1 %vm253_vm14, %v4825_v35 }
0x1f92   :  { %4959 = vmatpush.msra.mxu1 %v3730_v55  ;;  %v5151_v56 = vadd.f32 %v6076_v43, %v5150_v39 }
0x1f94   :  { %v5155_v60 = vsel %vm5154_vm2, %v6076_v43, %v5151_v56 }
0x1f95   :  { %v5160_v58 = vsel %vm5157_vm6, %v5159_v9, %v5155_v60 }
0x1f96   :  { %v5190_v61 = vmul.f32 %v7577_v57, %v5160_v58 }
0x1f97   :  { %v5840_v44 = vpop.permute.xlu0 %5839 }
0x1f98   :  { %v5842_v10 = vunpack.i.h.bf16 %v5840_v44  ;;  %v5841_v8 = vunpack.i.l.bf16 %v5840_v44 }
0x1f99   :  { %5760 = vmatmul.msk.f32.vlgmr.msra.gmra.mxu1 %vm253_vm14, %v7551_v13 }
0x1f9a   :  { %5240 = vmatpush.msra.mxu0 %v5841_v8  ;;  %5266 = vmatpush.msra.mxu2 %v5842_v10  ;;  %v7656_v8 = vld [vmem:[#allocation5 + $0x1f0] sm:$0xff] }
0x1f9b   :  { %5773 = vmatmul.msk.f32.vlgmr.msra.gmra.mxu0 %vm253_vm14, %v5190_v61  ;;  %5774 = vmatmul.msk.f32.vlgmr.msra.gmra.mxu2 %vm253_vm14, %v5191_v34  ;;  %v7659_v34 = vperm.slane %v7656_v8, 3 }
0x1f9c   :  { %5324 = vmatpush.msrb.mxu0 %v3731_v1  ;;  %5465 = vmatpush.msrb.mxu2 %v3727_v17  ;;  %v7662_v1 = vperm.slane %v7656_v8, 4 }
0x1f9e   :  { %5466 = vmatpush.msrb.mxu2 %v3726_v41 }
0x1fa0   :  { %5467 = vmatpush.msrb.mxu2 %v3725_v37 }
0x1fa2   :  { %5468 = vmatpush.msrb.mxu2 %v3724_v46 }
0x1fa3   :  { %v5216_v21 = vpop.f32.mrf.mxu3 }
0x1fa4   :  { %5776 = vmatmul.msk.f32.vlgmr.msrb.gmra.mxu0 %vm253_vm14, %v5216_v21 }
0x200e   :  { %v4877_v40 = vpop.f32.mrf.mxu1 }
0x200f   :  { %5761 = vmatmul.msk.f32.gmra.mxu1 %vm253_vm14, %v4877_v40 }
0x2016   :  { %v4961_v11 = vpop.f32.mrf.mxu1 }
0x2017   :  { %5762 = vmatmul.msk.f32.gmra.mxu1 %vm253_vm14, %v7541_v4  ;;  %v4973_v57 = vadd.f32 %v4961_v11, %v7521_v12  ;;  %v5294_v4 = vpop.f32.mrf.mxu3 }
0x2018   :  { %v5242_v13 = vpop.f32.mrf.mxu0 }
0x2019   :  { %5777 = vmatmul.msk.f32.gmra.mxu0 %vm253_vm14, %v5242_v13 }
0x201e   :  { %v5268_v20 = vpop.f32.mrf.mxu2 }
0x201f   :  { %5763 = vmatmul.msk.f32.gmra.mxu1 %vm253_vm14, %v7556_v62 }
0x2021   :  { %v5326_v49 = vpop.f32.mrf.mxu0  ;;  %5778 = vmatmul.msk.f32.gmra.mxu0 %vm253_vm14, %v5268_v20 }
0x2022   :  { %v7610_v33 = vadd.f32 %v5326_v49, %v4973_v57  ;;  %v3739_v49 = vld [vmem:[#allocation5 + $0x1e8] sm:$0xff] }
0x2023   :  { %5506 = vmatpush.msrb.mxu1 %v3739_v49 }
0x2024   :  { %v5342_v18 = vsel %vm97_vm0, %v7610_v33, 0.0 }
0x2025   :  { %5343 = vadd.xlane.f32.xlu0 %v5342_v18  ;;  %v3738_v18 = vld [vmem:[#allocation5 + $0x1e0] sm:$0xff] }
0x2026   :  { %5507 = vmatpush.msrb.mxu1 %v3738_v18 }
0x2029   :  { %5779 = vmatmul.msk.f32.gmra.mxu0 %vm253_vm14, %v5294_v4  ;;  %v3737_v4 = vld [vmem:[#allocation5 + $0x1d8] sm:$0xff] }
0x202a   :  { %5508 = vmatpush.msrb.mxu1 %v3737_v4 }
0x208c   :  { %v4964_v51 = vpop.f32.mrf.mxu1 }
0x208d   :  { %v4974_v52 = vadd.f32 %v4964_v51, %v7526_v15  ;;  %v3736_v51 = vld [vmem:[#allocation5 + $0x1d0] sm:$0xff] }
0x208e   :  { %5509 = vmatpush.msrb.mxu1 %v3736_v51 }
0x2094   :  { %v4967_v12 = vpop.f32.mrf.mxu1 }
0x2095   :  { %v4975_v54 = vadd.f32 %v4967_v12, %v7532_v31  ;;  %v3735_v12 = vld [vmem:[#allocation5 + $0x1c8] sm:$0xff] }
0x2096   :  { %v5329_v36 = vpop.f32.mrf.mxu0  ;;  %5510 = vmatpush.msrb.mxu1 %v3735_v12 }
0x2097   :  { %v7616_v62 = vadd.f32 %v5329_v36, %v4974_v52 }
0x2098   :  { %v5344_v63 = vpop.xlane.xlu0 %5343 }
0x2099   :  { %v5354_v38 = vmul.f32 %v5344_v63, %v6224_v14  ;;  %v5345_v24 = vsel %vm97_vm0, %v7616_v62, 0.0 }
0x209a   :  { %5346 = vadd.xlane.f32.xlu1 %v5345_v24 }
0x209b   :  { %v5358_v3 = vsub.f32 %v7610_v33, %v5354_v38 }
0x209c   :  { %v4970_v23 = vpop.f32.mrf.mxu1 }
0x209d   :  { %v5362_v53 = vmul.f32 %v5358_v3, %v5358_v3  ;;  %v4976_v19 = vadd.f32 %v4970_v23, %v4611_v47 }
0x209e   :  { %v5332_v29 = vpop.f32.mrf.mxu0 }
0x209f   :  { %v7623_v5 = vadd.f32 %v5332_v29, %v4975_v54  ;;  %v5366_v15 = vsel %vm97_vm0, %v5362_v53, 0.0  ;;  %v3733_v53 = vld [vmem:[#allocation5 + $0x1b8] sm:$0xff] }
0x20a1   :  { %v5348_v7 = vsel %vm97_vm0, %v7623_v5, 0.0 }
0x20a2   :  { %5367 = vadd.xlane.f32.xlu1 %v5366_v15  ;;  %5349 = vadd.xlane.f32.xlu2 %v5348_v7  ;;  %v3732_v7 = vld [vmem:[#allocation5 + $0x1b0] sm:$0xff] }
0x20a6   :  { %v5335_v26 = vpop.f32.mrf.mxu0 }
0x20a7   :  { %v7630_v22 = vadd.f32 %v5335_v26, %v4976_v19 }
0x20a9   :  { %v5351_v31 = vsel %vm97_vm0, %v7630_v22, 0.0 }
0x20aa   :  { %5352 = vadd.xlane.f32.xlu0 %v5351_v31 }
0x210d   :  { %v5347_v30 = vpop.xlane.xlu1 %5346 }
0x210e   :  { %v5355_v43 = vmul.f32 %v5347_v30, %v6224_v14 }
0x2110   :  { %v7636_v42 = vsub.f32 %v7616_v62, %v5355_v43 }
0x2112   :  { %v5363_v0 = vmul.f32 %v7636_v42, %v7636_v42 }
0x2114   :  { %v5369_v28 = vsel %vm97_vm0, %v5363_v0, 0.0 }
0x2115   :  { %v5368_v35 = vpop.xlane.xlu1 %5367  ;;  %5370 = vadd.xlane.f32.xlu2 %v5369_v28  ;;  %v5350_v27 = vpop.xlane.xlu2 %5349 }
0x2116   :  { %v5378_v6 = vmul.f32 %v5368_v35, %v6224_v14  ;;  %v5356_v55 = vmul.f32 %v5350_v27, %v6224_v14 }
0x2118   :  { %v5382_v32 = vadd.f32 1e-05, %v5378_v6  ;;  %v7644_v48 = vsub.f32 %v7623_v5, %v5356_v55 }
0x211a   :  { %6077 = vrsqrt.f32 %v5382_v32  ;;  %v5364_v39 = vmul.f32 %v7644_v48, %v7644_v48  ;;  %vm5392_vm9 = vweird.f32 %v5382_v32 }
0x211c   :  { %v5372_v25 = vsel %vm97_vm0, %v5364_v39, 0.0 }
0x211d   :  { %5373 = vadd.xlane.f32.xlu0 %v5372_v25  ;;  %v5353_v16 = vpop.xlane.xlu0 %5352 }
0x211e   :  { %v5357_v59 = vmul.f32 %v5353_v16, %v6224_v14 }
0x2120   :  { %v6078_v56 = vpop.eup %6077  ;;  %v7651_v2 = vsub.f32 %v7630_v22, %v5357_v59 }
0x2121   :  { %v5387_v50 = vmul.f32 %v6078_v56, %v5382_v32  ;;  %vm5393_vm14 = vweird.f32 %v6078_v56 }
0x2122   :  { %v5365_v60 = vmul.f32 %v7651_v2, %v7651_v2  ;;  %vm5394_vm10 = vmor %vm5392_vm9, %vm5393_vm14 }
0x2123   :  { %v5388_v9 = vmul.f32 %v6078_v56, %v5387_v50 }
0x2124   :  { %v5375_v45 = vsel %vm97_vm0, %v5365_v60, 0.0 }
0x2125   :  { %v5389_v58 = vmul.f32 0.5, %v5388_v9  ;;  %5376 = vadd.xlane.f32.xlu1 %v5375_v45  ;;  %v5440_v9 = vperm.slane %v7656_v8, 6 }
0x2127   :  { %v5390_v44 = vsub.f32 1.5, %v5389_v58 }
0x2129   :  { %v5391_v10 = vmul.f32 %v6078_v56, %v5390_v44 }
0x212b   :  { %v5395_v61 = vsel %vm5394_vm10, %v6078_v56, %v5391_v10 }
0x212c   :  { %v5426_v21 = vmul.f32 %v5395_v61, %v5358_v3  ;;  %v3734_v3 = vld [vmem:[#allocation5 + $0x1c0] sm:$0xff] }
0x212d   :  { %5511 = vmatpush.msrb.mxu1 %v3734_v3 }
0x212e   :  { %v5431_v40 = vmul.f32 %v7659_v34, %v5426_v21 }
0x212f   :  { %5512 = vmatpush.msrb.mxu1 %v3733_v53 }
0x2130   :  { %v5436_v13 = vadd.f32 %v7662_v1, %v5431_v40 }
0x2131   :  { %5513 = vmatpush.msrb.mxu1 %v3732_v7 }
0x2132   :  { %5780 = vmatmul.msk.f32.vlgmr.msrb.gmra.mxu2 %vm97_vm0, %v5436_v13 }
0x2188   :  { %v5371_v11 = vpop.xlane.xlu2 %5370 }
0x2189   :  { %v5379_v57 = vmul.f32 %v5371_v11, %v6224_v14 }
0x218b   :  { %v5383_v20 = vadd.f32 1e-05, %v5379_v57 }
0x218d   :  { %6079 = vrsqrt.f32 %v5383_v20  ;;  %vm5402_vm11 = vweird.f32 %v5383_v20 }
0x2190   :  { %v5374_v52 = vpop.xlane.xlu0 %5373 }
0x2191   :  { %v5380_v36 = vmul.f32 %v5374_v52, %v6224_v14 }
0x2193   :  { %v6080_v63 = vpop.eup %6079  ;;  %v5384_v38 = vadd.f32 1e-05, %v5380_v36 }
0x2194   :  { %v5397_v24 = vmul.f32 %v6080_v63, %v5383_v20  ;;  %vm5403_vm8 = vweird.f32 %v6080_v63 }
0x2195   :  { %6081 = vrsqrt.f32 %v5384_v38  ;;  %vm5404_vm12 = vmor %vm5402_vm11, %vm5403_vm8  ;;  %vm5412_vm1 = vweird.f32 %v5384_v38 }
0x2196   :  { %v5398_v54 = vmul.f32 %v6080_v63, %v5397_v24 }
0x2198   :  { %v5399_v29 = vmul.f32 0.5, %v5398_v54  ;;  %v5377_v15 = vpop.xlane.xlu1 %5376 }
0x2199   :  { %v5381_v23 = vmul.f32 %v5377_v15, %v6224_v14 }
0x219a   :  { %v5400_v47 = vsub.f32 1.5, %v5399_v29 }
0x219b   :  { %v6082_v19 = vpop.eup %6081  ;;  %v5385_v26 = vadd.f32 1e-05, %v5381_v23 }
0x219c   :  { %v5401_v31 = vmul.f32 %v6080_v63, %v5400_v47  ;;  %v5407_v17 = vmul.f32 %v6082_v19, %v5384_v38  ;;  %vm5413_vm13 = vweird.f32 %v6082_v19 }
0x219d   :  { %6083 = vrsqrt.f32 %v5385_v26  ;;  %vm5414_vm4 = vmor %vm5412_vm1, %vm5413_vm13  ;;  %vm5422_vm7 = vweird.f32 %v5385_v26 }
0x219e   :  { %v5405_v30 = vsel %vm5404_vm12, %v6080_v63, %v5401_v31  ;;  %v5408_v41 = vmul.f32 %v6082_v19, %v5407_v17 }
0x219f   :  { %v5427_v43 = vmul.f32 %v5405_v30, %v7636_v42 }
0x21a0   :  { %v5409_v37 = vmul.f32 0.5, %v5408_v41 }
0x21a1   :  { %v5432_v46 = vmul.f32 %v7659_v34, %v5427_v43 }
0x21a2   :  { %v5410_v0 = vsub.f32 1.5, %v5409_v37 }
0x21a3   :  { %v6084_v14 = vpop.eup %6083  ;;  %v5437_v28 = vadd.f32 %v7662_v1, %v5432_v46 }
0x21a4   :  { %v5411_v35 = vmul.f32 %v6082_v19, %v5410_v0  ;;  %v5417_v27 = vmul.f32 %v6084_v14, %v5385_v26  ;;  %vm5423_vm5 = vweird.f32 %v6084_v14 }
0x21a5   :  { %5781 = vmatmul.msk.f32.gmra.mxu2 %vm97_vm0, %v5437_v28  ;;  %vm5424_vm2 = vmor %vm5422_vm7, %vm5423_vm5 }
0x21a6   :  { %v5415_v6 = vsel %vm5414_vm4, %v6082_v19, %v5411_v35  ;;  %v5418_v55 = vmul.f32 %v6084_v14, %v5417_v27 }
0x21a7   :  { %v5428_v32 = vmul.f32 %v5415_v6, %v7644_v48 }
0x21a8   :  { %v5419_v39 = vmul.f32 0.5, %v5418_v55 }
0x21a9   :  { %v5433_v42 = vmul.f32 %v7659_v34, %v5428_v32 }
0x21aa   :  { %v5420_v25 = vsub.f32 1.5, %v5419_v39 }
0x21ab   :  { %v5438_v16 = vadd.f32 %v7662_v1, %v5433_v42 }
0x21ac   :  { %v5421_v59 = vmul.f32 %v6084_v14, %v5420_v25 }
0x21ad   :  { %5782 = vmatmul.msk.f32.gmra.mxu2 %vm97_vm0, %v5438_v16 }
0x21ae   :  { %v5425_v56 = vsel %vm5424_vm2, %v6084_v14, %v5421_v59 }
0x21af   :  { %v5429_v50 = vmul.f32 %v5425_v56, %v7651_v2 }
0x21b1   :  { %v5434_v60 = vmul.f32 %v7659_v34, %v5429_v50  ;;  %v5531_v34 = vperm.slane %v7656_v8, 7 }
0x21b3   :  { %v5439_v48 = vadd.f32 %v7662_v1, %v5434_v60 }
0x21b5   :  { %v5470_v45 = vpop.f32.mrf.mxu2  ;;  %5783 = vmatmul.msk.f32.gmra.mxu2 %vm97_vm0, %v5439_v48 }
0x21b6   :  { %v5471_v58 = vadd.f32 %v5470_v45, %v5440_v9 }
0x21b8   :  { %v5482_v44 = vmax.f32 %v5471_v58, 0.0 }
0x21ba   :  { %5784 = vmatmul.msk.f32.vlgmr.msrb.gmra.mxu1 %vm1851_vm15, %v5482_v44 }
0x2228   :  { %v5473_v10 = vpop.f32.mrf.mxu2 }
0x2229   :  { %v5474_v61 = vadd.f32 %v5473_v10, %v5440_v9 }
0x222b   :  { %v5483_v21 = vmax.f32 %v5474_v61, 0.0 }
0x222d   :  { %5785 = vmatmul.msk.f32.gmra.mxu1 %vm1851_vm15, %v5483_v21 }
0x2230   :  { %v5476_v40 = vpop.f32.mrf.mxu2 }
0x2231   :  { %v5477_v2 = vadd.f32 %v5476_v40, %v5440_v9 }
0x2233   :  { %v5484_v13 = vmax.f32 %v5477_v2, 0.0 }
0x2235   :  { %5786 = vmatmul.msk.f32.gmra.mxu1 %vm1851_vm15, %v5484_v13 }
0x2237   :  { %v5515_v1 = vpop.f32.mrf.mxu1 }
0x2238   :  { %v5527_v11 = vadd.f32 %v5515_v1, %v7610_v33  ;;  %v5479_v57 = vpop.f32.mrf.mxu2 }
0x2239   :  { %v5480_v20 = vadd.f32 %v5479_v57, %v5440_v9 }
0x223a   :  { %v5532_v49 = vadd.f32 %v5531_v34, %v5527_v11 }
0x223b   :  { %v5485_v18 = vmax.f32 %v5480_v20, 0.0 }
0x223c   :  { %5536 = vst.msk [vmem:[#allocation7] sm:$0xff] %vm97_vm0, %v5532_v49 }
0x223d   :  { %5787 = vmatmul.msk.f32.gmra.mxu1 %vm1851_vm15, %v5485_v18 }
0x22aa   :  { %v5518_v4 = vpop.f32.mrf.mxu1 }
0x22ab   :  { %v5528_v51 = vadd.f32 %v5518_v4, %v7616_v62 }
0x22ad   :  { %v5533_v52 = vadd.f32 %v5531_v34, %v5528_v51 }
0x22af   :  { %5537 = vst.msk [vmem:[#allocation7 + $0x8] sm:$0xff] %vm97_vm0, %v5533_v52 }
0x22b2   :  { %v5521_v36 = vpop.f32.mrf.mxu1 }
0x22b3   :  { %v5529_v8 = vadd.f32 %v5521_v36, %v7623_v5 }
0x22b5   :  { %v5534_v12 = vadd.f32 %v5531_v34, %v5529_v8 }
0x22b7   :  { %5538 = vst.msk [vmem:[#allocation7 + $0x10] sm:$0xff] %vm97_vm0, %v5534_v12 }
0x22ba   :  { %v5524_v33 = vpop.f32.mrf.mxu1 }
0x22bb   :  { %v5530_v63 = vadd.f32 %v5524_v33, %v7630_v22 }
0x22bd   :  { %v5535_v38 = vadd.f32 %v5531_v34, %v5530_v63 }
0x22bf   :  { %5539 = vst.msk [vmem:[#allocation7 + $0x18] sm:$0xff] %vm97_vm0, %v5535_v38 }
0x22c0   :  { %5552 = dma.vmem_to_hbm [thread:$0]  %s5545_s8, 512, %s5547_s11, [#allocation4], %s6171_s20, %s6171_s20, %s6172_s21  }
0x22c1   :  { %6168 = dma.done.wait [#allocation4], 512  }
0x22c2   :  { %6169 = vsyncadd [#allocation4], 4294966784 }
0x22c3   :  { %5557 = vsyncpa [#allocation3], 1 }
0x22c4   :  { %5558 = vsyncpa [#allocation6], 1 }
0x22c5   :  { %5559 = vsyncpa [#allocation4], 1 }

</bundles_post_ra>
